<compile_context>
chip_gen: v6e
topology: v6e:2x2x1
jax: 0.10.0
libtpu: 0.0.40
codegen_flags: <defaults>
</compile_context>

<pallas_src>
import math
import functools

import jax
import jax.numpy as jnp
from jax.experimental import pallas as pl
from jax.experimental.pallas import tpu as pltpu


# ------------------------------ tiling helpers ------------------------------

def _round_up(v, m):
    return (v + m - 1) // m * m


def _tile_and_pad(dim, pref, align):
    """Pick a TPU-friendly tile and the zero-padded extent for `dim`."""
    if dim <= pref:
        t = _round_up(dim, align)
        return t, t
    for t in (pref, pref // 2):
        if t >= align and dim % t == 0:
            return t, dim
    return pref, _round_up(dim, pref)


def _pad2d(a, rows, cols):
    r, c = a.shape
    if r == rows and c == cols:
        return a
    return jnp.pad(a, ((0, rows - r), (0, cols - c)))


# ------------------------- tiled matmul (+activation) -----------------------

def _matmul_kernel(x_ref, w_ref, b_ref, o_ref, acc_ref, *, activation):
    @pl.when(pl.program_id(2) == 0)
    def _init():
        acc_ref[...] = jnp.zeros_like(acc_ref)

    acc_ref[...] += jnp.dot(x_ref[...], w_ref[...],
                            preferred_element_type=jnp.float32)

    @pl.when(pl.program_id(2) == pl.num_programs(2) - 1)
    def _finalize():
        h = acc_ref[...] + b_ref[...]
        if activation == "gelu":
            h = jax.nn.gelu(h, approximate=True)        # tanh approx (EUP)
        elif activation == "silu":
            h = h * jax.nn.sigmoid(h)
        o_ref[...] = h.astype(o_ref.dtype)


def matmul_pallas(x, w, b, *, activation=None, out_dtype=jnp.bfloat16):
    """y = act(x @ w + b); bf16 MXU operands, f32 accumulation, tiled."""
    M, K = x.shape
    N = w.shape[1]
    tm, Mp = _tile_and_pad(M, 256, 8)
    tn, Np = _tile_and_pad(N, 256, 128)
    tk, Kp = _tile_and_pad(K, 512, 128)

    xp = _pad2d(x, Mp, Kp).astype(jnp.bfloat16)
    wp = _pad2d(w, Kp, Np).astype(jnp.bfloat16)
    bp = _pad2d(b.reshape(1, -1).astype(jnp.float32), 1, Np)

    out = pl.pallas_call(
        functools.partial(_matmul_kernel, activation=activation),
        out_shape=jax.ShapeDtypeStruct((Mp, Np), out_dtype),
        grid=(Mp // tm, Np // tn, Kp // tk),
        in_specs=[pl.BlockSpec((tm, tk), lambda i, j, k: (i, k)),
                  pl.BlockSpec((tk, tn), lambda i, j, k: (k, j)),
                  pl.BlockSpec((1, tn), lambda i, j, k: (0, j))],
        out_specs=pl.BlockSpec((tm, tn), lambda i, j, k: (i, j)),
        scratch_shapes=[pltpu.VMEM((tm, tn), jnp.float32)],
        compiler_params=pltpu.CompilerParams(
            dimension_semantics=("parallel", "parallel", "arbitrary")),
    )(xp, wp, bp)
    if (Mp, Np) != (M, N):
        out = out[:M, :N]
    return out


# ----------------- tiled matmul + bias + residual + LayerNorm ---------------

def _matmul_res_ln_kernel(x_ref, w_ref, b_ref, r_ref, g_ref, be_ref,
                          o_ref, acc_ref, *, eps):
    @pl.when(pl.program_id(1) == 0)
    def _init():
        acc_ref[...] = jnp.zeros_like(acc_ref)

    acc_ref[...] += jnp.dot(x_ref[...], w_ref[...],
                            preferred_element_type=jnp.float32)

    @pl.when(pl.program_id(1) == pl.num_programs(1) - 1)
    def _finalize():
        h = acc_ref[...] + b_ref[...] + r_ref[...].astype(jnp.float32)
        mu = jnp.mean(h, axis=-1, keepdims=True)
        xc = h - mu
        var = jnp.mean(xc * xc, axis=-1, keepdims=True)
        y = xc * jax.lax.rsqrt(var + eps)
        o_ref[...] = (y * g_ref[...] + be_ref[...]).astype(o_ref.dtype)


def matmul_residual_ln_pallas(x, w, b, residual, gamma, beta,
                              *, eps=1e-5, out_dtype=None):
    """LayerNorm(x @ w + b + residual) -- post-norm transformer epilogue."""
    M, K = x.shape
    N = w.shape[1]                       # LN dim kept whole (un-tiled)
    out_dtype = out_dtype or residual.dtype
    tm, Mp = _tile_and_pad(M, 256, 8)
    tk, Kp = _tile_and_pad(K, 512, 128)

    xp = _pad2d(x, Mp, Kp).astype(jnp.bfloat16)
    wp = _pad2d(w, Kp, N).astype(jnp.bfloat16)
    rp = _pad2d(residual, Mp, N)
    bp = b.reshape(1, N).astype(jnp.float32)
    gp = gamma.reshape(1, N).astype(jnp.float32)
    bep = beta.reshape(1, N).astype(jnp.float32)

    out = pl.pallas_call(
        functools.partial(_matmul_res_ln_kernel, eps=eps),
        out_shape=jax.ShapeDtypeStruct((Mp, N), out_dtype),
        grid=(Mp // tm, Kp // tk),
        in_specs=[pl.BlockSpec((tm, tk), lambda i, k: (i, k)),
                  pl.BlockSpec((tk, N), lambda i, k: (k, 0)),
                  pl.BlockSpec((1, N), lambda i, k: (0, 0)),
                  pl.BlockSpec((tm, N), lambda i, k: (i, 0)),   # resident (idx const)
                  pl.BlockSpec((1, N), lambda i, k: (0, 0)),
                  pl.BlockSpec((1, N), lambda i, k: (0, 0))],
        out_specs=pl.BlockSpec((tm, N), lambda i, k: (i, 0)),
        scratch_shapes=[pltpu.VMEM((tm, N), jnp.float32)],
        compiler_params=pltpu.CompilerParams(
            dimension_semantics=("parallel", "arbitrary")),
    )(xp, wp, bp, rp, gp, bep)
    return out[:M] if Mp != M else out


# --------------------- cross-stream multi-head attention --------------------

def _mha_cross_kernel(q_ref, ks_ref, kp_ref, vs_ref, vp_ref, bias_ref, o_ref,
                      *, num_heads, scale):
    # Fold the 1/sqrt(dh) scale into Q once (single [S,D] vmul) instead of
    # scaling every [S,S] score tile twice per head.
    q = (q_ref[0].astype(jnp.float32) * scale).astype(jnp.bfloat16)   # [S, D]
    ks, kp = ks_ref[0], kp_ref[0]             # self / partner keys
    vs, vp = vs_ref[0], vp_ref[0]
    bias = bias_ref[0].astype(jnp.float32)    # [1, S] (0 or -1e9)
    S, D = q.shape
    dh = D // num_heads
    dn = (((1,), (1,)), ((), ()))             # A @ B^T

    outs = []
    for hd in range(num_heads):               # dh==128 in the real model -> lane-aligned slices
        sl = slice(hd * dh, (hd + 1) * dh)
        qh = q[:, sl]
        ss = jax.lax.dot_general(qh, ks[:, sl], dn,
                                 preferred_element_type=jnp.float32) + bias
        sp = jax.lax.dot_general(qh, kp[:, sl], dn,
                                 preferred_element_type=jnp.float32) + bias
        m = jnp.maximum(jnp.max(ss, axis=-1, keepdims=True),
                        jnp.max(sp, axis=-1, keepdims=True))
        ps = jnp.exp(ss - m)
        pp = jnp.exp(sp - m)
        inv = pl.reciprocal(jnp.sum(ps, axis=-1, keepdims=True)
                            + jnp.sum(pp, axis=-1, keepdims=True), approx=True)
        acc = jnp.dot(ps.astype(vs.dtype), vs[:, sl],
                      preferred_element_type=jnp.float32)
        acc += jnp.dot(pp.astype(vp.dtype), vp[:, sl],
                       preferred_element_type=jnp.float32)
        outs.append((acc * inv).astype(o_ref.dtype))
    o_ref[0] = jnp.concatenate(outs, axis=-1)   # single lane-dense store


def mha_cross_pallas(qkv, bias, *, num_heads, batch):
    """qkv: [2B, S, 3D] fused projections (streams stacked along batch);
    each stacked batch element attends over concat(self, partner) keys where
    partner = (b + B) % 2B.  bias: [2B, 1, S] additive key-padding bias."""
    twoB, S, threeD = qkv.shape
    D = threeD // 3
    assert D % 128 == 0, "latent_dim must be a multiple of 128 (lane width)"
    scale = 1.0 / math.sqrt(D // num_heads)

    return pl.pallas_call(
        functools.partial(_mha_cross_kernel, num_heads=num_heads, scale=scale),
        out_shape=jax.ShapeDtypeStruct((twoB, S, D), qkv.dtype),
        grid=(twoB,),
        in_specs=[
            pl.BlockSpec((1, S, D), lambda b: (b, 0, 0)),                   # Q
            pl.BlockSpec((1, S, D), lambda b: (b, 0, 1)),                   # K self
            pl.BlockSpec((1, S, D), lambda b: ((b + batch) % twoB, 0, 1)),  # K partner
            pl.BlockSpec((1, S, D), lambda b: (b, 0, 2)),                   # V self
            pl.BlockSpec((1, S, D), lambda b: ((b + batch) % twoB, 0, 2)),  # V partner
            pl.BlockSpec((1, 1, S), lambda b: (b, 0, 0)),                   # bias
        ],
        out_specs=pl.BlockSpec((1, S, D), lambda b: (b, 0, 0)),
        compiler_params=pltpu.CompilerParams(dimension_semantics=("parallel",)),
    )(qkv, qkv, qkv, qkv, qkv, bias)


# ------------------------------- model glue --------------------------------

def embed_timestep(params, timesteps):
    # TimestepEmbedder: pe[t] -> Linear -> SiLU -> Linear (tiny; kept f32)
    pe_t = params['pe'][timesteps]                                   # [B, D]
    h = matmul_pallas(pe_t, params['time_w1'], params['time_b1'],
                      activation='silu', out_dtype=jnp.float32)
    return matmul_pallas(h, params['time_w2'], params['time_b2'],
                         out_dtype=jnp.float32)


def encoder_layer(lp, h, bias2, *, num_heads, batch):
    twoB, S, D = h.shape
    h2d = h.reshape(twoB * S, D)
    # fused QKV projection (shared weights, both streams at once)
    qkv = matmul_pallas(h2d, lp['wqkv'], lp['bqkv'],
                        out_dtype=h.dtype).reshape(twoB, S, 3 * D)
    attn = mha_cross_pallas(qkv, bias2, num_heads=num_heads, batch=batch)
    # attn out-projection + residual + LayerNorm fused (post-norm)
    h2d = matmul_residual_ln_pallas(attn.reshape(twoB * S, D), lp['wo'], lp['bo'],
                                    h2d, lp['ln1_g'], lp['ln1_b'])
    # FFN: (x@w1 + b1) -> GELU fused, then w2 + residual + LayerNorm fused
    ff = matmul_pallas(h2d, lp['w1'], lp['b1'], activation='gelu',
                       out_dtype=h2d.dtype)
    h2d = matmul_residual_ln_pallas(ff, lp['w2'], lp['b2'],
                                    h2d, lp['ln2_g'], lp['ln2_b'])
    return h2d.reshape(twoB, S, D)


def mdm_simetric_forward(params, x, timesteps, enc_text, frame_mask, *, num_heads):
    """x: [B, 2F, 1, T]; timesteps: [B] int; enc_text: [B, clip_dim];
    frame_mask: [B, 1, 1, T] bool (True = valid frame)."""
    B, twoF, _, T = x.shape
    F_ = twoF // 2
    S = T + 1
    D = params['pe'].shape[1]
    act_dt = jnp.bfloat16

    # conditioning (hoisted: identical for both streams; eval -> no cond mask)
    emb = embed_timestep(params, timesteps)
    emb = emb + matmul_pallas(enc_text, params['text_w'], params['text_b'],
                              out_dtype=jnp.float32)                 # [B, D]

    # input process, both streams stacked along batch
    xm1 = jnp.transpose(x[:, :F_, 0, :], (0, 2, 1))                  # [B, T, F]
    xm2 = jnp.transpose(x[:, F_:, 0, :], (0, 2, 1))
    xm = jnp.concatenate([xm1, xm2], axis=0).reshape(2 * B * T, F_)
    xp = matmul_pallas(xm, params['in_w'], params['in_b'],
                       out_dtype=jnp.float32).reshape(2 * B, T, D)

    emb2 = jnp.tile(emb, (2, 1))[:, None, :]                         # [2B, 1, D]
    h = jnp.concatenate([emb2, xp], axis=1)                          # [2B, S, D]
    h = (h + params['pe'][None, :S, :]).astype(act_dt)               # PE (eval: no dropout)

    # _create_mask: True == padding; prepend always-valid timestep token
    pad = jnp.logical_not(frame_mask[:, 0, 0, :])                    # [B, T]
    mask = jnp.concatenate([jnp.zeros((B, 1), dtype=bool), pad], axis=1)
    bias = jnp.where(mask, -1e9, 0.0).astype(jnp.float32)[:, None, :]
    bias2 = jnp.tile(bias, (2, 1, 1))                                # [2B, 1, S]

    for lp in params['layers']:
        h = encoder_layer(lp, h, bias2, num_heads=num_heads, batch=B)

    # output process: drop timestep token, single lane-dense matmul for both streams
    ho = h[:, 1:, :].reshape(2 * B * T, D)
    o = matmul_pallas(ho, params['out_w'], params['out_b'],
                      out_dtype=jnp.float32)                          # [2B*T, F]
    o = jnp.transpose(o.reshape(2, B, T, F_), (0, 1, 3, 2))           # [2, B, F, T]
    return jnp.concatenate([o[0][:, :, None, :], o[1][:, :, None, :]],
                           axis=1)                                    # [B, 2F, 1, T]


# ----------------------------- parameter init ------------------------------

def init_params(key, *, D, F_, clip_dim, ff, num_layers, max_len):
    wdt = jnp.bfloat16     # matmul weights stored bf16 (MXU + halved HBM traffic)

    def nrm(k, shape):
        return (jax.random.normal(k, shape, jnp.float32) * 0.02).astype(wdt)

    keys = jax.random.split(key, 8 + num_layers)

    pos = jnp.arange(max_len, dtype=jnp.float32)[:, None]
    div = jnp.exp(jnp.arange(0, D, 2, dtype=jnp.float32) *
                  (-math.log(10000.0) / D))
    pe = jnp.zeros((max_len, D), jnp.float32)
    pe = pe.at[:, 0::2].set(jnp.sin(pos * div))
    pe = pe.at[:, 1::2].set(jnp.cos(pos * div))

    p = {
        'pe': pe,
        'time_w1': nrm(keys[0], (D, D)), 'time_b1': jnp.zeros((D,), jnp.float32),
        'time_w2': nrm(keys[1], (D, D)), 'time_b2': jnp.zeros((D,), jnp.float32),
        'text_w': nrm(keys[2], (clip_dim, D)), 'text_b': jnp.zeros((D,), jnp.float32),
        'in_w': nrm(keys[3], (F_, D)), 'in_b': jnp.zeros((D,), jnp.float32),
        'out_w': nrm(keys[4], (D, F_)), 'out_b': jnp.zeros((F_,), jnp.float32),
        'layers': [],
    }
    for l in range(num_layers):
        lk = jax.random.split(keys[8 + l], 4)
        p['layers'].append({
            'wqkv': nrm(lk[0], (D, 3 * D)), 'bqkv': jnp.zeros((3 * D,), jnp.float32),
            'wo': nrm(lk[1], (D, D)), 'bo': jnp.zeros((D,), jnp.float32),
            'w1': nrm(lk[2], (D, ff)), 'b1': jnp.zeros((ff,), jnp.float32),
            'w2': nrm(lk[3], (ff, D)), 'b2': jnp.zeros((D,), jnp.float32),
            'ln1_g': jnp.ones((D,), jnp.float32), 'ln1_b': jnp.zeros((D,), jnp.float32),
            'ln2_g': jnp.ones((D,), jnp.float32), 'ln2_b': jnp.zeros((D,), jnp.float32),
        })
    return p


# ---------------------------------- main ------------------------------------

if __name__ == "__main__":
    # small synthetic shapes; D/H chosen so head_dim = 128 (lane-aligned head
    # slices, matching the real model's latent_dim=1024 / num_heads=8 ratio)
    B, F_, T = 2, 8, 8            # batch, per-stream features, frames
    D, H, FF, L = 256, 2, 512, 2  # latent, heads, ff_size, layers
    CLIP = 64                     # clip_dim
    MAX_LEN = 64

    key = jax.random.PRNGKey(0)
    kp, kx, kt, ktxt = jax.random.split(key, 4)

    params = init_params(kp, D=D, F_=F_, clip_dim=CLIP, ff=FF,
                         num_layers=L, max_len=MAX_LEN)

    x = jax.random.normal(kx, (B, 2 * F_, 1, T), jnp.float32)
    timesteps = jax.random.randint(kt, (B,), 0, MAX_LEN)
    enc_text = jax.random.normal(ktxt, (B, CLIP), jnp.float32)
    # y['mask']: True = valid frame; last 2 frames of batch 1 padded
    frame_mask = jnp.ones((B, 1, 1, T), dtype=bool).at[1, 0, 0, T - 2:].set(False)

    fwd = jax.jit(functools.partial(mdm_simetric_forward, num_heads=H))
    out = fwd(params, x, timesteps, enc_text, frame_mask)
    out = jax.block_until_ready(out)
    assert out.shape == (B, 2 * F_, 1, T), out.shape
    assert bool(jnp.all(jnp.isfinite(out.astype(jnp.float32))))
    print("KERNEL_OK")
</pallas_src>

<mosaic_0001>
module attributes {stable_mosaic.version = 11 : i64} {
  func.func @_matmul_kernel(%arg0: i32, %arg1: i32, %arg2: i32, %arg3: memref<32x128xbf16, #tpu.memory_space<vmem>>, %arg4: memref<128x256xbf16, #tpu.memory_space<vmem>>, %arg5: memref<1x256xf32, #tpu.memory_space<vmem>>, %arg6: memref<32x256xf32, #tpu.memory_space<vmem>>, %arg7: memref<32x256xf32, #tpu.memory_space<vmem>>) attributes {dimension_semantics = [#tpu.dimension_semantics<parallel>, #tpu.dimension_semantics<parallel>, #tpu.dimension_semantics<arbitrary>], iteration_bounds = array<i64: 1, 1, 1>, scalar_prefetch = 0 : i64, scratch_operands = 1 : i64, tpu.core_type = #tpu.core_type<tc>, window_params = [{transform_indices = @transform_0, window_bounds = array<i64: 32, 128>}, {transform_indices = @transform_1, window_bounds = array<i64: 128, 256>}, {transform_indices = @transform_2, window_bounds = array<i64: 1, 256>}, {transform_indices = @transform_3, window_bounds = array<i64: 32, 256>}]} {
    %c0_i32 = arith.constant 0 : i32
    %0 = arith.cmpi eq, %arg2, %c0_i32 : i32
    %1 = arith.extui %0 : i1 to i32
    %c0_i32_0 = arith.constant 0 : i32
    %2 = arith.cmpi ne, %1, %c0_i32_0 : i32
    scf.if %2 {
      %cst_10 = arith.constant 0.000000e+00 : f32
      %12 = vector.broadcast %cst_10 : f32 to vector<32x256xf32>
      %c0_11 = arith.constant 0 : index
      %c0_12 = arith.constant 0 : index
      %13 = vector.load %arg7[%c0_11, %c0_12] : memref<32x256xf32, #tpu.memory_space<vmem>>, vector<32x256xf32>
      tpu.vector_store %arg7[%c0_11, %c0_12], %12 {strides = array<i32>} : memref<32x256xf32, #tpu.memory_space<vmem>>, vector<32x256xf32>,
    } else {
    }
    %c0 = arith.constant 0 : index
    %c0_1 = arith.constant 0 : index
    %3 = vector.load %arg7[%c0, %c0_1] : memref<32x256xf32, #tpu.memory_space<vmem>>, vector<32x256xf32>
    %c0_2 = arith.constant 0 : index
    %c0_3 = arith.constant 0 : index
    %4 = vector.load %arg3[%c0_2, %c0_3] : memref<32x128xbf16, #tpu.memory_space<vmem>>, vector<32x128xbf16>
    %c0_4 = arith.constant 0 : index
    %c0_5 = arith.constant 0 : index
    %5 = vector.load %arg4[%c0_4, %c0_5] : memref<128x256xbf16, #tpu.memory_space<vmem>>, vector<128x256xbf16>
    %cst = arith.constant dense<0.000000e+00> : vector<32x256xf32>
    %6 = tpu.matmul %4, %5, %cst {dimension_numbers = #tpu.dot_dimension_numbers<[1], [0], [0], [1], [0, 0, 1, 1], [], []>} : vector<32x128xbf16>, vector<128x256xbf16>, vector<32x256xf32> -> vector<32x256xf32>
    %7 = arith.addf %3, %6 : vector<32x256xf32>
    %c0_6 = arith.constant 0 : index
    %c0_7 = arith.constant 0 : index
    %8 = vector.load %arg7[%c0_6, %c0_7] : memref<32x256xf32, #tpu.memory_space<vmem>>, vector<32x256xf32>
    tpu.vector_store %arg7[%c0_6, %c0_7], %7 {strides = array<i32>} : memref<32x256xf32, #tpu.memory_space<vmem>>, vector<32x256xf32>,
    %c0_i32_8 = arith.constant 0 : i32
    %9 = arith.cmpi eq, %arg2, %c0_i32_8 : i32
    %10 = arith.extui %9 : i1 to i32
    %c0_i32_9 = arith.constant 0 : i32
    %11 = arith.cmpi ne, %10, %c0_i32_9 : i32
    scf.if %11 {
      %c0_10 = arith.constant 0 : index
      %c0_11 = arith.constant 0 : index
      %12 = vector.load %arg7[%c0_10, %c0_11] : memref<32x256xf32, #tpu.memory_space<vmem>>, vector<32x256xf32>
      %c0_12 = arith.constant 0 : index
      %c0_13 = arith.constant 0 : index
      %13 = vector.load %arg5[%c0_12, %c0_13] : memref<1x256xf32, #tpu.memory_space<vmem>>, vector<1x256xf32>
      %14 = vector.broadcast %13 : vector<1x256xf32> to vector<32x256xf32>
      %15 = arith.addf %12, %14 : vector<32x256xf32>
      %c0_14 = arith.constant 0 : index
      %c0_15 = arith.constant 0 : index
      %16 = vector.load %arg6[%c0_14, %c0_15] : memref<32x256xf32, #tpu.memory_space<vmem>>, vector<32x256xf32>
      tpu.vector_store %arg6[%c0_14, %c0_15], %15 {strides = array<i32>} : memref<32x256xf32, #tpu.memory_space<vmem>>, vector<32x256xf32>,
    } else {
    }
    return
  }
  func.func @transform_0(%arg0: i32, %arg1: i32, %arg2: i32) -> (i32, i32) {
    %c0_i32 = arith.constant 0 : i32
    return %arg0, %arg2 : i32, i32
  }
  func.func @transform_1(%arg0: i32, %arg1: i32, %arg2: i32) -> (i32, i32) {
    %c0_i32 = arith.constant 0 : i32
    return %arg2, %arg1 : i32, i32
  }
  func.func @transform_2(%arg0: i32, %arg1: i32, %arg2: i32) -> (i32, i32) {
    %c0_i32 = arith.constant 0 : i32
    %c0_i32_0 = arith.constant 0 : i32
    return %c0_i32, %arg1 : i32, i32
  }
  func.func @transform_3(%arg0: i32, %arg1: i32, %arg2: i32) -> (i32, i32) {
    %c0_i32 = arith.constant 0 : i32
    return %arg0, %arg1 : i32, i32
  }
}

module attributes {stable_mosaic.version = 11 : i64} {
  func.func @_matmul_kernel(%arg0: i32, %arg1: i32, %arg2: i32, %arg3: memref<8x128xbf16, #tpu.memory_space<vmem>>, %arg4: memref<128x256xbf16, #tpu.memory_space<vmem>>, %arg5: memref<1x256xf32, #tpu.memory_space<vmem>>, %arg6: memref<8x256xf32, #tpu.memory_space<vmem>>, %arg7: memref<8x256xf32, #tpu.memory_space<vmem>>) attributes {dimension_semantics = [#tpu.dimension_semantics<parallel>, #tpu.dimension_semantics<parallel>, #tpu.dimension_semantics<arbitrary>], iteration_bounds = array<i64: 1, 1, 1>, scalar_prefetch = 0 : i64, scratch_operands = 1 : i64, tpu.core_type = #tpu.core_type<tc>, window_params = [{transform_indices = @transform_0, window_bounds = array<i64: 8, 128>}, {transform_indices = @transform_1, window_bounds = array<i64: 128, 256>}, {transform_indices = @transform_2, window_bounds = array<i64: 1, 256>}, {transform_indices = @transform_3, window_bounds = array<i64: 8, 256>}]} {
    %c0_i32 = arith.constant 0 : i32
    %0 = arith.cmpi eq, %arg2, %c0_i32 : i32
    %1 = arith.extui %0 : i1 to i32
    %c0_i32_0 = arith.constant 0 : i32
    %2 = arith.cmpi ne, %1, %c0_i32_0 : i32
    scf.if %2 {
      %cst_10 = arith.constant 0.000000e+00 : f32
      %12 = vector.broadcast %cst_10 : f32 to vector<8x256xf32>
      %c0_11 = arith.constant 0 : index
      %c0_12 = arith.constant 0 : index
      %13 = vector.load %arg7[%c0_11, %c0_12] : memref<8x256xf32, #tpu.memory_space<vmem>>, vector<8x256xf32>
      tpu.vector_store %arg7[%c0_11, %c0_12], %12 {strides = array<i32>} : memref<8x256xf32, #tpu.memory_space<vmem>>, vector<8x256xf32>,
    } else {
    }
    %c0 = arith.constant 0 : index
    %c0_1 = arith.constant 0 : index
    %3 = vector.load %arg7[%c0, %c0_1] : memref<8x256xf32, #tpu.memory_space<vmem>>, vector<8x256xf32>
    %c0_2 = arith.constant 0 : index
    %c0_3 = arith.constant 0 : index
    %4 = vector.load %arg3[%c0_2, %c0_3] : memref<8x128xbf16, #tpu.memory_space<vmem>>, vector<8x128xbf16>
    %c0_4 = arith.constant 0 : index
    %c0_5 = arith.constant 0 : index
    %5 = vector.load %arg4[%c0_4, %c0_5] : memref<128x256xbf16, #tpu.memory_space<vmem>>, vector<128x256xbf16>
    %cst = arith.constant dense<0.000000e+00> : vector<8x256xf32>
    %6 = tpu.matmul %4, %5, %cst {dimension_numbers = #tpu.dot_dimension_numbers<[1], [0], [0], [1], [0, 0, 1, 1], [], []>} : vector<8x128xbf16>, vector<128x256xbf16>, vector<8x256xf32> -> vector<8x256xf32>
    %7 = arith.addf %3, %6 : vector<8x256xf32>
    %c0_6 = arith.constant 0 : index
    %c0_7 = arith.constant 0 : index
    %8 = vector.load %arg7[%c0_6, %c0_7] : memref<8x256xf32, #tpu.memory_space<vmem>>, vector<8x256xf32>
    tpu.vector_store %arg7[%c0_6, %c0_7], %7 {strides = array<i32>} : memref<8x256xf32, #tpu.memory_space<vmem>>, vector<8x256xf32>,
    %c0_i32_8 = arith.constant 0 : i32
    %9 = arith.cmpi eq, %arg2, %c0_i32_8 : i32
    %10 = arith.extui %9 : i1 to i32
    %c0_i32_9 = arith.constant 0 : i32
    %11 = arith.cmpi ne, %10, %c0_i32_9 : i32
    scf.if %11 {
      %c0_10 = arith.constant 0 : index
      %c0_11 = arith.constant 0 : index
      %12 = vector.load %arg7[%c0_10, %c0_11] : memref<8x256xf32, #tpu.memory_space<vmem>>, vector<8x256xf32>
      %c0_12 = arith.constant 0 : index
      %c0_13 = arith.constant 0 : index
      %13 = vector.load %arg5[%c0_12, %c0_13] : memref<1x256xf32, #tpu.memory_space<vmem>>, vector<1x256xf32>
      %14 = vector.broadcast %13 : vector<1x256xf32> to vector<8x256xf32>
      %15 = arith.addf %12, %14 : vector<8x256xf32>
      %c0_14 = arith.constant 0 : index
      %c0_15 = arith.constant 0 : index
      %16 = vector.load %arg6[%c0_14, %c0_15] : memref<8x256xf32, #tpu.memory_space<vmem>>, vector<8x256xf32>
      tpu.vector_store %arg6[%c0_14, %c0_15], %15 {strides = array<i32>} : memref<8x256xf32, #tpu.memory_space<vmem>>, vector<8x256xf32>,
    } else {
    }
    return
  }
  func.func @transform_0(%arg0: i32, %arg1: i32, %arg2: i32) -> (i32, i32) {
    %c0_i32 = arith.constant 0 : i32
    return %arg0, %arg2 : i32, i32
  }
  func.func @transform_1(%arg0: i32, %arg1: i32, %arg2: i32) -> (i32, i32) {
    %c0_i32 = arith.constant 0 : i32
    return %arg2, %arg1 : i32, i32
  }
  func.func @transform_2(%arg0: i32, %arg1: i32, %arg2: i32) -> (i32, i32) {
    %c0_i32 = arith.constant 0 : i32
    %c0_i32_0 = arith.constant 0 : i32
    return %c0_i32, %arg1 : i32, i32
  }
  func.func @transform_3(%arg0: i32, %arg1: i32, %arg2: i32) -> (i32, i32) {
    %c0_i32 = arith.constant 0 : i32
    return %arg0, %arg1 : i32, i32
  }
}

module attributes {stable_mosaic.version = 11 : i64} {
  func.func @_matmul_kernel(%arg0: i32, %arg1: i32, %arg2: i32, %arg3: memref<8x256xbf16, #tpu.memory_space<vmem>>, %arg4: memref<256x256xbf16, #tpu.memory_space<vmem>>, %arg5: memref<1x256xf32, #tpu.memory_space<vmem>>, %arg6: memref<8x256xf32, #tpu.memory_space<vmem>>, %arg7: memref<8x256xf32, #tpu.memory_space<vmem>>) attributes {dimension_semantics = [#tpu.dimension_semantics<parallel>, #tpu.dimension_semantics<parallel>, #tpu.dimension_semantics<arbitrary>], iteration_bounds = array<i64: 1, 1, 1>, scalar_prefetch = 0 : i64, scratch_operands = 1 : i64, tpu.core_type = #tpu.core_type<tc>, window_params = [{transform_indices = @transform_0, window_bounds = array<i64: 8, 256>}, {transform_indices = @transform_1, window_bounds = array<i64: 256, 256>}, {transform_indices = @transform_2, window_bounds = array<i64: 1, 256>}, {transform_indices = @transform_3, window_bounds = array<i64: 8, 256>}]} {
    %c0_i32 = arith.constant 0 : i32
    %0 = arith.cmpi eq, %arg2, %c0_i32 : i32
    %1 = arith.extui %0 : i1 to i32
    %c0_i32_0 = arith.constant 0 : i32
    %2 = arith.cmpi ne, %1, %c0_i32_0 : i32
    scf.if %2 {
      %cst_10 = arith.constant 0.000000e+00 : f32
      %12 = vector.broadcast %cst_10 : f32 to vector<8x256xf32>
      %c0_11 = arith.constant 0 : index
      %c0_12 = arith.constant 0 : index
      %13 = vector.load %arg7[%c0_11, %c0_12] : memref<8x256xf32, #tpu.memory_space<vmem>>, vector<8x256xf32>
      tpu.vector_store %arg7[%c0_11, %c0_12], %12 {strides = array<i32>} : memref<8x256xf32, #tpu.memory_space<vmem>>, vector<8x256xf32>,
    } else {
    }
    %c0 = arith.constant 0 : index
    %c0_1 = arith.constant 0 : index
    %3 = vector.load %arg7[%c0, %c0_1] : memref<8x256xf32, #tpu.memory_space<vmem>>, vector<8x256xf32>
    %c0_2 = arith.constant 0 : index
    %c0_3 = arith.constant 0 : index
    %4 = vector.load %arg3[%c0_2, %c0_3] : memref<8x256xbf16, #tpu.memory_space<vmem>>, vector<8x256xbf16>
    %c0_4 = arith.constant 0 : index
    %c0_5 = arith.constant 0 : index
    %5 = vector.load %arg4[%c0_4, %c0_5] : memref<256x256xbf16, #tpu.memory_space<vmem>>, vector<256x256xbf16>
    %cst = arith.constant dense<0.000000e+00> : vector<8x256xf32>
    %6 = tpu.matmul %4, %5, %cst {dimension_numbers = #tpu.dot_dimension_numbers<[1], [0], [0], [1], [0, 0, 1, 1], [], []>} : vector<8x256xbf16>, vector<256x256xbf16>, vector<8x256xf32> -> vector<8x256xf32>
    %7 = arith.addf %3, %6 : vector<8x256xf32>
    %c0_6 = arith.constant 0 : index
    %c0_7 = arith.constant 0 : index
    %8 = vector.load %arg7[%c0_6, %c0_7] : memref<8x256xf32, #tpu.memory_space<vmem>>, vector<8x256xf32>
    tpu.vector_store %arg7[%c0_6, %c0_7], %7 {strides = array<i32>} : memref<8x256xf32, #tpu.memory_space<vmem>>, vector<8x256xf32>,
    %c0_i32_8 = arith.constant 0 : i32
    %9 = arith.cmpi eq, %arg2, %c0_i32_8 : i32
    %10 = arith.extui %9 : i1 to i32
    %c0_i32_9 = arith.constant 0 : i32
    %11 = arith.cmpi ne, %10, %c0_i32_9 : i32
    scf.if %11 {
      %c0_10 = arith.constant 0 : index
      %c0_11 = arith.constant 0 : index
      %12 = vector.load %arg7[%c0_10, %c0_11] : memref<8x256xf32, #tpu.memory_space<vmem>>, vector<8x256xf32>
      %c0_12 = arith.constant 0 : index
      %c0_13 = arith.constant 0 : index
      %13 = vector.load %arg5[%c0_12, %c0_13] : memref<1x256xf32, #tpu.memory_space<vmem>>, vector<1x256xf32>
      %14 = vector.broadcast %13 : vector<1x256xf32> to vector<8x256xf32>
      %15 = arith.addf %12, %14 : vector<8x256xf32>
      %c0_14 = arith.constant 0 : index
      %c0_15 = arith.constant 0 : index
      %16 = vector.load %arg6[%c0_14, %c0_15] : memref<8x256xf32, #tpu.memory_space<vmem>>, vector<8x256xf32>
      tpu.vector_store %arg6[%c0_14, %c0_15], %15 {strides = array<i32>} : memref<8x256xf32, #tpu.memory_space<vmem>>, vector<8x256xf32>,
    } else {
    }
    return
  }
  func.func @transform_0(%arg0: i32, %arg1: i32, %arg2: i32) -> (i32, i32) {
    %c0_i32 = arith.constant 0 : i32
    return %arg0, %arg2 : i32, i32
  }
  func.func @transform_1(%arg0: i32, %arg1: i32, %arg2: i32) -> (i32, i32) {
    %c0_i32 = arith.constant 0 : i32
    return %arg2, %arg1 : i32, i32
  }
  func.func @transform_2(%arg0: i32, %arg1: i32, %arg2: i32) -> (i32, i32) {
    %c0_i32 = arith.constant 0 : i32
    %c0_i32_0 = arith.constant 0 : i32
    return %c0_i32, %arg1 : i32, i32
  }
  func.func @transform_3(%arg0: i32, %arg1: i32, %arg2: i32) -> (i32, i32) {
    %c0_i32 = arith.constant 0 : i32
    return %arg0, %arg1 : i32, i32
  }
}

module attributes {stable_mosaic.version = 11 : i64} {
  func.func @_matmul_kernel(%arg0: i32, %arg1: i32, %arg2: i32, %arg3: memref<8x256xbf16, #tpu.memory_space<vmem>>, %arg4: memref<256x256xbf16, #tpu.memory_space<vmem>>, %arg5: memref<1x256xf32, #tpu.memory_space<vmem>>, %arg6: memref<8x256xf32, #tpu.memory_space<vmem>>, %arg7: memref<8x256xf32, #tpu.memory_space<vmem>>) attributes {dimension_semantics = [#tpu.dimension_semantics<parallel>, #tpu.dimension_semantics<parallel>, #tpu.dimension_semantics<arbitrary>], iteration_bounds = array<i64: 1, 1, 1>, scalar_prefetch = 0 : i64, scratch_operands = 1 : i64, tpu.core_type = #tpu.core_type<tc>, window_params = [{transform_indices = @transform_0, window_bounds = array<i64: 8, 256>}, {transform_indices = @transform_1, window_bounds = array<i64: 256, 256>}, {transform_indices = @transform_2, window_bounds = array<i64: 1, 256>}, {transform_indices = @transform_3, window_bounds = array<i64: 8, 256>}]} {
    %c0_i32 = arith.constant 0 : i32
    %0 = arith.cmpi eq, %arg2, %c0_i32 : i32
    %1 = arith.extui %0 : i1 to i32
    %c0_i32_0 = arith.constant 0 : i32
    %2 = arith.cmpi ne, %1, %c0_i32_0 : i32
    scf.if %2 {
      %cst_10 = arith.constant 0.000000e+00 : f32
      %12 = vector.broadcast %cst_10 : f32 to vector<8x256xf32>
      %c0_11 = arith.constant 0 : index
      %c0_12 = arith.constant 0 : index
      %13 = vector.load %arg7[%c0_11, %c0_12] : memref<8x256xf32, #tpu.memory_space<vmem>>, vector<8x256xf32>
      tpu.vector_store %arg7[%c0_11, %c0_12], %12 {strides = array<i32>} : memref<8x256xf32, #tpu.memory_space<vmem>>, vector<8x256xf32>,
    } else {
    }
    %c0 = arith.constant 0 : index
    %c0_1 = arith.constant 0 : index
    %3 = vector.load %arg7[%c0, %c0_1] : memref<8x256xf32, #tpu.memory_space<vmem>>, vector<8x256xf32>
    %c0_2 = arith.constant 0 : index
    %c0_3 = arith.constant 0 : index
    %4 = vector.load %arg3[%c0_2, %c0_3] : memref<8x256xbf16, #tpu.memory_space<vmem>>, vector<8x256xbf16>
    %c0_4 = arith.constant 0 : index
    %c0_5 = arith.constant 0 : index
    %5 = vector.load %arg4[%c0_4, %c0_5] : memref<256x256xbf16, #tpu.memory_space<vmem>>, vector<256x256xbf16>
    %cst = arith.constant dense<0.000000e+00> : vector<8x256xf32>
    %6 = tpu.matmul %4, %5, %cst {dimension_numbers = #tpu.dot_dimension_numbers<[1], [0], [0], [1], [0, 0, 1, 1], [], []>} : vector<8x256xbf16>, vector<256x256xbf16>, vector<8x256xf32> -> vector<8x256xf32>
    %7 = arith.addf %3, %6 : vector<8x256xf32>
    %c0_6 = arith.constant 0 : index
    %c0_7 = arith.constant 0 : index
    %8 = vector.load %arg7[%c0_6, %c0_7] : memref<8x256xf32, #tpu.memory_space<vmem>>, vector<8x256xf32>
    tpu.vector_store %arg7[%c0_6, %c0_7], %7 {strides = array<i32>} : memref<8x256xf32, #tpu.memory_space<vmem>>, vector<8x256xf32>,
    %c0_i32_8 = arith.constant 0 : i32
    %9 = arith.cmpi eq, %arg2, %c0_i32_8 : i32
    %10 = arith.extui %9 : i1 to i32
    %c0_i32_9 = arith.constant 0 : i32
    %11 = arith.cmpi ne, %10, %c0_i32_9 : i32
    scf.if %11 {
      %c0_10 = arith.constant 0 : index
      %c0_11 = arith.constant 0 : index
      %12 = vector.load %arg7[%c0_10, %c0_11] : memref<8x256xf32, #tpu.memory_space<vmem>>, vector<8x256xf32>
      %c0_12 = arith.constant 0 : index
      %c0_13 = arith.constant 0 : index
      %13 = vector.load %arg5[%c0_12, %c0_13] : memref<1x256xf32, #tpu.memory_space<vmem>>, vector<1x256xf32>
      %14 = vector.broadcast %13 : vector<1x256xf32> to vector<8x256xf32>
      %15 = arith.addf %12, %14 : vector<8x256xf32>
      %16 = arith.negf %15 : vector<8x256xf32>
      %17 = math.exp %16 : vector<8x256xf32>
      %cst_14 = arith.constant 1.000000e+00 : f32
      %18 = vector.broadcast %cst_14 : f32 to vector<8x256xf32>
      %19 = arith.addf %18, %17 : vector<8x256xf32>
      %20 = arith.divf %18, %19 : vector<8x256xf32>
      %21 = arith.mulf %15, %20 : vector<8x256xf32>
      %c0_15 = arith.constant 0 : index
      %c0_16 = arith.constant 0 : index
      %22 = vector.load %arg6[%c0_15, %c0_16] : memref<8x256xf32, #tpu.memory_space<vmem>>, vector<8x256xf32>
      tpu.vector_store %arg6[%c0_15, %c0_16], %21 {strides = array<i32>} : memref<8x256xf32, #tpu.memory_space<vmem>>, vector<8x256xf32>,
    } else {
    }
    return
  }
  func.func @transform_0(%arg0: i32, %arg1: i32, %arg2: i32) -> (i32, i32) {
    %c0_i32 = arith.constant 0 : i32
    return %arg0, %arg2 : i32, i32
  }
  func.func @transform_1(%arg0: i32, %arg1: i32, %arg2: i32) -> (i32, i32) {
    %c0_i32 = arith.constant 0 : i32
    return %arg2, %arg1 : i32, i32
  }
  func.func @transform_2(%arg0: i32, %arg1: i32, %arg2: i32) -> (i32, i32) {
    %c0_i32 = arith.constant 0 : i32
    %c0_i32_0 = arith.constant 0 : i32
    return %c0_i32, %arg1 : i32, i32
  }
  func.func @transform_3(%arg0: i32, %arg1: i32, %arg2: i32) -> (i32, i32) {
    %c0_i32 = arith.constant 0 : i32
    return %arg0, %arg1 : i32, i32
  }
}

module attributes {stable_mosaic.version = 11 : i64} {
  func.func @_matmul_res_ln_kernel(%arg0: i32, %arg1: i32, %arg2: memref<40x256xbf16, #tpu.memory_space<vmem>>, %arg3: memref<256x256xbf16, #tpu.memory_space<vmem>>, %arg4: memref<1x256xf32, #tpu.memory_space<vmem>>, %arg5: memref<40x256xbf16, #tpu.memory_space<vmem>>, %arg6: memref<1x256xf32, #tpu.memory_space<vmem>>, %arg7: memref<1x256xf32, #tpu.memory_space<vmem>>, %arg8: memref<40x256xbf16, #tpu.memory_space<vmem>>, %arg9: memref<40x256xf32, #tpu.memory_space<vmem>>) attributes {dimension_semantics = [#tpu.dimension_semantics<parallel>, #tpu.dimension_semantics<arbitrary>], iteration_bounds = array<i64: 1, 1>, scalar_prefetch = 0 : i64, scratch_operands = 1 : i64, tpu.core_type = #tpu.core_type<tc>, window_params = [{transform_indices = @transform_0, window_bounds = array<i64: 40, 256>}, {transform_indices = @transform_1, window_bounds = array<i64: 256, 256>}, {pipeline_mode = #tpu.pipeline_mode<synchronous>, transform_indices = @transform_2, window_bounds = array<i64: 1, 256>}, {transform_indices = @transform_3, window_bounds = array<i64: 40, 256>}, {pipeline_mode = #tpu.pipeline_mode<synchronous>, transform_indices = @transform_4, window_bounds = array<i64: 1, 256>}, {pipeline_mode = #tpu.pipeline_mode<synchronous>, transform_indices = @transform_5, window_bounds = array<i64: 1, 256>}, {transform_indices = @transform_6, window_bounds = array<i64: 40, 256>}]} {
    %c0_i32 = arith.constant 0 : i32
    %0 = arith.cmpi eq, %arg1, %c0_i32 : i32
    %1 = arith.extui %0 : i1 to i32
    %c0_i32_0 = arith.constant 0 : i32
    %2 = arith.cmpi ne, %1, %c0_i32_0 : i32
    scf.if %2 {
      %cst_10 = arith.constant 0.000000e+00 : f32
      %12 = vector.broadcast %cst_10 : f32 to vector<40x256xf32>
      %c0_11 = arith.constant 0 : index
      %c0_12 = arith.constant 0 : index
      %13 = vector.load %arg9[%c0_11, %c0_12] : memref<40x256xf32, #tpu.memory_space<vmem>>, vector<40x256xf32>
      tpu.vector_store %arg9[%c0_11, %c0_12], %12 {strides = array<i32>} : memref<40x256xf32, #tpu.memory_space<vmem>>, vector<40x256xf32>,
    } else {
    }
    %c0 = arith.constant 0 : index
    %c0_1 = arith.constant 0 : index
    %3 = vector.load %arg9[%c0, %c0_1] : memref<40x256xf32, #tpu.memory_space<vmem>>, vector<40x256xf32>
    %c0_2 = arith.constant 0 : index
    %c0_3 = arith.constant 0 : index
    %4 = vector.load %arg2[%c0_2, %c0_3] : memref<40x256xbf16, #tpu.memory_space<vmem>>, vector<40x256xbf16>
    %c0_4 = arith.constant 0 : index
    %c0_5 = arith.constant 0 : index
    %5 = vector.load %arg3[%c0_4, %c0_5] : memref<256x256xbf16, #tpu.memory_space<vmem>>, vector<256x256xbf16>
    %cst = arith.constant dense<0.000000e+00> : vector<40x256xf32>
    %6 = tpu.matmul %4, %5, %cst {dimension_numbers = #tpu.dot_dimension_numbers<[1], [0], [0], [1], [0, 0, 1, 1], [], []>} : vector<40x256xbf16>, vector<256x256xbf16>, vector<40x256xf32> -> vector<40x256xf32>
    %7 = arith.addf %3, %6 : vector<40x256xf32>
    %c0_6 = arith.constant 0 : index
    %c0_7 = arith.constant 0 : index
    %8 = vector.load %arg9[%c0_6, %c0_7] : memref<40x256xf32, #tpu.memory_space<vmem>>, vector<40x256xf32>
    tpu.vector_store %arg9[%c0_6, %c0_7], %7 {strides = array<i32>} : memref<40x256xf32, #tpu.memory_space<vmem>>, vector<40x256xf32>,
    %c0_i32_8 = arith.constant 0 : i32
    %9 = arith.cmpi eq, %arg1, %c0_i32_8 : i32
    %10 = arith.extui %9 : i1 to i32
    %c0_i32_9 = arith.constant 0 : i32
    %11 = arith.cmpi ne, %10, %c0_i32_9 : i32
    scf.if %11 {
      %c0_10 = arith.constant 0 : index
      %c0_11 = arith.constant 0 : index
      %12 = vector.load %arg9[%c0_10, %c0_11] : memref<40x256xf32, #tpu.memory_space<vmem>>, vector<40x256xf32>
      %c0_12 = arith.constant 0 : index
      %c0_13 = arith.constant 0 : index
      %13 = vector.load %arg4[%c0_12, %c0_13] : memref<1x256xf32, #tpu.memory_space<vmem>>, vector<1x256xf32>
      %14 = vector.broadcast %13 : vector<1x256xf32> to vector<40x256xf32>
      %15 = arith.addf %12, %14 : vector<40x256xf32>
      %c0_14 = arith.constant 0 : index
      %c0_15 = arith.constant 0 : index
      %16 = vector.load %arg5[%c0_14, %c0_15] : memref<40x256xbf16, #tpu.memory_space<vmem>>, vector<40x256xbf16>
      %17 = arith.extf %16 : vector<40x256xbf16> to vector<40x256xf32>
      %18 = arith.addf %15, %17 : vector<40x256xf32>
      %cst_16 = arith.constant dense<0.000000e+00> : vector<40xf32>
      %19 = vector.multi_reduction <add>, %18, %cst_16 [1] : vector<40x256xf32> to vector<40xf32>
      %20 = vector.shape_cast %19 : vector<40xf32> to vector<40x1xf32>
      %cst_17 = arith.constant 2.560000e+02 : f32
      %21 = vector.broadcast %cst_17 : f32 to vector<40x1xf32>
      %22 = arith.divf %20, %21 : vector<40x1xf32>
      %23 = vector.broadcast %22 : vector<40x1xf32> to vector<40x256xf32>
      %24 = arith.subf %18, %23 : vector<40x256xf32>
      %25 = arith.mulf %24, %24 : vector<40x256xf32>
      %cst_18 = arith.constant dense<0.000000e+00> : vector<40xf32>
      %26 = vector.multi_reduction <add>, %25, %cst_18 [1] : vector<40x256xf32> to vector<40xf32>
      %27 = vector.shape_cast %26 : vector<40xf32> to vector<40x1xf32>
      %cst_19 = arith.constant 2.560000e+02 : f32
      %28 = vector.broadcast %cst_19 : f32 to vector<40x1xf32>
      %29 = arith.divf %27, %28 : vector<40x1xf32>
      %cst_20 = arith.constant 9.99999974E-6 : f32
      %30 = vector.broadcast %cst_20 : f32 to vector<40x1xf32>
      %31 = arith.addf %29, %30 : vector<40x1xf32>
      %32 = math.rsqrt %31 : vector<40x1xf32>
      %33 = vector.broadcast %32 : vector<40x1xf32> to vector<40x256xf32>
      %34 = arith.mulf %24, %33 : vector<40x256xf32>
      %c0_21 = arith.constant 0 : index
      %c0_22 = arith.constant 0 : index
      %35 = vector.load %arg6[%c0_21, %c0_22] : memref<1x256xf32, #tpu.memory_space<vmem>>, vector<1x256xf32>
      %36 = vector.broadcast %35 : vector<1x256xf32> to vector<40x256xf32>
      %37 = arith.mulf %34, %36 : vector<40x256xf32>
      %c0_23 = arith.constant 0 : index
      %c0_24 = arith.constant 0 : index
      %38 = vector.load %arg7[%c0_23, %c0_24] : memref<1x256xf32, #tpu.memory_space<vmem>>, vector<1x256xf32>
      %39 = vector.broadcast %38 : vector<1x256xf32> to vector<40x256xf32>
      %40 = arith.addf %37, %39 : vector<40x256xf32>
      %41 = arith.truncf %40 : vector<40x256xf32> to vector<40x256xbf16>
      %c0_25 = arith.constant 0 : index
      %c0_26 = arith.constant 0 : index
      %42 = vector.load %arg8[%c0_25, %c0_26] : memref<40x256xbf16, #tpu.memory_space<vmem>>, vector<40x256xbf16>
      tpu.vector_store %arg8[%c0_25, %c0_26], %41 {strides = array<i32>} : memref<40x256xbf16, #tpu.memory_space<vmem>>, vector<40x256xbf16>,
    } else {
    }
    return
  }
  func.func @transform_0(%arg0: i32, %arg1: i32) -> (i32, i32) {
    %c0_i32 = arith.constant 0 : i32
    return %arg0, %arg1 : i32, i32
  }
  func.func @transform_1(%arg0: i32, %arg1: i32) -> (i32, i32) {
    %c0_i32 = arith.constant 0 : i32
    %c0_i32_0 = arith.constant 0 : i32
    return %arg1, %c0_i32 : i32, i32
  }
  func.func @transform_2(%arg0: i32, %arg1: i32) -> (i32, i32) {
    %c0_i32 = arith.constant 0 : i32
    %c0_i32_0 = arith.constant 0 : i32
    %c0_i32_1 = arith.constant 0 : i32
    return %c0_i32, %c0_i32_0 : i32, i32
  }
  func.func @transform_3(%arg0: i32, %arg1: i32) -> (i32, i32) {
    %c0_i32 = arith.constant 0 : i32
    %c0_i32_0 = arith.constant 0 : i32
    return %arg0, %c0_i32 : i32, i32
  }
  func.func @transform_4(%arg0: i32, %arg1: i32) -> (i32, i32) {
    %c0_i32 = arith.constant 0 : i32
    %c0_i32_0 = arith.constant 0 : i32
    %c0_i32_1 = arith.constant 0 : i32
    return %c0_i32, %c0_i32_0 : i32, i32
  }
  func.func @transform_5(%arg0: i32, %arg1: i32) -> (i32, i32) {
    %c0_i32 = arith.constant 0 : i32
    %c0_i32_0 = arith.constant 0 : i32
    %c0_i32_1 = arith.constant 0 : i32
    return %c0_i32, %c0_i32_0 : i32, i32
  }
  func.func @transform_6(%arg0: i32, %arg1: i32) -> (i32, i32) {
    %c0_i32 = arith.constant 0 : i32
    %c0_i32_0 = arith.constant 0 : i32
    return %arg0, %c0_i32 : i32, i32
  }
}

module attributes {stable_mosaic.version = 11 : i64} {
  func.func @_mha_cross_kernel(%arg0: i32, %arg1: memref<1x9x256xbf16, #tpu.memory_space<vmem>>, %arg2: memref<1x9x256xbf16, #tpu.memory_space<vmem>>, %arg3: memref<1x9x256xbf16, #tpu.memory_space<vmem>>, %arg4: memref<1x9x256xbf16, #tpu.memory_space<vmem>>, %arg5: memref<1x9x256xbf16, #tpu.memory_space<vmem>>, %arg6: memref<1x1x9xf32, #tpu.memory_space<vmem>>, %arg7: memref<1x9x256xbf16, #tpu.memory_space<vmem>>) attributes {dimension_semantics = [#tpu.dimension_semantics<parallel>], iteration_bounds = array<i64: 4>, scalar_prefetch = 0 : i64, scratch_operands = 0 : i64, tpu.core_type = #tpu.core_type<tc>, window_params = [{transform_indices = @transform_0, window_bounds = array<i64: 1, 9, 256>}, {transform_indices = @transform_1, window_bounds = array<i64: 1, 9, 256>}, {transform_indices = @transform_2, window_bounds = array<i64: 1, 9, 256>}, {transform_indices = @transform_3, window_bounds = array<i64: 1, 9, 256>}, {transform_indices = @transform_4, window_bounds = array<i64: 1, 9, 256>}, {transform_indices = @transform_5, window_bounds = array<i64: 1, 1, 9>}, {transform_indices = @transform_6, window_bounds = array<i64: 1, 9, 256>}]} {
    %c0 = arith.constant 0 : index
    %c0_0 = arith.constant 0 : index
    %c0_1 = arith.constant 0 : index
    %0 = vector.load %arg1[%c0, %c0_0, %c0_1] : memref<1x9x256xbf16, #tpu.memory_space<vmem>>, vector<1x9x256xbf16>
    %1 = vector.shape_cast %0 : vector<1x9x256xbf16> to vector<9x256xbf16>
    %2 = arith.extf %1 : vector<9x256xbf16> to vector<9x256xf32>
    %cst = arith.constant 0.0883883461 : f32
    %3 = vector.broadcast %cst : f32 to vector<9x256xf32>
    %4 = arith.mulf %2, %3 : vector<9x256xf32>
    %5 = arith.truncf %4 : vector<9x256xf32> to vector<9x256xbf16>
    %c0_2 = arith.constant 0 : index
    %c0_3 = arith.constant 0 : index
    %c0_4 = arith.constant 0 : index
    %6 = vector.load %arg2[%c0_2, %c0_3, %c0_4] : memref<1x9x256xbf16, #tpu.memory_space<vmem>>, vector<1x9x256xbf16>
    %7 = vector.shape_cast %6 : vector<1x9x256xbf16> to vector<9x256xbf16>
    %c0_5 = arith.constant 0 : index
    %c0_6 = arith.constant 0 : index
    %c0_7 = arith.constant 0 : index
    %8 = vector.load %arg3[%c0_5, %c0_6, %c0_7] : memref<1x9x256xbf16, #tpu.memory_space<vmem>>, vector<1x9x256xbf16>
    %9 = vector.shape_cast %8 : vector<1x9x256xbf16> to vector<9x256xbf16>
    %c0_8 = arith.constant 0 : index
    %c0_9 = arith.constant 0 : index
    %c0_10 = arith.constant 0 : index
    %10 = vector.load %arg4[%c0_8, %c0_9, %c0_10] : memref<1x9x256xbf16, #tpu.memory_space<vmem>>, vector<1x9x256xbf16>
    %11 = vector.shape_cast %10 : vector<1x9x256xbf16> to vector<9x256xbf16>
    %c0_11 = arith.constant 0 : index
    %c0_12 = arith.constant 0 : index
    %c0_13 = arith.constant 0 : index
    %12 = vector.load %arg5[%c0_11, %c0_12, %c0_13] : memref<1x9x256xbf16, #tpu.memory_space<vmem>>, vector<1x9x256xbf16>
    %13 = vector.shape_cast %12 : vector<1x9x256xbf16> to vector<9x256xbf16>
    %c0_14 = arith.constant 0 : index
    %c0_15 = arith.constant 0 : index
    %c0_16 = arith.constant 0 : index
    %14 = vector.load %arg6[%c0_14, %c0_15, %c0_16] : memref<1x1x9xf32, #tpu.memory_space<vmem>>, vector<1x1x9xf32>
    %15 = vector.shape_cast %14 : vector<1x1x9xf32> to vector<1x9xf32>
    %16 = vector.extract_strided_slice %5 {offsets = [0, 0], sizes = [9, 128], strides = [1, 1]} : vector<9x256xbf16> to vector<9x128xbf16>
    %17 = vector.extract_strided_slice %7 {offsets = [0, 0], sizes = [9, 128], strides = [1, 1]} : vector<9x256xbf16> to vector<9x128xbf16>
    %cst_17 = arith.constant dense<0.000000e+00> : vector<9x9xf32>
    %18 = tpu.matmul %16, %17, %cst_17 {dimension_numbers = #tpu.dot_dimension_numbers<[1], [1], [0], [0], [0, 0, 1, 0], [], []>} : vector<9x128xbf16>, vector<9x128xbf16>, vector<9x9xf32> -> vector<9x9xf32>
    %19 = vector.broadcast %15 : vector<1x9xf32> to vector<9x9xf32>
    %20 = arith.addf %18, %19 : vector<9x9xf32>
    %21 = vector.extract_strided_slice %9 {offsets = [0, 0], sizes = [9, 128], strides = [1, 1]} : vector<9x256xbf16> to vector<9x128xbf16>
    %cst_18 = arith.constant dense<0.000000e+00> : vector<9x9xf32>
    %22 = tpu.matmul %16, %21, %cst_18 {dimension_numbers = #tpu.dot_dimension_numbers<[1], [1], [0], [0], [0, 0, 1, 0], [], []>} : vector<9x128xbf16>, vector<9x128xbf16>, vector<9x9xf32> -> vector<9x9xf32>
    %23 = vector.broadcast %15 : vector<1x9xf32> to vector<9x9xf32>
    %24 = arith.addf %22, %23 : vector<9x9xf32>
    %cst_19 = arith.constant dense<0xFF800000> : vector<9xf32>
    %25 = vector.multi_reduction <maximumf>, %20, %cst_19 [1] : vector<9x9xf32> to vector<9xf32>
    %26 = vector.shape_cast %25 : vector<9xf32> to vector<9x1xf32>
    %cst_20 = arith.constant dense<0xFF800000> : vector<9xf32>
    %27 = vector.multi_reduction <maximumf>, %24, %cst_20 [1] : vector<9x9xf32> to vector<9xf32>
    %28 = vector.shape_cast %27 : vector<9xf32> to vector<9x1xf32>
    %29 = arith.maximumf %26, %28 : vector<9x1xf32>
    %30 = vector.broadcast %29 : vector<9x1xf32> to vector<9x9xf32>
    %31 = arith.subf %20, %30 : vector<9x9xf32>
    %32 = math.exp %31 : vector<9x9xf32>
    %33 = vector.broadcast %29 : vector<9x1xf32> to vector<9x9xf32>
    %34 = arith.subf %24, %33 : vector<9x9xf32>
    %35 = math.exp %34 : vector<9x9xf32>
    %cst_21 = arith.constant dense<0.000000e+00> : vector<9xf32>
    %36 = vector.multi_reduction <add>, %32, %cst_21 [1] : vector<9x9xf32> to vector<9xf32>
    %37 = vector.shape_cast %36 : vector<9xf32> to vector<9x1xf32>
    %cst_22 = arith.constant dense<0.000000e+00> : vector<9xf32>
    %38 = vector.multi_reduction <add>, %35, %cst_22 [1] : vector<9x9xf32> to vector<9xf32>
    %39 = vector.shape_cast %38 : vector<9xf32> to vector<9x1xf32>
    %40 = arith.addf %37, %39 : vector<9x1xf32>
    %41 = tpu.reciprocal %40 {approx = true} : vector<9x1xf32> -> vector<9x1xf32>
    %42 = arith.truncf %32 : vector<9x9xf32> to vector<9x9xbf16>
    %43 = vector.extract_strided_slice %11 {offsets = [0, 0], sizes = [9, 128], strides = [1, 1]} : vector<9x256xbf16> to vector<9x128xbf16>
    %cst_23 = arith.constant dense<0.000000e+00> : vector<9x128xf32>
    %44 = tpu.matmul %42, %43, %cst_23 {dimension_numbers = #tpu.dot_dimension_numbers<[1], [0], [0], [1], [0, 0, 1, 1], [], []>} : vector<9x9xbf16>, vector<9x128xbf16>, vector<9x128xf32> -> vector<9x128xf32>
    %45 = arith.truncf %35 : vector<9x9xf32> to vector<9x9xbf16>
    %46 = vector.extract_strided_slice %13 {offsets = [0, 0], sizes = [9, 128], strides = [1, 1]} : vector<9x256xbf16> to vector<9x128xbf16>
    %cst_24 = arith.constant dense<0.000000e+00> : vector<9x128xf32>
    %47 = tpu.matmul %45, %46, %cst_24 {dimension_numbers = #tpu.dot_dimension_numbers<[1], [0], [0], [1], [0, 0, 1, 1], [], []>} : vector<9x9xbf16>, vector<9x128xbf16>, vector<9x128xf32> -> vector<9x128xf32>
    %48 = arith.addf %44, %47 : vector<9x128xf32>
    %49 = vector.broadcast %41 : vector<9x1xf32> to vector<9x128xf32>
    %50 = arith.mulf %48, %49 : vector<9x128xf32>
    %51 = arith.truncf %50 : vector<9x128xf32> to vector<9x128xbf16>
    %52 = vector.extract_strided_slice %5 {offsets = [0, 128], sizes = [9, 128], strides = [1, 1]} : vector<9x256xbf16> to vector<9x128xbf16>
    %53 = vector.extract_strided_slice %7 {offsets = [0, 128], sizes = [9, 128], strides = [1, 1]} : vector<9x256xbf16> to vector<9x128xbf16>
    %cst_25 = arith.constant dense<0.000000e+00> : vector<9x9xf32>
    %54 = tpu.matmul %52, %53, %cst_25 {dimension_numbers = #tpu.dot_dimension_numbers<[1], [1], [0], [0], [0, 0, 1, 0], [], []>} : vector<9x128xbf16>, vector<9x128xbf16>, vector<9x9xf32> -> vector<9x9xf32>
    %55 = vector.broadcast %15 : vector<1x9xf32> to vector<9x9xf32>
    %56 = arith.addf %54, %55 : vector<9x9xf32>
    %57 = vector.extract_strided_slice %9 {offsets = [0, 128], sizes = [9, 128], strides = [1, 1]} : vector<9x256xbf16> to vector<9x128xbf16>
    %cst_26 = arith.constant dense<0.000000e+00> : vector<9x9xf32>
    %58 = tpu.matmul %52, %57, %cst_26 {dimension_numbers = #tpu.dot_dimension_numbers<[1], [1], [0], [0], [0, 0, 1, 0], [], []>} : vector<9x128xbf16>, vector<9x128xbf16>, vector<9x9xf32> -> vector<9x9xf32>
    %59 = vector.broadcast %15 : vector<1x9xf32> to vector<9x9xf32>
    %60 = arith.addf %58, %59 : vector<9x9xf32>
    %cst_27 = arith.constant dense<0xFF800000> : vector<9xf32>
    %61 = vector.multi_reduction <maximumf>, %56, %cst_27 [1] : vector<9x9xf32> to vector<9xf32>
    %62 = vector.shape_cast %61 : vector<9xf32> to vector<9x1xf32>
    %cst_28 = arith.constant dense<0xFF800000> : vector<9xf32>
    %63 = vector.multi_reduction <maximumf>, %60, %cst_28 [1] : vector<9x9xf32> to vector<9xf32>
    %64 = vector.shape_cast %63 : vector<9xf32> to vector<9x1xf32>
    %65 = arith.maximumf %62, %64 : vector<9x1xf32>
    %66 = vector.broadcast %65 : vector<9x1xf32> to vector<9x9xf32>
    %67 = arith.subf %56, %66 : vector<9x9xf32>
    %68 = math.exp %67 : vector<9x9xf32>
    %69 = vector.broadcast %65 : vector<9x1xf32> to vector<9x9xf32>
    %70 = arith.subf %60, %69 : vector<9x9xf32>
    %71 = math.exp %70 : vector<9x9xf32>
    %cst_29 = arith.constant dense<0.000000e+00> : vector<9xf32>
    %72 = vector.multi_reduction <add>, %68, %cst_29 [1] : vector<9x9xf32> to vector<9xf32>
    %73 = vector.shape_cast %72 : vector<9xf32> to vector<9x1xf32>
    %cst_30 = arith.constant dense<0.000000e+00> : vector<9xf32>
    %74 = vector.multi_reduction <add>, %71, %cst_30 [1] : vector<9x9xf32> to vector<9xf32>
    %75 = vector.shape_cast %74 : vector<9xf32> to vector<9x1xf32>
    %76 = arith.addf %73, %75 : vector<9x1xf32>
    %77 = tpu.reciprocal %76 {approx = true} : vector<9x1xf32> -> vector<9x1xf32>
    %78 = arith.truncf %68 : vector<9x9xf32> to vector<9x9xbf16>
    %79 = vector.extract_strided_slice %11 {offsets = [0, 128], sizes = [9, 128], strides = [1, 1]} : vector<9x256xbf16> to vector<9x128xbf16>
    %cst_31 = arith.constant dense<0.000000e+00> : vector<9x128xf32>
    %80 = tpu.matmul %78, %79, %cst_31 {dimension_numbers = #tpu.dot_dimension_numbers<[1], [0], [0], [1], [0, 0, 1, 1], [], []>} : vector<9x9xbf16>, vector<9x128xbf16>, vector<9x128xf32> -> vector<9x128xf32>
    %81 = arith.truncf %71 : vector<9x9xf32> to vector<9x9xbf16>
    %82 = vector.extract_strided_slice %13 {offsets = [0, 128], sizes = [9, 128], strides = [1, 1]} : vector<9x256xbf16> to vector<9x128xbf16>
    %cst_32 = arith.constant dense<0.000000e+00> : vector<9x128xf32>
    %83 = tpu.matmul %81, %82, %cst_32 {dimension_numbers = #tpu.dot_dimension_numbers<[1], [0], [0], [1], [0, 0, 1, 1], [], []>} : vector<9x9xbf16>, vector<9x128xbf16>, vector<9x128xf32> -> vector<9x128xf32>
    %84 = arith.addf %80, %83 : vector<9x128xf32>
    %85 = vector.broadcast %77 : vector<9x1xf32> to vector<9x128xf32>
    %86 = arith.mulf %84, %85 : vector<9x128xf32>
    %87 = arith.truncf %86 : vector<9x128xf32> to vector<9x128xbf16>
    %88 = tpu.concatenate %51, %87 in 1 : vector<9x128xbf16>, vector<9x128xbf16> -> vector<9x256xbf16>
    %c0_33 = arith.constant 0 : index
    %c0_34 = arith.constant 0 : index
    %c0_35 = arith.constant 0 : index
    %89 = vector.load %arg7[%c0_33, %c0_34, %c0_35] : memref<1x9x256xbf16, #tpu.memory_space<vmem>>, vector<1x9x256xbf16>
    %90 = vector.shape_cast %89 : vector<1x9x256xbf16> to vector<9x256xbf16>
    %91 = vector.shape_cast %88 : vector<9x256xbf16> to vector<1x9x256xbf16>
    tpu.vector_store %arg7[%c0_33, %c0_34, %c0_35], %91 {strides = array<i32>} : memref<1x9x256xbf16, #tpu.memory_space<vmem>>, vector<1x9x256xbf16>,
    return
  }
  func.func @transform_0(%arg0: i32) -> (i32, i32, i32) {
    %c0_i32 = arith.constant 0 : i32
    %c0_i32_0 = arith.constant 0 : i32
    %c0_i32_1 = arith.constant 0 : i32
    return %arg0, %c0_i32, %c0_i32_0 : i32, i32, i32
  }
  func.func @transform_1(%arg0: i32) -> (i32, i32, i32) {
    %c0_i32 = arith.constant 0 : i32
    %c1_i32 = arith.constant 1 : i32
    %c0_i32_0 = arith.constant 0 : i32
    return %arg0, %c0_i32, %c1_i32 : i32, i32, i32
  }
  func.func @transform_2(%arg0: i32) -> (i32, i32, i32) {
    %c2_i32 = arith.constant 2 : i32
    %0 = arith.addi %arg0, %c2_i32 : i32
    %c4_i32 = arith.constant 4 : i32
    %c0_i32 = arith.constant 0 : i32
    %1 = arith.cmpi eq, %c4_i32, %c0_i32 : i32
    %c1_i32 = arith.constant 1 : i32
    %2 = arith.select %1, %c1_i32, %c4_i32 : i32
    %3 = arith.remsi %0, %2 : i32
    %c0_i32_0 = arith.constant 0 : i32
    %4 = arith.cmpi ne, %3, %c0_i32_0 : i32
    %c0_i32_1 = arith.constant 0 : i32
    %5 = arith.cmpi slt, %3, %c0_i32_1 : i32
    %c0_i32_2 = arith.constant 0 : i32
    %6 = arith.cmpi slt, %2, %c0_i32_2 : i32
    %7 = arith.xori %5, %6 : i1
    %8 = arith.andi %7, %4 : i1
    %9 = arith.addi %3, %2 : i32
    %10 = arith.select %8, %9, %3 : i32
    %c0_i32_3 = arith.constant 0 : i32
    %c1_i32_4 = arith.constant 1 : i32
    %c0_i32_5 = arith.constant 0 : i32
    return %10, %c0_i32_3, %c1_i32_4 : i32, i32, i32
  }
  func.func @transform_3(%arg0: i32) -> (i32, i32, i32) {
    %c0_i32 = arith.constant 0 : i32
    %c2_i32 = arith.constant 2 : i32
    %c0_i32_0 = arith.constant 0 : i32
    return %arg0, %c0_i32, %c2_i32 : i32, i32, i32
  }
  func.func @transform_4(%arg0: i32) -> (i32, i32, i32) {
    %c2_i32 = arith.constant 2 : i32
    %0 = arith.addi %arg0, %c2_i32 : i32
    %c4_i32 = arith.constant 4 : i32
    %c0_i32 = arith.constant 0 : i32
    %1 = arith.cmpi eq, %c4_i32, %c0_i32 : i32
    %c1_i32 = arith.constant 1 : i32
    %2 = arith.select %1, %c1_i32, %c4_i32 : i32
    %3 = arith.remsi %0, %2 : i32
    %c0_i32_0 = arith.constant 0 : i32
    %4 = arith.cmpi ne, %3, %c0_i32_0 : i32
    %c0_i32_1 = arith.constant 0 : i32
    %5 = arith.cmpi slt, %3, %c0_i32_1 : i32
    %c0_i32_2 = arith.constant 0 : i32
    %6 = arith.cmpi slt, %2, %c0_i32_2 : i32
    %7 = arith.xori %5, %6 : i1
    %8 = arith.andi %7, %4 : i1
    %9 = arith.addi %3, %2 : i32
    %10 = arith.select %8, %9, %3 : i32
    %c0_i32_3 = arith.constant 0 : i32
    %c2_i32_4 = arith.constant 2 : i32
    %c0_i32_5 = arith.constant 0 : i32
    return %10, %c0_i32_3, %c2_i32_4 : i32, i32, i32
  }
  func.func @transform_5(%arg0: i32) -> (i32, i32, i32) {
    %c0_i32 = arith.constant 0 : i32
    %c0_i32_0 = arith.constant 0 : i32
    %c0_i32_1 = arith.constant 0 : i32
    return %arg0, %c0_i32, %c0_i32_0 : i32, i32, i32
  }
  func.func @transform_6(%arg0: i32) -> (i32, i32, i32) {
    %c0_i32 = arith.constant 0 : i32
    %c0_i32_0 = arith.constant 0 : i32
    %c0_i32_1 = arith.constant 0 : i32
    return %arg0, %c0_i32, %c0_i32_0 : i32, i32, i32
  }
}

module attributes {stable_mosaic.version = 11 : i64} {
  func.func @_matmul_kernel(%arg0: i32, %arg1: i32, %arg2: i32, %arg3: memref<40x256xbf16, #tpu.memory_space<vmem>>, %arg4: memref<256x256xbf16, #tpu.memory_space<vmem>>, %arg5: memref<1x256xf32, #tpu.memory_space<vmem>>, %arg6: memref<40x256xbf16, #tpu.memory_space<vmem>>, %arg7: memref<40x256xf32, #tpu.memory_space<vmem>>) attributes {dimension_semantics = [#tpu.dimension_semantics<parallel>, #tpu.dimension_semantics<parallel>, #tpu.dimension_semantics<arbitrary>], iteration_bounds = array<i64: 1, 3, 1>, scalar_prefetch = 0 : i64, scratch_operands = 1 : i64, tpu.core_type = #tpu.core_type<tc>, window_params = [{transform_indices = @transform_0, window_bounds = array<i64: 40, 256>}, {transform_indices = @transform_1, window_bounds = array<i64: 256, 256>}, {transform_indices = @transform_2, window_bounds = array<i64: 1, 256>}, {transform_indices = @transform_3, window_bounds = array<i64: 40, 256>}]} {
    %c0_i32 = arith.constant 0 : i32
    %0 = arith.cmpi eq, %arg2, %c0_i32 : i32
    %1 = arith.extui %0 : i1 to i32
    %c0_i32_0 = arith.constant 0 : i32
    %2 = arith.cmpi ne, %1, %c0_i32_0 : i32
    scf.if %2 {
      %cst_10 = arith.constant 0.000000e+00 : f32
      %12 = vector.broadcast %cst_10 : f32 to vector<40x256xf32>
      %c0_11 = arith.constant 0 : index
      %c0_12 = arith.constant 0 : index
      %13 = vector.load %arg7[%c0_11, %c0_12] : memref<40x256xf32, #tpu.memory_space<vmem>>, vector<40x256xf32>
      tpu.vector_store %arg7[%c0_11, %c0_12], %12 {strides = array<i32>} : memref<40x256xf32, #tpu.memory_space<vmem>>, vector<40x256xf32>,
    } else {
    }
    %c0 = arith.constant 0 : index
    %c0_1 = arith.constant 0 : index
    %3 = vector.load %arg7[%c0, %c0_1] : memref<40x256xf32, #tpu.memory_space<vmem>>, vector<40x256xf32>
    %c0_2 = arith.constant 0 : index
    %c0_3 = arith.constant 0 : index
    %4 = vector.load %arg3[%c0_2, %c0_3] : memref<40x256xbf16, #tpu.memory_space<vmem>>, vector<40x256xbf16>
    %c0_4 = arith.constant 0 : index
    %c0_5 = arith.constant 0 : index
    %5 = vector.load %arg4[%c0_4, %c0_5] : memref<256x256xbf16, #tpu.memory_space<vmem>>, vector<256x256xbf16>
    %cst = arith.constant dense<0.000000e+00> : vector<40x256xf32>
    %6 = tpu.matmul %4, %5, %cst {dimension_numbers = #tpu.dot_dimension_numbers<[1], [0], [0], [1], [0, 0, 1, 1], [], []>} : vector<40x256xbf16>, vector<256x256xbf16>, vector<40x256xf32> -> vector<40x256xf32>
    %7 = arith.addf %3, %6 : vector<40x256xf32>
    %c0_6 = arith.constant 0 : index
    %c0_7 = arith.constant 0 : index
    %8 = vector.load %arg7[%c0_6, %c0_7] : memref<40x256xf32, #tpu.memory_space<vmem>>, vector<40x256xf32>
    tpu.vector_store %arg7[%c0_6, %c0_7], %7 {strides = array<i32>} : memref<40x256xf32, #tpu.memory_space<vmem>>, vector<40x256xf32>,
    %c0_i32_8 = arith.constant 0 : i32
    %9 = arith.cmpi eq, %arg2, %c0_i32_8 : i32
    %10 = arith.extui %9 : i1 to i32
    %c0_i32_9 = arith.constant 0 : i32
    %11 = arith.cmpi ne, %10, %c0_i32_9 : i32
    scf.if %11 {
      %c0_10 = arith.constant 0 : index
      %c0_11 = arith.constant 0 : index
      %12 = vector.load %arg7[%c0_10, %c0_11] : memref<40x256xf32, #tpu.memory_space<vmem>>, vector<40x256xf32>
      %c0_12 = arith.constant 0 : index
      %c0_13 = arith.constant 0 : index
      %13 = vector.load %arg5[%c0_12, %c0_13] : memref<1x256xf32, #tpu.memory_space<vmem>>, vector<1x256xf32>
      %14 = vector.broadcast %13 : vector<1x256xf32> to vector<40x256xf32>
      %15 = arith.addf %12, %14 : vector<40x256xf32>
      %16 = arith.truncf %15 : vector<40x256xf32> to vector<40x256xbf16>
      %c0_14 = arith.constant 0 : index
      %c0_15 = arith.constant 0 : index
      %17 = vector.load %arg6[%c0_14, %c0_15] : memref<40x256xbf16, #tpu.memory_space<vmem>>, vector<40x256xbf16>
      tpu.vector_store %arg6[%c0_14, %c0_15], %16 {strides = array<i32>} : memref<40x256xbf16, #tpu.memory_space<vmem>>, vector<40x256xbf16>,
    } else {
    }
    return
  }
  func.func @transform_0(%arg0: i32, %arg1: i32, %arg2: i32) -> (i32, i32) {
    %c0_i32 = arith.constant 0 : i32
    return %arg0, %arg2 : i32, i32
  }
  func.func @transform_1(%arg0: i32, %arg1: i32, %arg2: i32) -> (i32, i32) {
    %c0_i32 = arith.constant 0 : i32
    return %arg2, %arg1 : i32, i32
  }
  func.func @transform_2(%arg0: i32, %arg1: i32, %arg2: i32) -> (i32, i32) {
    %c0_i32 = arith.constant 0 : i32
    %c0_i32_0 = arith.constant 0 : i32
    return %c0_i32, %arg1 : i32, i32
  }
  func.func @transform_3(%arg0: i32, %arg1: i32, %arg2: i32) -> (i32, i32) {
    %c0_i32 = arith.constant 0 : i32
    return %arg0, %arg1 : i32, i32
  }
}

module attributes {stable_mosaic.version = 11 : i64} {
  func.func @_matmul_kernel(%arg0: i32, %arg1: i32, %arg2: i32, %arg3: memref<40x256xbf16, #tpu.memory_space<vmem>>, %arg4: memref<256x256xbf16, #tpu.memory_space<vmem>>, %arg5: memref<1x256xf32, #tpu.memory_space<vmem>>, %arg6: memref<40x256xbf16, #tpu.memory_space<vmem>>, %arg7: memref<40x256xf32, #tpu.memory_space<vmem>>) attributes {dimension_semantics = [#tpu.dimension_semantics<parallel>, #tpu.dimension_semantics<parallel>, #tpu.dimension_semantics<arbitrary>], iteration_bounds = array<i64: 1, 2, 1>, scalar_prefetch = 0 : i64, scratch_operands = 1 : i64, tpu.core_type = #tpu.core_type<tc>, window_params = [{transform_indices = @transform_0, window_bounds = array<i64: 40, 256>}, {transform_indices = @transform_1, window_bounds = array<i64: 256, 256>}, {transform_indices = @transform_2, window_bounds = array<i64: 1, 256>}, {transform_indices = @transform_3, window_bounds = array<i64: 40, 256>}]} {
    %c0_i32 = arith.constant 0 : i32
    %0 = arith.cmpi eq, %arg2, %c0_i32 : i32
    %1 = arith.extui %0 : i1 to i32
    %c0_i32_0 = arith.constant 0 : i32
    %2 = arith.cmpi ne, %1, %c0_i32_0 : i32
    scf.if %2 {
      %cst_10 = arith.constant 0.000000e+00 : f32
      %12 = vector.broadcast %cst_10 : f32 to vector<40x256xf32>
      %c0_11 = arith.constant 0 : index
      %c0_12 = arith.constant 0 : index
      %13 = vector.load %arg7[%c0_11, %c0_12] : memref<40x256xf32, #tpu.memory_space<vmem>>, vector<40x256xf32>
      tpu.vector_store %arg7[%c0_11, %c0_12], %12 {strides = array<i32>} : memref<40x256xf32, #tpu.memory_space<vmem>>, vector<40x256xf32>,
    } else {
    }
    %c0 = arith.constant 0 : index
    %c0_1 = arith.constant 0 : index
    %3 = vector.load %arg7[%c0, %c0_1] : memref<40x256xf32, #tpu.memory_space<vmem>>, vector<40x256xf32>
    %c0_2 = arith.constant 0 : index
    %c0_3 = arith.constant 0 : index
    %4 = vector.load %arg3[%c0_2, %c0_3] : memref<40x256xbf16, #tpu.memory_space<vmem>>, vector<40x256xbf16>
    %c0_4 = arith.constant 0 : index
    %c0_5 = arith.constant 0 : index
    %5 = vector.load %arg4[%c0_4, %c0_5] : memref<256x256xbf16, #tpu.memory_space<vmem>>, vector<256x256xbf16>
    %cst = arith.constant dense<0.000000e+00> : vector<40x256xf32>
    %6 = tpu.matmul %4, %5, %cst {dimension_numbers = #tpu.dot_dimension_numbers<[1], [0], [0], [1], [0, 0, 1, 1], [], []>} : vector<40x256xbf16>, vector<256x256xbf16>, vector<40x256xf32> -> vector<40x256xf32>
    %7 = arith.addf %3, %6 : vector<40x256xf32>
    %c0_6 = arith.constant 0 : index
    %c0_7 = arith.constant 0 : index
    %8 = vector.load %arg7[%c0_6, %c0_7] : memref<40x256xf32, #tpu.memory_space<vmem>>, vector<40x256xf32>
    tpu.vector_store %arg7[%c0_6, %c0_7], %7 {strides = array<i32>} : memref<40x256xf32, #tpu.memory_space<vmem>>, vector<40x256xf32>,
    %c0_i32_8 = arith.constant 0 : i32
    %9 = arith.cmpi eq, %arg2, %c0_i32_8 : i32
    %10 = arith.extui %9 : i1 to i32
    %c0_i32_9 = arith.constant 0 : i32
    %11 = arith.cmpi ne, %10, %c0_i32_9 : i32
    scf.if %11 {
      %c0_10 = arith.constant 0 : index
      %c0_11 = arith.constant 0 : index
      %12 = vector.load %arg7[%c0_10, %c0_11] : memref<40x256xf32, #tpu.memory_space<vmem>>, vector<40x256xf32>
      %c0_12 = arith.constant 0 : index
      %c0_13 = arith.constant 0 : index
      %13 = vector.load %arg5[%c0_12, %c0_13] : memref<1x256xf32, #tpu.memory_space<vmem>>, vector<1x256xf32>
      %14 = vector.broadcast %13 : vector<1x256xf32> to vector<40x256xf32>
      %15 = arith.addf %12, %14 : vector<40x256xf32>
      %16 = arith.mulf %15, %15 : vector<40x256xf32>
      %17 = arith.mulf %15, %16 : vector<40x256xf32>
      %cst_14 = arith.constant 4.471500e-02 : f32
      %18 = vector.broadcast %cst_14 : f32 to vector<40x256xf32>
      %19 = arith.mulf %18, %17 : vector<40x256xf32>
      %20 = arith.addf %15, %19 : vector<40x256xf32>
      %cst_15 = arith.constant 0.797884583 : f32
      %21 = vector.broadcast %cst_15 : f32 to vector<40x256xf32>
      %22 = arith.mulf %21, %20 : vector<40x256xf32>
      %23 = math.tanh %22 : vector<40x256xf32>
      %cst_16 = arith.constant 1.000000e+00 : f32
      %24 = vector.broadcast %cst_16 : f32 to vector<40x256xf32>
      %25 = arith.addf %24, %23 : vector<40x256xf32>
      %cst_17 = arith.constant 5.000000e-01 : f32
      %26 = vector.broadcast %cst_17 : f32 to vector<40x256xf32>
      %27 = arith.mulf %26, %25 : vector<40x256xf32>
      %28 = arith.mulf %15, %27 : vector<40x256xf32>
      %29 = arith.truncf %28 : vector<40x256xf32> to vector<40x256xbf16>
      %c0_18 = arith.constant 0 : index
      %c0_19 = arith.constant 0 : index
      %30 = vector.load %arg6[%c0_18, %c0_19] : memref<40x256xbf16, #tpu.memory_space<vmem>>, vector<40x256xbf16>
      tpu.vector_store %arg6[%c0_18, %c0_19], %29 {strides = array<i32>} : memref<40x256xbf16, #tpu.memory_space<vmem>>, vector<40x256xbf16>,
    } else {
    }
    return
  }
  func.func @transform_0(%arg0: i32, %arg1: i32, %arg2: i32) -> (i32, i32) {
    %c0_i32 = arith.constant 0 : i32
    return %arg0, %arg2 : i32, i32
  }
  func.func @transform_1(%arg0: i32, %arg1: i32, %arg2: i32) -> (i32, i32) {
    %c0_i32 = arith.constant 0 : i32
    return %arg2, %arg1 : i32, i32
  }
  func.func @transform_2(%arg0: i32, %arg1: i32, %arg2: i32) -> (i32, i32) {
    %c0_i32 = arith.constant 0 : i32
    %c0_i32_0 = arith.constant 0 : i32
    return %c0_i32, %arg1 : i32, i32
  }
  func.func @transform_3(%arg0: i32, %arg1: i32, %arg2: i32) -> (i32, i32) {
    %c0_i32 = arith.constant 0 : i32
    return %arg0, %arg1 : i32, i32
  }
}

module attributes {stable_mosaic.version = 11 : i64} {
  func.func @_matmul_res_ln_kernel(%arg0: i32, %arg1: i32, %arg2: memref<40x512xbf16, #tpu.memory_space<vmem>>, %arg3: memref<512x256xbf16, #tpu.memory_space<vmem>>, %arg4: memref<1x256xf32, #tpu.memory_space<vmem>>, %arg5: memref<40x256xbf16, #tpu.memory_space<vmem>>, %arg6: memref<1x256xf32, #tpu.memory_space<vmem>>, %arg7: memref<1x256xf32, #tpu.memory_space<vmem>>, %arg8: memref<40x256xbf16, #tpu.memory_space<vmem>>, %arg9: memref<40x256xf32, #tpu.memory_space<vmem>>) attributes {dimension_semantics = [#tpu.dimension_semantics<parallel>, #tpu.dimension_semantics<arbitrary>], iteration_bounds = array<i64: 1, 1>, scalar_prefetch = 0 : i64, scratch_operands = 1 : i64, tpu.core_type = #tpu.core_type<tc>, window_params = [{transform_indices = @transform_0, window_bounds = array<i64: 40, 512>}, {transform_indices = @transform_1, window_bounds = array<i64: 512, 256>}, {pipeline_mode = #tpu.pipeline_mode<synchronous>, transform_indices = @transform_2, window_bounds = array<i64: 1, 256>}, {transform_indices = @transform_3, window_bounds = array<i64: 40, 256>}, {pipeline_mode = #tpu.pipeline_mode<synchronous>, transform_indices = @transform_4, window_bounds = array<i64: 1, 256>}, {pipeline_mode = #tpu.pipeline_mode<synchronous>, transform_indices = @transform_5, window_bounds = array<i64: 1, 256>}, {transform_indices = @transform_6, window_bounds = array<i64: 40, 256>}]} {
    %c0_i32 = arith.constant 0 : i32
    %0 = arith.cmpi eq, %arg1, %c0_i32 : i32
    %1 = arith.extui %0 : i1 to i32
    %c0_i32_0 = arith.constant 0 : i32
    %2 = arith.cmpi ne, %1, %c0_i32_0 : i32
    scf.if %2 {
      %cst_10 = arith.constant 0.000000e+00 : f32
      %12 = vector.broadcast %cst_10 : f32 to vector<40x256xf32>
      %c0_11 = arith.constant 0 : index
      %c0_12 = arith.constant 0 : index
      %13 = vector.load %arg9[%c0_11, %c0_12] : memref<40x256xf32, #tpu.memory_space<vmem>>, vector<40x256xf32>
      tpu.vector_store %arg9[%c0_11, %c0_12], %12 {strides = array<i32>} : memref<40x256xf32, #tpu.memory_space<vmem>>, vector<40x256xf32>,
    } else {
    }
    %c0 = arith.constant 0 : index
    %c0_1 = arith.constant 0 : index
    %3 = vector.load %arg9[%c0, %c0_1] : memref<40x256xf32, #tpu.memory_space<vmem>>, vector<40x256xf32>
    %c0_2 = arith.constant 0 : index
    %c0_3 = arith.constant 0 : index
    %4 = vector.load %arg2[%c0_2, %c0_3] : memref<40x512xbf16, #tpu.memory_space<vmem>>, vector<40x512xbf16>
    %c0_4 = arith.constant 0 : index
    %c0_5 = arith.constant 0 : index
    %5 = vector.load %arg3[%c0_4, %c0_5] : memref<512x256xbf16, #tpu.memory_space<vmem>>, vector<512x256xbf16>
    %cst = arith.constant dense<0.000000e+00> : vector<40x256xf32>
    %6 = tpu.matmul %4, %5, %cst {dimension_numbers = #tpu.dot_dimension_numbers<[1], [0], [0], [1], [0, 0, 1, 1], [], []>} : vector<40x512xbf16>, vector<512x256xbf16>, vector<40x256xf32> -> vector<40x256xf32>
    %7 = arith.addf %3, %6 : vector<40x256xf32>
    %c0_6 = arith.constant 0 : index
    %c0_7 = arith.constant 0 : index
    %8 = vector.load %arg9[%c0_6, %c0_7] : memref<40x256xf32, #tpu.memory_space<vmem>>, vector<40x256xf32>
    tpu.vector_store %arg9[%c0_6, %c0_7], %7 {strides = array<i32>} : memref<40x256xf32, #tpu.memory_space<vmem>>, vector<40x256xf32>,
    %c0_i32_8 = arith.constant 0 : i32
    %9 = arith.cmpi eq, %arg1, %c0_i32_8 : i32
    %10 = arith.extui %9 : i1 to i32
    %c0_i32_9 = arith.constant 0 : i32
    %11 = arith.cmpi ne, %10, %c0_i32_9 : i32
    scf.if %11 {
      %c0_10 = arith.constant 0 : index
      %c0_11 = arith.constant 0 : index
      %12 = vector.load %arg9[%c0_10, %c0_11] : memref<40x256xf32, #tpu.memory_space<vmem>>, vector<40x256xf32>
      %c0_12 = arith.constant 0 : index
      %c0_13 = arith.constant 0 : index
      %13 = vector.load %arg4[%c0_12, %c0_13] : memref<1x256xf32, #tpu.memory_space<vmem>>, vector<1x256xf32>
      %14 = vector.broadcast %13 : vector<1x256xf32> to vector<40x256xf32>
      %15 = arith.addf %12, %14 : vector<40x256xf32>
      %c0_14 = arith.constant 0 : index
      %c0_15 = arith.constant 0 : index
      %16 = vector.load %arg5[%c0_14, %c0_15] : memref<40x256xbf16, #tpu.memory_space<vmem>>, vector<40x256xbf16>
      %17 = arith.extf %16 : vector<40x256xbf16> to vector<40x256xf32>
      %18 = arith.addf %15, %17 : vector<40x256xf32>
      %cst_16 = arith.constant dense<0.000000e+00> : vector<40xf32>
      %19 = vector.multi_reduction <add>, %18, %cst_16 [1] : vector<40x256xf32> to vector<40xf32>
      %20 = vector.shape_cast %19 : vector<40xf32> to vector<40x1xf32>
      %cst_17 = arith.constant 2.560000e+02 : f32
      %21 = vector.broadcast %cst_17 : f32 to vector<40x1xf32>
      %22 = arith.divf %20, %21 : vector<40x1xf32>
      %23 = vector.broadcast %22 : vector<40x1xf32> to vector<40x256xf32>
      %24 = arith.subf %18, %23 : vector<40x256xf32>
      %25 = arith.mulf %24, %24 : vector<40x256xf32>
      %cst_18 = arith.constant dense<0.000000e+00> : vector<40xf32>
      %26 = vector.multi_reduction <add>, %25, %cst_18 [1] : vector<40x256xf32> to vector<40xf32>
      %27 = vector.shape_cast %26 : vector<40xf32> to vector<40x1xf32>
      %cst_19 = arith.constant 2.560000e+02 : f32
      %28 = vector.broadcast %cst_19 : f32 to vector<40x1xf32>
      %29 = arith.divf %27, %28 : vector<40x1xf32>
      %cst_20 = arith.constant 9.99999974E-6 : f32
      %30 = vector.broadcast %cst_20 : f32 to vector<40x1xf32>
      %31 = arith.addf %29, %30 : vector<40x1xf32>
      %32 = math.rsqrt %31 : vector<40x1xf32>
      %33 = vector.broadcast %32 : vector<40x1xf32> to vector<40x256xf32>
      %34 = arith.mulf %24, %33 : vector<40x256xf32>
      %c0_21 = arith.constant 0 : index
      %c0_22 = arith.constant 0 : index
      %35 = vector.load %arg6[%c0_21, %c0_22] : memref<1x256xf32, #tpu.memory_space<vmem>>, vector<1x256xf32>
      %36 = vector.broadcast %35 : vector<1x256xf32> to vector<40x256xf32>
      %37 = arith.mulf %34, %36 : vector<40x256xf32>
      %c0_23 = arith.constant 0 : index
      %c0_24 = arith.constant 0 : index
      %38 = vector.load %arg7[%c0_23, %c0_24] : memref<1x256xf32, #tpu.memory_space<vmem>>, vector<1x256xf32>
      %39 = vector.broadcast %38 : vector<1x256xf32> to vector<40x256xf32>
      %40 = arith.addf %37, %39 : vector<40x256xf32>
      %41 = arith.truncf %40 : vector<40x256xf32> to vector<40x256xbf16>
      %c0_25 = arith.constant 0 : index
      %c0_26 = arith.constant 0 : index
      %42 = vector.load %arg8[%c0_25, %c0_26] : memref<40x256xbf16, #tpu.memory_space<vmem>>, vector<40x256xbf16>
      tpu.vector_store %arg8[%c0_25, %c0_26], %41 {strides = array<i32>} : memref<40x256xbf16, #tpu.memory_space<vmem>>, vector<40x256xbf16>,
    } else {
    }
    return
  }
  func.func @transform_0(%arg0: i32, %arg1: i32) -> (i32, i32) {
    %c0_i32 = arith.constant 0 : i32
    return %arg0, %arg1 : i32, i32
  }
  func.func @transform_1(%arg0: i32, %arg1: i32) -> (i32, i32) {
    %c0_i32 = arith.constant 0 : i32
    %c0_i32_0 = arith.constant 0 : i32
    return %arg1, %c0_i32 : i32, i32
  }
  func.func @transform_2(%arg0: i32, %arg1: i32) -> (i32, i32) {
    %c0_i32 = arith.constant 0 : i32
    %c0_i32_0 = arith.constant 0 : i32
    %c0_i32_1 = arith.constant 0 : i32
    return %c0_i32, %c0_i32_0 : i32, i32
  }
  func.func @transform_3(%arg0: i32, %arg1: i32) -> (i32, i32) {
    %c0_i32 = arith.constant 0 : i32
    %c0_i32_0 = arith.constant 0 : i32
    return %arg0, %c0_i32 : i32, i32
  }
  func.func @transform_4(%arg0: i32, %arg1: i32) -> (i32, i32) {
    %c0_i32 = arith.constant 0 : i32
    %c0_i32_0 = arith.constant 0 : i32
    %c0_i32_1 = arith.constant 0 : i32
    return %c0_i32, %c0_i32_0 : i32, i32
  }
  func.func @transform_5(%arg0: i32, %arg1: i32) -> (i32, i32) {
    %c0_i32 = arith.constant 0 : i32
    %c0_i32_0 = arith.constant 0 : i32
    %c0_i32_1 = arith.constant 0 : i32
    return %c0_i32, %c0_i32_0 : i32, i32
  }
  func.func @transform_6(%arg0: i32, %arg1: i32) -> (i32, i32) {
    %c0_i32 = arith.constant 0 : i32
    %c0_i32_0 = arith.constant 0 : i32
    return %arg0, %c0_i32 : i32, i32
  }
}

module attributes {stable_mosaic.version = 11 : i64} {
  func.func @_matmul_kernel(%arg0: i32, %arg1: i32, %arg2: i32, %arg3: memref<32x256xbf16, #tpu.memory_space<vmem>>, %arg4: memref<256x128xbf16, #tpu.memory_space<vmem>>, %arg5: memref<1x128xf32, #tpu.memory_space<vmem>>, %arg6: memref<32x128xf32, #tpu.memory_space<vmem>>, %arg7: memref<32x128xf32, #tpu.memory_space<vmem>>) attributes {dimension_semantics = [#tpu.dimension_semantics<parallel>, #tpu.dimension_semantics<parallel>, #tpu.dimension_semantics<arbitrary>], iteration_bounds = array<i64: 1, 1, 1>, scalar_prefetch = 0 : i64, scratch_operands = 1 : i64, tpu.core_type = #tpu.core_type<tc>, window_params = [{transform_indices = @transform_0, window_bounds = array<i64: 32, 256>}, {transform_indices = @transform_1, window_bounds = array<i64: 256, 128>}, {transform_indices = @transform_2, window_bounds = array<i64: 1, 128>}, {transform_indices = @transform_3, window_bounds = array<i64: 32, 128>}]} {
    %c0_i32 = arith.constant 0 : i32
    %0 = arith.cmpi eq, %arg2, %c0_i32 : i32
    %1 = arith.extui %0 : i1 to i32
    %c0_i32_0 = arith.constant 0 : i32
    %2 = arith.cmpi ne, %1, %c0_i32_0 : i32
    scf.if %2 {
      %cst_10 = arith.constant 0.000000e+00 : f32
      %12 = vector.broadcast %cst_10 : f32 to vector<32x128xf32>
      %c0_11 = arith.constant 0 : index
      %c0_12 = arith.constant 0 : index
      %13 = vector.load %arg7[%c0_11, %c0_12] : memref<32x128xf32, #tpu.memory_space<vmem>>, vector<32x128xf32>
      tpu.vector_store %arg7[%c0_11, %c0_12], %12 {strides = array<i32>} : memref<32x128xf32, #tpu.memory_space<vmem>>, vector<32x128xf32>,
    } else {
    }
    %c0 = arith.constant 0 : index
    %c0_1 = arith.constant 0 : index
    %3 = vector.load %arg7[%c0, %c0_1] : memref<32x128xf32, #tpu.memory_space<vmem>>, vector<32x128xf32>
    %c0_2 = arith.constant 0 : index
    %c0_3 = arith.constant 0 : index
    %4 = vector.load %arg3[%c0_2, %c0_3] : memref<32x256xbf16, #tpu.memory_space<vmem>>, vector<32x256xbf16>
    %c0_4 = arith.constant 0 : index
    %c0_5 = arith.constant 0 : index
    %5 = vector.load %arg4[%c0_4, %c0_5] : memref<256x128xbf16, #tpu.memory_space<vmem>>, vector<256x128xbf16>
    %cst = arith.constant dense<0.000000e+00> : vector<32x128xf32>
    %6 = tpu.matmul %4, %5, %cst {dimension_numbers = #tpu.dot_dimension_numbers<[1], [0], [0], [1], [0, 0, 1, 1], [], []>} : vector<32x256xbf16>, vector<256x128xbf16>, vector<32x128xf32> -> vector<32x128xf32>
    %7 = arith.addf %3, %6 : vector<32x128xf32>
    %c0_6 = arith.constant 0 : index
    %c0_7 = arith.constant 0 : index
    %8 = vector.load %arg7[%c0_6, %c0_7] : memref<32x128xf32, #tpu.memory_space<vmem>>, vector<32x128xf32>
    tpu.vector_store %arg7[%c0_6, %c0_7], %7 {strides = array<i32>} : memref<32x128xf32, #tpu.memory_space<vmem>>, vector<32x128xf32>,
    %c0_i32_8 = arith.constant 0 : i32
    %9 = arith.cmpi eq, %arg2, %c0_i32_8 : i32
    %10 = arith.extui %9 : i1 to i32
    %c0_i32_9 = arith.constant 0 : i32
    %11 = arith.cmpi ne, %10, %c0_i32_9 : i32
    scf.if %11 {
      %c0_10 = arith.constant 0 : index
      %c0_11 = arith.constant 0 : index
      %12 = vector.load %arg7[%c0_10, %c0_11] : memref<32x128xf32, #tpu.memory_space<vmem>>, vector<32x128xf32>
      %c0_12 = arith.constant 0 : index
      %c0_13 = arith.constant 0 : index
      %13 = vector.load %arg5[%c0_12, %c0_13] : memref<1x128xf32, #tpu.memory_space<vmem>>, vector<1x128xf32>
      %14 = vector.broadcast %13 : vector<1x128xf32> to vector<32x128xf32>
      %15 = arith.addf %12, %14 : vector<32x128xf32>
      %c0_14 = arith.constant 0 : index
      %c0_15 = arith.constant 0 : index
      %16 = vector.load %arg6[%c0_14, %c0_15] : memref<32x128xf32, #tpu.memory_space<vmem>>, vector<32x128xf32>
      tpu.vector_store %arg6[%c0_14, %c0_15], %15 {strides = array<i32>} : memref<32x128xf32, #tpu.memory_space<vmem>>, vector<32x128xf32>,
    } else {
    }
    return
  }
  func.func @transform_0(%arg0: i32, %arg1: i32, %arg2: i32) -> (i32, i32) {
    %c0_i32 = arith.constant 0 : i32
    return %arg0, %arg2 : i32, i32
  }
  func.func @transform_1(%arg0: i32, %arg1: i32, %arg2: i32) -> (i32, i32) {
    %c0_i32 = arith.constant 0 : i32
    return %arg2, %arg1 : i32, i32
  }
  func.func @transform_2(%arg0: i32, %arg1: i32, %arg2: i32) -> (i32, i32) {
    %c0_i32 = arith.constant 0 : i32
    %c0_i32_0 = arith.constant 0 : i32
    return %c0_i32, %arg1 : i32, i32
  }
  func.func @transform_3(%arg0: i32, %arg1: i32, %arg2: i32) -> (i32, i32) {
    %c0_i32 = arith.constant 0 : i32
    return %arg0, %arg1 : i32, i32
  }
}

</mosaic_0001>

<bundles_post_ra>
// kernel: mdm_simetric_forward.17
= control target key start
LH: loop header
LB: loop body
LE: loop exit
PB: predicated region body
PF: predicated region fallthrough
CT: control target
= control target key end

     0   :  { %v231_v1 = vmov 0   ;;  %v172_v18 = vlaneseq  ;;  %s312_s1 = inlined_call_operand.vmem [shape: bf16[128,256], index: 1, kind: input, shape index: {}]   ;;  %s313_s0 = inlined_call_operand.vmem [shape: bf16[8,128], index: 0, kind: input, shape index: {}]   ;;  %s314_s2 = inlined_call_operand.vmem [shape: f32[1,256], index: 2, kind: input, shape index: {}]   ;;  %s315_s3 = inlined_call_operand.vmem [shape: f32[8,256], index: 3, kind: output, shape index: {}]  }
   0x1   :  { %v207_v0 = vld [vmem:[%s312_s1 + $0x74] ss:$8 sps:$4 sm:$0xff]   ;;  %152 = vmatprep.mubr.bf16.mxu0 %v231_v1  ;;  %v209_v2 = vld [vmem:[%s312_s1 + $0x70] ss:$8 sps:$4 sm:$0xff]   ;;  %v210_v3 = vld [vmem:[%s312_s1 + $0x64] ss:$8 sps:$4 sm:$0xff]  }
   0x2   :  { %120 = vmatprep.subr.bf16.mxu0 %v207_v0  ;;  %v212_v4 = vld [vmem:[%s312_s1 + $0x60] ss:$8 sps:$4 sm:$0xff]   ;;  %v213_v5 = vld [vmem:[%s312_s1 + $0x54] ss:$8 sps:$4 sm:$0xff]   ;;  %v215_v6 = vld [vmem:[%s312_s1 + $0x50] ss:$8 sps:$4 sm:$0xff]  }
   0x3   :  { %121 = vmatpush1.bf16.msra.mxu0 %v209_v2  ;;  %v216_v7 = vld [vmem:[%s312_s1 + $0x44] ss:$8 sps:$4 sm:$0xff]   ;;  %v218_v8 = vld [vmem:[%s312_s1 + $0x40] ss:$8 sps:$4 sm:$0xff]   ;;  %v219_v9 = vld [vmem:[%s312_s1 + $0x34] ss:$8 sps:$4 sm:$0xff]  }
   0x4   :  { %122 = vmatprep.subr.bf16.mxu0 %v210_v3  ;;  %v221_v10 = vld [vmem:[%s312_s1 + $0x30] ss:$8 sps:$4 sm:$0xff]   ;;  %v222_v11 = vld [vmem:[%s312_s1 + $0x24] ss:$8 sps:$4 sm:$0xff]   ;;  %v224_v12 = vld [vmem:[%s312_s1 + $0x20] ss:$8 sps:$4 sm:$0xff]  }
   0x5   :  { %v225_v13 = vld [vmem:[%s312_s1 + $0x14] ss:$8 sps:$4 sm:$0xff]   ;;  %v227_v14 = vld [vmem:[%s312_s1 + $0x10] ss:$8 sps:$4 sm:$0xff]   ;;  %v228_v15 = vld [vmem:[%s312_s1 + $0x4] ss:$8 sps:$4 sm:$0xff]  }
   0x6   :  { %v230_v16 = vld [vmem:[%s312_s1] ss:$8 sps:$4 sm:$0xff]   ;;  %v173_v19 = vshrl.u32 %v172_v18, 7 }
   0x7   :  { %123 = vmatpush1.bf16.msra.mxu0 %v212_v4  ;;  %v23_v17 = vld [vmem:[%s313_s0] sm:$0xf] }
   0x8   :  { %124 = vmatprep.subr.bf16.mxu0 %v213_v5  ;;  %v174_v20 = vsub.s32 0, %v173_v19  ;;  %v170_v21 = vld [vmem:[%s314_s2] sm:$0x3]  ;;  %v178_v22 = vsub.s32 1, %v173_v19 }
   0xa   :  { %v175_v23 = vrot.slane %v170_v21, %v174_v20  ;;  %v179_v24 = vrot.slane %v170_v21, %v178_v22 }
   0xb   :  { %125 = vmatpush1.bf16.msra.mxu0 %v215_v6 }
   0xc   :  { %126 = vmatprep.subr.bf16.mxu0 %v216_v7 }
   0xf   :  { %127 = vmatpush1.bf16.msra.mxu0 %v218_v8 }
  0x10   :  { %128 = vmatprep.subr.bf16.mxu0 %v219_v9 }
  0x13   :  { %129 = vmatpush1.bf16.msra.mxu0 %v221_v10 }
  0x14   :  { %130 = vmatprep.subr.bf16.mxu0 %v222_v11 }
  0x17   :  { %131 = vmatpush1.bf16.msra.mxu0 %v224_v12 }
  0x18   :  { %132 = vmatprep.subr.bf16.mxu0 %v225_v13 }
  0x1b   :  { %133 = vmatpush1.bf16.msra.mxu0 %v227_v14 }
  0x1c   :  { %134 = vmatprep.subr.bf16.mxu0 %v228_v15 }
  0x1f   :  { %135 = vmatpush1.bf16.msra.mxu0 %v230_v16 }
  0x22   :  { %153 = vmatmul.mubr.bf16.vlgmr.msra.gmra.mxu0 %v23_v17 }
  0xe2   :  { %v154_v25 = vpop.f32.mrf.mxu0 }
  0xe3   :  { %v182_v26 = vadd.f32 %v175_v23, %v154_v25 }
  0xe4   :  { %v156_v27 = vpop.f32.mrf.mxu0 }
  0xe5   :  { %184 = vst [vmem:[%s315_s3] sm:$0xff] %v182_v26  ;;  %v183_v28 = vadd.f32 %v179_v24, %v156_v27 }
  0xe6   :  { %v158_v29 = vpop.f32.mrf.mxu0 }
  0xe7   :  { %185 = vst [vmem:[%s315_s3 + $0x8] sm:$0xff] %v183_v28 }
  0xe8   :  { %v159_v30 = vpop.f32.mrf.mxu0 }

// kernel: mdm_simetric_forward.18
= control target key start
LH: loop header
LB: loop body
LE: loop exit
PB: predicated region body
PF: predicated region fallthrough
CT: control target
= control target key end

     0   :  { %v320_v1 = vmov 0   ;;  %v229_v19 = vlaneseq  ;;  %s422_s1 = inlined_call_operand.vmem [shape: bf16[128,256], index: 1, kind: input, shape index: {}]   ;;  %s423_s0 = inlined_call_operand.vmem [shape: bf16[32,128], index: 0, kind: input, shape index: {}]   ;;  %s424_s2 = inlined_call_operand.vmem [shape: f32[1,256], index: 2, kind: input, shape index: {}]   ;;  %s425_s3 = inlined_call_operand.vmem [shape: f32[32,256], index: 3, kind: output, shape index: {}]  }
   0x1   :  { %v294_v0 = vld [vmem:[%s422_s1 + $0x74] ss:$8 sps:$4 sm:$0xff]   ;;  %179 = vmatprep.mubr.bf16.mxu0 %v320_v1  ;;  %189 = vmatprep.mubr.bf16.mxu1 %v320_v1  ;;  %v296_v2 = vld [vmem:[%s422_s1 + $0x70] ss:$8 sps:$4 sm:$0xff]   ;;  %v297_v3 = vld [vmem:[%s422_s1 + $0x64] ss:$8 sps:$4 sm:$0xff]  }
   0x2   :  { %147 = vmatprep.subr.bf16.mxu0 %v294_v0  ;;  %277 = vmatprep.subr.bf16.mxu1 %v294_v0  ;;  %v299_v4 = vld [vmem:[%s422_s1 + $0x60] ss:$8 sps:$4 sm:$0xff]   ;;  %v300_v5 = vld [vmem:[%s422_s1 + $0x54] ss:$8 sps:$4 sm:$0xff]   ;;  %v302_v6 = vld [vmem:[%s422_s1 + $0x50] ss:$8 sps:$4 sm:$0xff]  }
   0x3   :  { %148 = vmatpush1.bf16.msra.mxu0 %v296_v2  ;;  %285 = vmatpush1.bf16.msra.mxu1 %v296_v2  ;;  %v303_v7 = vld [vmem:[%s422_s1 + $0x44] ss:$8 sps:$4 sm:$0xff]   ;;  %v305_v8 = vld [vmem:[%s422_s1 + $0x40] ss:$8 sps:$4 sm:$0xff]   ;;  %v306_v9 = vld [vmem:[%s422_s1 + $0x34] ss:$8 sps:$4 sm:$0xff]  }
   0x4   :  { %149 = vmatprep.subr.bf16.mxu0 %v297_v3  ;;  %278 = vmatprep.subr.bf16.mxu1 %v297_v3  ;;  %v308_v10 = vld [vmem:[%s422_s1 + $0x30] ss:$8 sps:$4 sm:$0xff]   ;;  %v309_v11 = vld [vmem:[%s422_s1 + $0x24] ss:$8 sps:$4 sm:$0xff]   ;;  %v311_v12 = vld [vmem:[%s422_s1 + $0x20] ss:$8 sps:$4 sm:$0xff]  }
   0x5   :  { %v312_v13 = vld [vmem:[%s422_s1 + $0x14] ss:$8 sps:$4 sm:$0xff]   ;;  %v314_v14 = vld [vmem:[%s422_s1 + $0x10] ss:$8 sps:$4 sm:$0xff]   ;;  %v315_v15 = vld [vmem:[%s422_s1 + $0x4] ss:$8 sps:$4 sm:$0xff]  }
   0x6   :  { %v317_v16 = vld [vmem:[%s422_s1] ss:$8 sps:$4 sm:$0xff]   ;;  %v230_v20 = vshrl.u32 %v229_v19, 7 }
   0x7   :  { %150 = vmatpush1.bf16.msra.mxu0 %v299_v4  ;;  %286 = vmatpush1.bf16.msra.mxu1 %v299_v4  ;;  %v318_v17 = vld [vmem:[%s423_s0] sm:$0xff]   ;;  %v319_v18 = vld [vmem:[%s423_s0 + $0x8] sm:$0xff]  }
   0x8   :  { %151 = vmatprep.subr.bf16.mxu0 %v300_v5  ;;  %279 = vmatprep.subr.bf16.mxu1 %v300_v5  ;;  %v231_v21 = vsub.s32 0, %v230_v20  ;;  %v227_v22 = vld [vmem:[%s424_s2] sm:$0x3]  ;;  %v235_v23 = vsub.s32 1, %v230_v20 }
   0xa   :  { %v232_v24 = vrot.slane %v227_v22, %v231_v21  ;;  %v236_v25 = vrot.slane %v227_v22, %v235_v23 }
   0xb   :  { %152 = vmatpush1.bf16.msra.mxu0 %v302_v6  ;;  %287 = vmatpush1.bf16.msra.mxu1 %v302_v6 }
   0xc   :  { %153 = vmatprep.subr.bf16.mxu0 %v303_v7  ;;  %280 = vmatprep.subr.bf16.mxu1 %v303_v7 }
   0xf   :  { %154 = vmatpush1.bf16.msra.mxu0 %v305_v8  ;;  %288 = vmatpush1.bf16.msra.mxu1 %v305_v8 }
  0x10   :  { %155 = vmatprep.subr.bf16.mxu0 %v306_v9  ;;  %281 = vmatprep.subr.bf16.mxu1 %v306_v9 }
  0x13   :  { %156 = vmatpush1.bf16.msra.mxu0 %v308_v10  ;;  %289 = vmatpush1.bf16.msra.mxu1 %v308_v10 }
  0x14   :  { %157 = vmatprep.subr.bf16.mxu0 %v309_v11  ;;  %282 = vmatprep.subr.bf16.mxu1 %v309_v11 }
  0x17   :  { %158 = vmatpush1.bf16.msra.mxu0 %v311_v12  ;;  %290 = vmatpush1.bf16.msra.mxu1 %v311_v12 }
  0x18   :  { %159 = vmatprep.subr.bf16.mxu0 %v312_v13  ;;  %283 = vmatprep.subr.bf16.mxu1 %v312_v13 }
  0x1b   :  { %160 = vmatpush1.bf16.msra.mxu0 %v314_v14  ;;  %291 = vmatpush1.bf16.msra.mxu1 %v314_v14 }
  0x1c   :  { %161 = vmatprep.subr.bf16.mxu0 %v315_v15  ;;  %284 = vmatprep.subr.bf16.mxu1 %v315_v15 }
  0x1f   :  { %162 = vmatpush1.bf16.msra.mxu0 %v317_v16  ;;  %292 = vmatpush1.bf16.msra.mxu1 %v317_v16 }
  0x22   :  { %180 = vmatmul.mubr.bf16.vlgmr.msra.gmra.mxu0 %v318_v17  ;;  %190 = vmatmul.mubr.bf16.vlgmr.msra.gmra.mxu1 %v319_v18 }
  0xe2   :  { %v181_v26 = vpop.f32.mrf.mxu0  ;;  %v191_v27 = vpop.f32.mrf.mxu1 }
  0xe3   :  { %v239_v28 = vadd.f32 %v232_v24, %v181_v26  ;;  %v243_v29 = vadd.f32 %v232_v24, %v191_v27 }
  0xe4   :  { %v183_v30 = vpop.f32.mrf.mxu0  ;;  %v193_v31 = vpop.f32.mrf.mxu1 }
  0xe5   :  { %247 = vst [vmem:[%s425_s3] sm:$0xff] %v239_v28  ;;  %251 = vst [vmem:[%s425_s3 + $0x20] sm:$0xff] %v243_v29  ;;  %v240_v32 = vadd.f32 %v236_v25, %v183_v30  ;;  %v244_v33 = vadd.f32 %v236_v25, %v193_v31 }
  0xe6   :  { %v185_v34 = vpop.f32.mrf.mxu0  ;;  %v195_v35 = vpop.f32.mrf.mxu1 }
  0xe7   :  { %248 = vst [vmem:[%s425_s3 + $0x8] sm:$0xff] %v240_v32  ;;  %252 = vst [vmem:[%s425_s3 + $0x28] sm:$0xff] %v244_v33  ;;  %v241_v36 = vadd.f32 %v232_v24, %v185_v34  ;;  %v245_v37 = vadd.f32 %v232_v24, %v195_v35 }
  0xe8   :  { %v187_v38 = vpop.f32.mrf.mxu0  ;;  %v197_v39 = vpop.f32.mrf.mxu1 }
  0xe9   :  { %249 = vst [vmem:[%s425_s3 + $0x10] sm:$0xff] %v241_v36  ;;  %253 = vst [vmem:[%s425_s3 + $0x30] sm:$0xff] %v245_v37  ;;  %v242_v40 = vadd.f32 %v236_v25, %v187_v38  ;;  %v246_v41 = vadd.f32 %v236_v25, %v197_v39 }
  0xeb   :  { %250 = vst [vmem:[%s425_s3 + $0x18] sm:$0xff] %v242_v40  ;;  %254 = vst [vmem:[%s425_s3 + $0x38] sm:$0xff] %v246_v41 }

// kernel: mdm_simetric_forward.16
= control target key start
LH: loop header
LB: loop body
LE: loop exit
PB: predicated region body
PF: predicated region fallthrough
CT: control target
= control target key end

     0   :  { %v274_v35 = vlaneseq  ;;  %s504_s1 = inlined_call_operand.vmem [shape: bf16[256,256], index: 1, kind: input, shape index: {}]   ;;  %s505_s0 = inlined_call_operand.vmem [shape: bf16[8,256], index: 0, kind: input, shape index: {}]   ;;  %s506_s2 = inlined_call_operand.vmem [shape: f32[1,256], index: 2, kind: input, shape index: {}]   ;;  %s507_s3 = inlined_call_operand.vmem [shape: f32[8,256], index: 3, kind: output, shape index: {}]  }
   0x1   :  { %v326_v0 = vld [vmem:[%s504_s1 + $0x74] ss:$8 sps:$4 sm:$0xff]   ;;  %v328_v1 = vld [vmem:[%s504_s1 + $0x70] ss:$8 sps:$4 sm:$0xff]   ;;  %v329_v2 = vld [vmem:[%s504_s1 + $0x64] ss:$8 sps:$4 sm:$0xff]  }
   0x2   :  { %222 = vmatprep.subr.bf16.mxu0 %v326_v0  ;;  %v331_v3 = vld [vmem:[%s504_s1 + $0x60] ss:$8 sps:$4 sm:$0xff]   ;;  %v332_v4 = vld [vmem:[%s504_s1 + $0x54] ss:$8 sps:$4 sm:$0xff]   ;;  %v334_v5 = vld [vmem:[%s504_s1 + $0x50] ss:$8 sps:$4 sm:$0xff]  }
   0x3   :  { %223 = vmatpush1.bf16.msra.mxu0 %v328_v1  ;;  %v335_v6 = vld [vmem:[%s504_s1 + $0x44] ss:$8 sps:$4 sm:$0xff]   ;;  %v337_v7 = vld [vmem:[%s504_s1 + $0x40] ss:$8 sps:$4 sm:$0xff]   ;;  %v338_v8 = vld [vmem:[%s504_s1 + $0x34] ss:$8 sps:$4 sm:$0xff]  }
   0x4   :  { %224 = vmatprep.subr.bf16.mxu0 %v329_v2  ;;  %v340_v9 = vld [vmem:[%s504_s1 + $0x30] ss:$8 sps:$4 sm:$0xff]   ;;  %v341_v10 = vld [vmem:[%s504_s1 + $0x24] ss:$8 sps:$4 sm:$0xff]   ;;  %v343_v11 = vld [vmem:[%s504_s1 + $0x20] ss:$8 sps:$4 sm:$0xff]  }
   0x5   :  { %v344_v12 = vld [vmem:[%s504_s1 + $0x14] ss:$8 sps:$4 sm:$0xff]   ;;  %v22_v13 = vld [vmem:[%s505_s0] sm:$0xff]  ;;  %v346_v15 = vld [vmem:[%s504_s1 + $0x10] ss:$8 sps:$4 sm:$0xff]   ;;  %v275_v36 = vshrl.u32 %v274_v35, 7 }
   0x6   :  { %v293_v14 = vcombine.high %v22_v13, %v22_v13  ;;  %v347_v16 = vld [vmem:[%s504_s1 + $0x4] ss:$8 sps:$4 sm:$0xff]   ;;  %v349_v17 = vld [vmem:[%s504_s1] ss:$8 sps:$4 sm:$0xff]   ;;  %v350_v18 = vld [vmem:[%s504_s1 + $0xf4] ss:$8 sps:$4 sm:$0xff]   ;;  %v292_v34 = vcombine.low %v22_v13, %v22_v13 }
   0x7   :  { %225 = vmatpush1.bf16.msra.mxu0 %v331_v3  ;;  %v352_v19 = vld [vmem:[%s504_s1 + $0xf0] ss:$8 sps:$4 sm:$0xff]   ;;  %v353_v20 = vld [vmem:[%s504_s1 + $0xe4] ss:$8 sps:$4 sm:$0xff]   ;;  %v355_v21 = vld [vmem:[%s504_s1 + $0xe0] ss:$8 sps:$4 sm:$0xff]  }
   0x8   :  { %226 = vmatprep.subr.bf16.mxu0 %v332_v4  ;;  %254 = vmatprep.mubr.bf16.mxu0 %v293_v14  ;;  %v356_v22 = vld [vmem:[%s504_s1 + $0xd4] ss:$8 sps:$4 sm:$0xff]   ;;  %v358_v23 = vld [vmem:[%s504_s1 + $0xd0] ss:$8 sps:$4 sm:$0xff]   ;;  %v359_v24 = vld [vmem:[%s504_s1 + $0xc4] ss:$8 sps:$4 sm:$0xff]  }
   0x9   :  { %v361_v25 = vld [vmem:[%s504_s1 + $0xc0] ss:$8 sps:$4 sm:$0xff]   ;;  %v362_v26 = vld [vmem:[%s504_s1 + $0xb4] ss:$8 sps:$4 sm:$0xff]   ;;  %v364_v27 = vld [vmem:[%s504_s1 + $0xb0] ss:$8 sps:$4 sm:$0xff]  }
   0xa   :  { %v365_v28 = vld [vmem:[%s504_s1 + $0xa4] ss:$8 sps:$4 sm:$0xff]   ;;  %v367_v29 = vld [vmem:[%s504_s1 + $0xa0] ss:$8 sps:$4 sm:$0xff]   ;;  %v368_v30 = vld [vmem:[%s504_s1 + $0x94] ss:$8 sps:$4 sm:$0xff]  }
   0xb   :  { %227 = vmatpush1.bf16.msra.mxu0 %v334_v5  ;;  %v370_v31 = vld [vmem:[%s504_s1 + $0x90] ss:$8 sps:$4 sm:$0xff]   ;;  %v371_v32 = vld [vmem:[%s504_s1 + $0x84] ss:$8 sps:$4 sm:$0xff]   ;;  %v373_v33 = vld [vmem:[%s504_s1 + $0x80] ss:$8 sps:$4 sm:$0xff]  }
   0xc   :  { %228 = vmatprep.subr.bf16.mxu0 %v335_v6  ;;  %v276_v37 = vsub.s32 0, %v275_v36  ;;  %v272_v38 = vld [vmem:[%s506_s2] sm:$0x3]  ;;  %v280_v39 = vsub.s32 1, %v275_v36 }
   0xe   :  { %v277_v40 = vrot.slane %v272_v38, %v276_v37  ;;  %v281_v41 = vrot.slane %v272_v38, %v280_v39 }
   0xf   :  { %229 = vmatpush1.bf16.msra.mxu0 %v337_v7 }
  0x10   :  { %230 = vmatprep.subr.bf16.mxu0 %v338_v8 }
  0x13   :  { %231 = vmatpush1.bf16.msra.mxu0 %v340_v9 }
  0x14   :  { %232 = vmatprep.subr.bf16.mxu0 %v341_v10 }
  0x17   :  { %233 = vmatpush1.bf16.msra.mxu0 %v343_v11 }
  0x18   :  { %234 = vmatprep.subr.bf16.mxu0 %v344_v12 }
  0x1b   :  { %235 = vmatpush1.bf16.msra.mxu0 %v346_v15 }
  0x1c   :  { %236 = vmatprep.subr.bf16.mxu0 %v347_v16 }
  0x1f   :  { %237 = vmatpush1.bf16.msra.mxu0 %v349_v17 }
  0x20   :  { %238 = vmatprep.subr.bf16.mxu0 %v350_v18 }
  0x23   :  { %239 = vmatpush2.bf16.msra.mxu0 %v352_v19 }
  0x24   :  { %240 = vmatprep.subr.bf16.mxu0 %v353_v20 }
  0x27   :  { %241 = vmatpush2.bf16.msra.mxu0 %v355_v21 }
  0x28   :  { %242 = vmatprep.subr.bf16.mxu0 %v356_v22 }
  0x2b   :  { %243 = vmatpush2.bf16.msra.mxu0 %v358_v23 }
  0x2c   :  { %244 = vmatprep.subr.bf16.mxu0 %v359_v24 }
  0x2f   :  { %245 = vmatpush2.bf16.msra.mxu0 %v361_v25 }
  0x30   :  { %246 = vmatprep.subr.bf16.mxu0 %v362_v26 }
  0x33   :  { %247 = vmatpush2.bf16.msra.mxu0 %v364_v27 }
  0x34   :  { %248 = vmatprep.subr.bf16.mxu0 %v365_v28 }
  0x37   :  { %249 = vmatpush2.bf16.msra.mxu0 %v367_v29 }
  0x38   :  { %250 = vmatprep.subr.bf16.mxu0 %v368_v30 }
  0x3b   :  { %251 = vmatpush2.bf16.msra.mxu0 %v370_v31 }
  0x3c   :  { %252 = vmatprep.subr.bf16.mxu0 %v371_v32 }
  0x3f   :  { %253 = vmatpush2.bf16.msra.mxu0 %v373_v33 }
  0x42   :  { %255 = vmatmul.mubr.bf16.vlgmr.msra.gmra.mxu0 %v292_v34 }
 0x102   :  { %v256_v42 = vpop.f32.mrf.mxu0 }
 0x103   :  { %v284_v43 = vadd.f32 %v277_v40, %v256_v42 }
 0x104   :  { %v258_v44 = vpop.f32.mrf.mxu0 }
 0x105   :  { %286 = vst [vmem:[%s507_s3] sm:$0xff] %v284_v43  ;;  %v285_v45 = vadd.f32 %v281_v41, %v258_v44 }
 0x106   :  { %v260_v46 = vpop.f32.mrf.mxu0 }
 0x107   :  { %287 = vst [vmem:[%s507_s3 + $0x8] sm:$0xff] %v285_v45 }
 0x108   :  { %v261_v47 = vpop.f32.mrf.mxu0 }

// kernel: mdm_simetric_forward.15
= control target key start
LH: loop header
LB: loop body
LE: loop exit
PB: predicated region body
PF: predicated region fallthrough
CT: control target
= control target key end

     0   :  { %v274_v35 = vlaneseq  ;;  %s528_s1 = inlined_call_operand.vmem [shape: bf16[256,256], index: 1, kind: input, shape index: {}]   ;;  %s529_s0 = inlined_call_operand.vmem [shape: bf16[8,256], index: 0, kind: input, shape index: {}]   ;;  %s530_s2 = inlined_call_operand.vmem [shape: f32[1,256], index: 2, kind: input, shape index: {}]   ;;  %s531_s3 = inlined_call_operand.vmem [shape: f32[8,256], index: 3, kind: output, shape index: {}]  }
   0x1   :  { %v342_v0 = vld [vmem:[%s528_s1 + $0x74] ss:$8 sps:$4 sm:$0xff]   ;;  %v344_v1 = vld [vmem:[%s528_s1 + $0x70] ss:$8 sps:$4 sm:$0xff]   ;;  %v345_v2 = vld [vmem:[%s528_s1 + $0x64] ss:$8 sps:$4 sm:$0xff]  }
   0x2   :  { %222 = vmatprep.subr.bf16.mxu0 %v342_v0  ;;  %v347_v3 = vld [vmem:[%s528_s1 + $0x60] ss:$8 sps:$4 sm:$0xff]   ;;  %v348_v4 = vld [vmem:[%s528_s1 + $0x54] ss:$8 sps:$4 sm:$0xff]   ;;  %v350_v5 = vld [vmem:[%s528_s1 + $0x50] ss:$8 sps:$4 sm:$0xff]  }
   0x3   :  { %223 = vmatpush1.bf16.msra.mxu0 %v344_v1  ;;  %v351_v6 = vld [vmem:[%s528_s1 + $0x44] ss:$8 sps:$4 sm:$0xff]   ;;  %v353_v7 = vld [vmem:[%s528_s1 + $0x40] ss:$8 sps:$4 sm:$0xff]   ;;  %v354_v8 = vld [vmem:[%s528_s1 + $0x34] ss:$8 sps:$4 sm:$0xff]  }
   0x4   :  { %224 = vmatprep.subr.bf16.mxu0 %v345_v2  ;;  %v356_v9 = vld [vmem:[%s528_s1 + $0x30] ss:$8 sps:$4 sm:$0xff]   ;;  %v357_v10 = vld [vmem:[%s528_s1 + $0x24] ss:$8 sps:$4 sm:$0xff]   ;;  %v359_v11 = vld [vmem:[%s528_s1 + $0x20] ss:$8 sps:$4 sm:$0xff]  }
   0x5   :  { %v360_v12 = vld [vmem:[%s528_s1 + $0x14] ss:$8 sps:$4 sm:$0xff]   ;;  %v22_v13 = vld [vmem:[%s529_s0] sm:$0xff]  ;;  %v362_v15 = vld [vmem:[%s528_s1 + $0x10] ss:$8 sps:$4 sm:$0xff]   ;;  %v275_v36 = vshrl.u32 %v274_v35, 7 }
   0x6   :  { %v307_v14 = vcombine.high %v22_v13, %v22_v13  ;;  %v363_v16 = vld [vmem:[%s528_s1 + $0x4] ss:$8 sps:$4 sm:$0xff]   ;;  %v365_v17 = vld [vmem:[%s528_s1] ss:$8 sps:$4 sm:$0xff]   ;;  %v366_v18 = vld [vmem:[%s528_s1 + $0xf4] ss:$8 sps:$4 sm:$0xff]   ;;  %v306_v34 = vcombine.low %v22_v13, %v22_v13 }
   0x7   :  { %225 = vmatpush1.bf16.msra.mxu0 %v347_v3  ;;  %v368_v19 = vld [vmem:[%s528_s1 + $0xf0] ss:$8 sps:$4 sm:$0xff]   ;;  %v369_v20 = vld [vmem:[%s528_s1 + $0xe4] ss:$8 sps:$4 sm:$0xff]   ;;  %v371_v21 = vld [vmem:[%s528_s1 + $0xe0] ss:$8 sps:$4 sm:$0xff]  }
   0x8   :  { %226 = vmatprep.subr.bf16.mxu0 %v348_v4  ;;  %254 = vmatprep.mubr.bf16.mxu0 %v307_v14  ;;  %v372_v22 = vld [vmem:[%s528_s1 + $0xd4] ss:$8 sps:$4 sm:$0xff]   ;;  %v374_v23 = vld [vmem:[%s528_s1 + $0xd0] ss:$8 sps:$4 sm:$0xff]   ;;  %v375_v24 = vld [vmem:[%s528_s1 + $0xc4] ss:$8 sps:$4 sm:$0xff]  }
   0x9   :  { %v377_v25 = vld [vmem:[%s528_s1 + $0xc0] ss:$8 sps:$4 sm:$0xff]   ;;  %v378_v26 = vld [vmem:[%s528_s1 + $0xb4] ss:$8 sps:$4 sm:$0xff]   ;;  %v380_v27 = vld [vmem:[%s528_s1 + $0xb0] ss:$8 sps:$4 sm:$0xff]  }
   0xa   :  { %v381_v28 = vld [vmem:[%s528_s1 + $0xa4] ss:$8 sps:$4 sm:$0xff]   ;;  %v383_v29 = vld [vmem:[%s528_s1 + $0xa0] ss:$8 sps:$4 sm:$0xff]   ;;  %v384_v30 = vld [vmem:[%s528_s1 + $0x94] ss:$8 sps:$4 sm:$0xff]  }
   0xb   :  { %227 = vmatpush1.bf16.msra.mxu0 %v350_v5  ;;  %v386_v31 = vld [vmem:[%s528_s1 + $0x90] ss:$8 sps:$4 sm:$0xff]   ;;  %v387_v32 = vld [vmem:[%s528_s1 + $0x84] ss:$8 sps:$4 sm:$0xff]   ;;  %v389_v33 = vld [vmem:[%s528_s1 + $0x80] ss:$8 sps:$4 sm:$0xff]  }
   0xc   :  { %228 = vmatprep.subr.bf16.mxu0 %v351_v6  ;;  %v276_v37 = vsub.s32 0, %v275_v36  ;;  %v272_v38 = vld [vmem:[%s530_s2] sm:$0x3]  ;;  %v280_v39 = vsub.s32 1, %v275_v36 }
   0xe   :  { %v277_v40 = vrot.slane %v272_v38, %v276_v37  ;;  %v281_v41 = vrot.slane %v272_v38, %v280_v39 }
   0xf   :  { %229 = vmatpush1.bf16.msra.mxu0 %v353_v7 }
  0x10   :  { %230 = vmatprep.subr.bf16.mxu0 %v354_v8 }
  0x13   :  { %231 = vmatpush1.bf16.msra.mxu0 %v356_v9 }
  0x14   :  { %232 = vmatprep.subr.bf16.mxu0 %v357_v10 }
  0x17   :  { %233 = vmatpush1.bf16.msra.mxu0 %v359_v11 }
  0x18   :  { %234 = vmatprep.subr.bf16.mxu0 %v360_v12 }
  0x1b   :  { %235 = vmatpush1.bf16.msra.mxu0 %v362_v15 }
  0x1c   :  { %236 = vmatprep.subr.bf16.mxu0 %v363_v16 }
  0x1f   :  { %237 = vmatpush1.bf16.msra.mxu0 %v365_v17 }
  0x20   :  { %238 = vmatprep.subr.bf16.mxu0 %v366_v18 }
  0x23   :  { %239 = vmatpush2.bf16.msra.mxu0 %v368_v19 }
  0x24   :  { %240 = vmatprep.subr.bf16.mxu0 %v369_v20 }
  0x27   :  { %241 = vmatpush2.bf16.msra.mxu0 %v371_v21 }
  0x28   :  { %242 = vmatprep.subr.bf16.mxu0 %v372_v22 }
  0x2b   :  { %243 = vmatpush2.bf16.msra.mxu0 %v374_v23 }
  0x2c   :  { %244 = vmatprep.subr.bf16.mxu0 %v375_v24 }
  0x2f   :  { %245 = vmatpush2.bf16.msra.mxu0 %v377_v25 }
  0x30   :  { %246 = vmatprep.subr.bf16.mxu0 %v378_v26 }
  0x33   :  { %247 = vmatpush2.bf16.msra.mxu0 %v380_v27 }
  0x34   :  { %248 = vmatprep.subr.bf16.mxu0 %v381_v28 }
  0x37   :  { %249 = vmatpush2.bf16.msra.mxu0 %v383_v29 }
  0x38   :  { %250 = vmatprep.subr.bf16.mxu0 %v384_v30 }
  0x3b   :  { %251 = vmatpush2.bf16.msra.mxu0 %v386_v31 }
  0x3c   :  { %252 = vmatprep.subr.bf16.mxu0 %v387_v32 }
  0x3f   :  { %253 = vmatpush2.bf16.msra.mxu0 %v389_v33 }
  0x42   :  { %255 = vmatmul.mubr.bf16.vlgmr.msra.gmra.mxu0 %v306_v34 }
 0x102   :  { %v256_v42 = vpop.f32.mrf.mxu0 }
 0x103   :  { %v284_v43 = vadd.f32 %v277_v40, %v256_v42 }
 0x104   :  { %v258_v44 = vpop.f32.mrf.mxu0 }
 0x105   :  { %v340_v45 = vmul.f32 -1.442695, %v284_v43  ;;  %v285_v46 = vadd.f32 %v281_v41, %v258_v44 }
 0x106   :  { %v260_v47 = vpop.f32.mrf.mxu0 }
 0x107   :  { %392 = vpow2.f32 %v340_v45  ;;  %v341_v48 = vmul.f32 -1.442695, %v285_v46 }
 0x108   :  { %v261_v49 = vpop.f32.mrf.mxu0 }
 0x109   :  { %394 = vpow2.f32 %v341_v48 }
 0x114   :  { %v393_v50 = vpop.eup %392 }
 0x115   :  { %v292_v51 = vadd.f32 1.0, %v393_v50 }
 0x116   :  { %v395_v52 = vpop.eup %394 }
 0x117   :  { %396 = vrcp.f32 %v292_v51  ;;  %v293_v53 = vadd.f32 1.0, %v395_v52 }
 0x119   :  { %398 = vrcp.f32 %v293_v53 }
 0x124   :  { %v397_v54 = vpop.eup %396 }
 0x125   :  { %v298_v55 = vmul.f32 %v397_v54, %v284_v43 }
 0x126   :  { %v399_v56 = vpop.eup %398 }
 0x127   :  { %300 = vst [vmem:[%s531_s3] sm:$0xff] %v298_v55  ;;  %v299_v57 = vmul.f32 %v399_v56, %v285_v46 }
 0x129   :  { %301 = vst [vmem:[%s531_s3 + $0x8] sm:$0xff] %v299_v57 }

// kernel: mdm_simetric_forward.19
= control target key start
LH: loop header
LB: loop body
LE: loop exit
PB: predicated region body
PF: predicated region fallthrough
CT: control target
= control target key end

     0   :  { %s1236_s12 = smov 0   ;;  %s1238_s13 = smov 0   ;;  %s1433_s0 = inlined_call_operand.vmem [shape: bf16[40,256], index: 0, kind: input, shape index: {}]   ;;  %s1434_s1 = inlined_call_operand.vmem [shape: bf16[256,768], index: 1, kind: input, shape index: {}]   ;;  %s1435_s2 = inlined_call_operand.vmem [shape: f32[1,768], index: 2, kind: input, shape index: {}]   ;;  %s1436_s3 = inlined_call_operand.vmem [shape: bf16[40,768], index: 3, kind: output, shape index: {}]  }
   0x1   :  { %s1240_s14 = smov 0   ;;  %s1242_s15 = smov 0  }
   0x2   :  { %s1244_s16 = smov 0  }
   0x3 LB: > { %s28_s17 = sadd.s32 1, %s1210_s15  ;;  %s982_s18 = sadd.s32 4294967295, %s1214_s16   ;;  %s1214_s16 = sphi %s1244_s16, %s13_s16   ;;  %s1210_s15 = sphi %s1242_s15, %s1441_s15   ;;  %s1206_s14 = sphi %s1240_s14, %s1440_s14   ;;  %s1202_s13 = sphi %s1238_s13, %s1439_s13   ;;  %s1198_s12 = sphi %s1236_s12, %s1438_s12  }
   0x4   : > { %p30_p0 = scmp.ge.s32.totalorder %s28_s17, 3  ;;  %p76_p1 = scmp.ne.s32.totalorder %s1202_s13, %s1198_s12 }
   0x5   : > { %p77_p2 = scmp.eq.s32.totalorder %s1214_s16, 0  ;;  %p134_p4 = scmp.eq.s32.totalorder %s982_s18, 2 }
   0x6   : > { %s1443_s17 = smov (%p30_p0, %s28_s17), 0  ;;  %s69_s20 = sadd.s32 1, %s1202_s13 }
   0x7   : > { %p78_p3 = por %p77_p2, %p76_p1  ;;  %s65_s19 = ssub.s32 %s1210_s15, %s1443_s17 }
   0x8   : > { %p67_p5 = scmp.eq.s32.totalorder %s65_s19, 0  ;;  %p1271_p6 = por %p134_p4, %p76_p1 }
   0x9   : > { %p986_p7 = scmp.ge.s32.totalorder %s1214_s16, 3 }
   0xa   : > { %s1276_s22 = scalar_select %p67_p5, %s1202_s13, %s69_s20  }
   0xb   : > { %171 = sbr.rel (%p986_p7) target bundleno = 36 (0x24), region = 20 }
  0x10   : > { %174 = sbr.rel (!%p78_p3) target bundleno = 36 (0x24), region = 24  ;;  %s176_s23 = sand.u32 (%p78_p3), 1, %s1202_s13  }
  0x11   : > { %s1040_s24 = sshll.u32 (%p78_p3), %s1210_s15, 3  ;;  %s987_s25 = sshll.u32 (%p78_p3), %s176_s23, 8 }
  0x12   : > { %s1284_s28 = scalar_lea.vmem (%p78_p3), %s1434_s1, %s1040_s24  ;;  %s1289_s29 = scalar_lea.vmem (%p78_p3), [#allocation3], %s987_s25 }
  0x13   : > { %v275_v0 = vld [vmem:[%s1284_s28] sm:$0xff] (%p78_p3)  ;;  %v277_v1 = vld [vmem:[%s1284_s28 + $0x18] sm:$0xff] (%p78_p3)  ;;  %v279_v2 = vld [vmem:[%s1284_s28 + $0x30] sm:$0xff] (%p78_p3) }
  0x14   : > { %276 = vst [vmem:[%s1289_s29] sm:$0xff] (%p78_p3), %v275_v0  ;;  %278 = vst [vmem:[%s1289_s29 + $0x8] sm:$0xff] (%p78_p3), %v277_v1  ;;  %v281_v3 = vld [vmem:[%s1284_s28 + $0x48] sm:$0xff] (%p78_p3)  ;;  %v283_v4 = vld [vmem:[%s1284_s28 + $0x60] sm:$0xff] (%p78_p3) }
  0x15   : > { %280 = vst [vmem:[%s1289_s29 + $0x10] sm:$0xff] %v279_v2  ;;  %v285_v5 = vld [vmem:[%s1284_s28 + $0x78] sm:$0xff]  ;;  %282 = vst [vmem:[%s1289_s29 + $0x18] sm:$0xff] %v281_v3  ;;  %v287_v6 = vld [vmem:[%s1284_s28 + $0x90] sm:$0xff] }
  0x16   : > { %284 = vst [vmem:[%s1289_s29 + $0x20] sm:$0xff] %v283_v4  ;;  %286 = vst [vmem:[%s1289_s29 + $0x28] sm:$0xff] %v285_v5  ;;  %v289_v7 = vld [vmem:[%s1284_s28 + $0xa8] sm:$0xff]  ;;  %v291_v8 = vld [vmem:[%s1284_s28 + $0xc0] sm:$0xff] }
  0x17   : > { %288 = vst [vmem:[%s1289_s29 + $0x30] sm:$0xff] %v287_v6  ;;  %290 = vst [vmem:[%s1289_s29 + $0x38] sm:$0xff] %v289_v7  ;;  %v293_v9 = vld [vmem:[%s1284_s28 + $0xd8] sm:$0xff]  ;;  %v295_v10 = vld [vmem:[%s1284_s28 + $0xf0] sm:$0xff] }
  0x18   : > { %292 = vst [vmem:[%s1289_s29 + $0x40] sm:$0xff] %v291_v8  ;;  %v297_v11 = vld [vmem:[%s1284_s28 + $0x108] sm:$0xff]  ;;  %294 = vst [vmem:[%s1289_s29 + $0x48] sm:$0xff] %v293_v9  ;;  %v299_v12 = vld [vmem:[%s1284_s28 + $0x120] sm:$0xff] }
  0x19   : > { %296 = vst [vmem:[%s1289_s29 + $0x50] sm:$0xff] %v295_v10  ;;  %298 = vst [vmem:[%s1289_s29 + $0x58] sm:$0xff] %v297_v11  ;;  %v301_v13 = vld [vmem:[%s1284_s28 + $0x138] sm:$0xff]  ;;  %v303_v14 = vld [vmem:[%s1284_s28 + $0x150] sm:$0xff] }
  0x1a   : > { %300 = vst [vmem:[%s1289_s29 + $0x60] sm:$0xff] %v299_v12  ;;  %302 = vst [vmem:[%s1289_s29 + $0x68] sm:$0xff] %v301_v13  ;;  %v305_v15 = vld [vmem:[%s1284_s28 + $0x168] sm:$0xff]  ;;  %v307_v16 = vld [vmem:[%s1284_s28 + $0x180] sm:$0xff] }
  0x1b   : > { %304 = vst [vmem:[%s1289_s29 + $0x70] sm:$0xff] %v303_v14  ;;  %v309_v17 = vld [vmem:[%s1284_s28 + $0x198] sm:$0xff]  ;;  %306 = vst [vmem:[%s1289_s29 + $0x78] sm:$0xff] %v305_v15  ;;  %v311_v18 = vld [vmem:[%s1284_s28 + $0x1b0] sm:$0xff] }
  0x1c   : > { %308 = vst [vmem:[%s1289_s29 + $0x80] sm:$0xff] %v307_v16  ;;  %310 = vst [vmem:[%s1289_s29 + $0x88] sm:$0xff] %v309_v17  ;;  %v313_v19 = vld [vmem:[%s1284_s28 + $0x1c8] sm:$0xff]  ;;  %v315_v20 = vld [vmem:[%s1284_s28 + $0x1e0] sm:$0xff] }
  0x1d   : > { %312 = vst [vmem:[%s1289_s29 + $0x90] sm:$0xff] %v311_v18  ;;  %314 = vst [vmem:[%s1289_s29 + $0x98] sm:$0xff] %v313_v19  ;;  %v317_v21 = vld [vmem:[%s1284_s28 + $0x1f8] sm:$0xff]  ;;  %v319_v22 = vld [vmem:[%s1284_s28 + $0x210] sm:$0xff] }
  0x1e   : > { %316 = vst [vmem:[%s1289_s29 + $0xa0] sm:$0xff] %v315_v20  ;;  %v321_v23 = vld [vmem:[%s1284_s28 + $0x228] sm:$0xff]  ;;  %318 = vst [vmem:[%s1289_s29 + $0xa8] sm:$0xff] %v317_v21  ;;  %v323_v24 = vld [vmem:[%s1284_s28 + $0x240] sm:$0xff] }
  0x1f   : > { %320 = vst [vmem:[%s1289_s29 + $0xb0] sm:$0xff] %v319_v22  ;;  %322 = vst [vmem:[%s1289_s29 + $0xb8] sm:$0xff] %v321_v23  ;;  %v325_v25 = vld [vmem:[%s1284_s28 + $0x258] sm:$0xff]  ;;  %v327_v26 = vld [vmem:[%s1284_s28 + $0x270] sm:$0xff] }
  0x20   : > { %324 = vst [vmem:[%s1289_s29 + $0xc0] sm:$0xff] %v323_v24  ;;  %326 = vst [vmem:[%s1289_s29 + $0xc8] sm:$0xff] %v325_v25  ;;  %v329_v27 = vld [vmem:[%s1284_s28 + $0x288] sm:$0xff]  ;;  %v331_v28 = vld [vmem:[%s1284_s28 + $0x2a0] sm:$0xff] }
  0x21   : > { %328 = vst [vmem:[%s1289_s29 + $0xd0] sm:$0xff] %v327_v26  ;;  %v333_v29 = vld [vmem:[%s1284_s28 + $0x2b8] sm:$0xff]  ;;  %330 = vst [vmem:[%s1289_s29 + $0xd8] sm:$0xff] %v329_v27  ;;  %v335_v30 = vld [vmem:[%s1284_s28 + $0x2d0] sm:$0xff] }
  0x22   : > { %332 = vst [vmem:[%s1289_s29 + $0xe0] sm:$0xff] %v331_v28  ;;  %334 = vst [vmem:[%s1289_s29 + $0xe8] sm:$0xff] %v333_v29  ;;  %v337_v31 = vld [vmem:[%s1284_s28 + $0x2e8] sm:$0xff] }
  0x23   : > { %336 = vst [vmem:[%s1289_s29 + $0xf0] sm:$0xff] %v335_v30  ;;  %338 = vst [vmem:[%s1289_s29 + $0xf8] sm:$0xff] %v337_v31 }
  0x24 PF: > { %p990_p8 = scmp.ge.s32.totalorder %s1214_s16, 1  ;;  %p351_p9 = scmp.lt.s32.totalorder %s1214_s16, 4 }
  0x26   : > { %p352_p10 = pnand %p990_p8, %p351_p9 }
  0x27   : > { %s358_s30 = sand.u32 (!%p352_p10), 1, %s1198_s12   ;;  %s992_s24 = sshll.u32 (!%p352_p10), %s1206_s14, 1 }
  0x28   : > { %355 = sbr.rel (%p352_p10) target bundleno = 327 (0x147), region = 66  ;;  %s991_s4 = sshll.u32 (!%p352_p10), %s358_s30, 8 }
  0x29   : > { %s1363_s9 = scalar_lea.vmem (!%p352_p10), [#allocation3], %s991_s4  ;;  %p409_p11 = scmp.lt.s32.totalorder (!%p352_p10), %s992_s24, 5 }
  0x2a   : > { %s1079_s28 = smul.u32 (!%p352_p10), 40, %s358_s30 }
  0x2c   : > { %s393_s29 = scalar_lea.vmem (!%p352_p10), [#allocation4], %s1079_s28 }
  0x2d   : > { %v1170_v32 = vld [vmem:[%s1433_s0 + $0x4] ss:$8 sps:$4 sm:$0xff]   ;;  %v1173_v33 = vld [vmem:[%s1433_s0 + $0x14] ss:$8 sps:$4 sm:$0xff]   ;;  %v1122_v35 = vld [vmem:[%s1363_s9 + $0x70] ss:$8 sps:$4 sm:$0xff]   ;;  %v759_v7 = vlaneseq }
  0x2e   : > { %v1120_v34 = vld [vmem:[%s1363_s9 + $0x74] ss:$8 sps:$4 sm:$0xff]   ;;  %695 = vmatprep.mubr.bf16.mxu0 %v1170_v32  ;;  %705 = vmatprep.mubr.bf16.mxu1 %v1173_v33  ;;  %v1123_v36 = vld [vmem:[%s1363_s9 + $0x64] ss:$8 sps:$4 sm:$0xff]   ;;  %v1125_v37 = vld [vmem:[%s1363_s9 + $0x60] ss:$8 sps:$4 sm:$0xff]  }
  0x2f   : > { %663 = vmatprep.subr.bf16.mxu0 %v1120_v34  ;;  %1047 = vmatprep.subr.bf16.mxu1 %v1120_v34  ;;  %v1126_v38 = vld [vmem:[%s1363_s9 + $0x54] ss:$8 sps:$4 sm:$0xff]   ;;  %v1128_v39 = vld [vmem:[%s1363_s9 + $0x50] ss:$8 sps:$4 sm:$0xff]   ;;  %v1129_v40 = vld [vmem:[%s1363_s9 + $0x44] ss:$8 sps:$4 sm:$0xff]  }
  0x30   : > { %664 = vmatpush1.bf16.msra.mxu0 %v1122_v35  ;;  %1063 = vmatpush1.bf16.msra.mxu1 %v1122_v35  ;;  %v1131_v41 = vld [vmem:[%s1363_s9 + $0x40] ss:$8 sps:$4 sm:$0xff]   ;;  %v1132_v42 = vld [vmem:[%s1363_s9 + $0x34] ss:$8 sps:$4 sm:$0xff]   ;;  %v1134_v43 = vld [vmem:[%s1363_s9 + $0x30] ss:$8 sps:$4 sm:$0xff]  }
  0x31   : > { %665 = vmatprep.subr.bf16.mxu0 %v1123_v36  ;;  %1048 = vmatprep.subr.bf16.mxu1 %v1123_v36  ;;  %v1135_v44 = vld [vmem:[%s1363_s9 + $0x24] ss:$8 sps:$4 sm:$0xff]   ;;  %v1137_v45 = vld [vmem:[%s1363_s9 + $0x20] ss:$8 sps:$4 sm:$0xff]   ;;  %v1138_v46 = vld [vmem:[%s1363_s9 + $0x14] ss:$8 sps:$4 sm:$0xff]  }
  0x32   : > { %v1140_v47 = vld [vmem:[%s1363_s9 + $0x10] ss:$8 sps:$4 sm:$0xff]   ;;  %v1141_v48 = vld [vmem:[%s1363_s9 + $0x4] ss:$8 sps:$4 sm:$0xff]   ;;  %v1143_v49 = vld [vmem:[%s1363_s9] ss:$8 sps:$4 sm:$0xff]  }
  0x33   : > { %v1144_v50 = vld [vmem:[%s1363_s9 + $0xf4] ss:$8 sps:$4 sm:$0xff]   ;;  %v1146_v51 = vld [vmem:[%s1363_s9 + $0xf0] ss:$8 sps:$4 sm:$0xff]   ;;  %v1147_v52 = vld [vmem:[%s1363_s9 + $0xe4] ss:$8 sps:$4 sm:$0xff]  }
  0x34   : > { %666 = vmatpush1.bf16.msra.mxu0 %v1125_v37  ;;  %1064 = vmatpush1.bf16.msra.mxu1 %v1125_v37  ;;  %v1149_v53 = vld [vmem:[%s1363_s9 + $0xe0] ss:$8 sps:$4 sm:$0xff]   ;;  %v1150_v54 = vld [vmem:[%s1363_s9 + $0xd4] ss:$8 sps:$4 sm:$0xff]   ;;  %v1152_v55 = vld [vmem:[%s1363_s9 + $0xd0] ss:$8 sps:$4 sm:$0xff]  }
  0x35   : > { %667 = vmatprep.subr.bf16.mxu0 %v1126_v38  ;;  %1049 = vmatprep.subr.bf16.mxu1 %v1126_v38  ;;  %v1153_v56 = vld [vmem:[%s1363_s9 + $0xc4] ss:$8 sps:$4 sm:$0xff]   ;;  %v1155_v57 = vld [vmem:[%s1363_s9 + $0xc0] ss:$8 sps:$4 sm:$0xff]   ;;  %v1156_v58 = vld [vmem:[%s1363_s9 + $0xb4] ss:$8 sps:$4 sm:$0xff]  }
  0x36   : > { %v1158_v59 = vld [vmem:[%s1363_s9 + $0xb0] ss:$8 sps:$4 sm:$0xff]   ;;  %v1159_v60 = vld [vmem:[%s1363_s9 + $0xa4] ss:$8 sps:$4 sm:$0xff]   ;;  %v1161_v61 = vld [vmem:[%s1363_s9 + $0xa0] ss:$8 sps:$4 sm:$0xff]  }
  0x37   : > { %v1162_v62 = vld [vmem:[%s1363_s9 + $0x94] ss:$8 sps:$4 sm:$0xff]   ;;  %v1164_v63 = vld [vmem:[%s1363_s9 + $0x90] ss:$8 sps:$4 sm:$0xff]   ;;  %v1165_v0 = vld [vmem:[%s1363_s9 + $0x84] ss:$8 sps:$4 sm:$0xff]  }
  0x38   : > { %668 = vmatpush1.bf16.msra.mxu0 %v1128_v39  ;;  %1065 = vmatpush1.bf16.msra.mxu1 %v1128_v39  ;;  %v1167_v1 = vld [vmem:[%s1363_s9 + $0x80] ss:$8 sps:$4 sm:$0xff]   ;;  %v1171_v4 = vld [vmem:[%s1433_s0 + $0x10] ss:$8 sps:$4 sm:$0xff]   ;;  %s1445_s24 = smov (!%p409_p11, %s992_s24), 5  ;;  %v760_v8 = vshrl.u32 %v759_v7, 7 }
  0x39   : > { %669 = vmatprep.subr.bf16.mxu0 %v1129_v40  ;;  %1050 = vmatprep.subr.bf16.mxu1 %v1129_v40  ;;  %v443_v2 = vld [vmem:[%s1433_s0 + $0x20] sm:$0xff]  ;;  %s411_s27 = scalar_lea.vmem %s1435_s2, %s1445_s24  ;;  %s1046_s12 = sshll.u32 (%p1271_p6), %s1206_s14, 3 }
  0x3a   : > { %v1168_v3 = vld [vmem:[%s1433_s0] ss:$8 sps:$4 sm:$0xff]   ;;  %v998_v5 = vcombine.high %v443_v2, %v443_v2  ;;  %v997_v6 = vcombine.low %v443_v2, %v443_v2  ;;  %v761_v9 = vsub.s32 0, %v760_v8  ;;  %v765_v10 = vsub.s32 1, %v760_v8  ;;  %s828_s5 = scalar_lea.vmem (%p1271_p6), %s1436_s3, %s1046_s12 }
  0x3b   : > { %v757_v11 = vld [vmem:[%s411_s27] sm:$0x3] }
  0x3c   : > { %670 = vmatpush1.bf16.msra.mxu0 %v1131_v41  ;;  %1066 = vmatpush1.bf16.msra.mxu1 %v1131_v41  ;;  %v762_v12 = vrot.slane %v757_v11, %v761_v9  ;;  %v766_v13 = vrot.slane %v757_v11, %v765_v10 }
  0x3d   : > { %671 = vmatprep.subr.bf16.mxu0 %v1132_v42  ;;  %1051 = vmatprep.subr.bf16.mxu1 %v1132_v42 }
  0x40   : > { %672 = vmatpush1.bf16.msra.mxu0 %v1134_v43  ;;  %1067 = vmatpush1.bf16.msra.mxu1 %v1134_v43 }
  0x41   : > { %673 = vmatprep.subr.bf16.mxu0 %v1135_v44  ;;  %1052 = vmatprep.subr.bf16.mxu1 %v1135_v44 }
  0x44   : > { %674 = vmatpush1.bf16.msra.mxu0 %v1137_v45  ;;  %1068 = vmatpush1.bf16.msra.mxu1 %v1137_v45 }
  0x45   : > { %675 = vmatprep.subr.bf16.mxu0 %v1138_v46  ;;  %1053 = vmatprep.subr.bf16.mxu1 %v1138_v46 }
  0x48   : > { %676 = vmatpush1.bf16.msra.mxu0 %v1140_v47  ;;  %1069 = vmatpush1.bf16.msra.mxu1 %v1140_v47 }
  0x49   : > { %677 = vmatprep.subr.bf16.mxu0 %v1141_v48  ;;  %1054 = vmatprep.subr.bf16.mxu1 %v1141_v48 }
  0x4c   : > { %678 = vmatpush1.bf16.msra.mxu0 %v1143_v49  ;;  %1070 = vmatpush1.bf16.msra.mxu1 %v1143_v49 }
  0x4d   : > { %679 = vmatprep.subr.bf16.mxu0 %v1144_v50  ;;  %1055 = vmatprep.subr.bf16.mxu1 %v1144_v50 }
  0x50   : > { %680 = vmatpush2.bf16.msra.mxu0 %v1146_v51  ;;  %1071 = vmatpush2.bf16.msra.mxu1 %v1146_v51 }
  0x51   : > { %681 = vmatprep.subr.bf16.mxu0 %v1147_v52  ;;  %1056 = vmatprep.subr.bf16.mxu1 %v1147_v52 }
  0x54   : > { %682 = vmatpush2.bf16.msra.mxu0 %v1149_v53  ;;  %1072 = vmatpush2.bf16.msra.mxu1 %v1149_v53 }
  0x55   : > { %683 = vmatprep.subr.bf16.mxu0 %v1150_v54  ;;  %1057 = vmatprep.subr.bf16.mxu1 %v1150_v54 }
  0x58   : > { %684 = vmatpush2.bf16.msra.mxu0 %v1152_v55  ;;  %1073 = vmatpush2.bf16.msra.mxu1 %v1152_v55 }
  0x59   : > { %685 = vmatprep.subr.bf16.mxu0 %v1153_v56  ;;  %1058 = vmatprep.subr.bf16.mxu1 %v1153_v56 }
  0x5c   : > { %686 = vmatpush2.bf16.msra.mxu0 %v1155_v57  ;;  %1074 = vmatpush2.bf16.msra.mxu1 %v1155_v57 }
  0x5d   : > { %687 = vmatprep.subr.bf16.mxu0 %v1156_v58  ;;  %1059 = vmatprep.subr.bf16.mxu1 %v1156_v58 }
  0x60   : > { %688 = vmatpush2.bf16.msra.mxu0 %v1158_v59  ;;  %1075 = vmatpush2.bf16.msra.mxu1 %v1158_v59 }
  0x61   : > { %689 = vmatprep.subr.bf16.mxu0 %v1159_v60  ;;  %1060 = vmatprep.subr.bf16.mxu1 %v1159_v60 }
  0x64   : > { %690 = vmatpush2.bf16.msra.mxu0 %v1161_v61  ;;  %1076 = vmatpush2.bf16.msra.mxu1 %v1161_v61 }
  0x65   : > { %691 = vmatprep.subr.bf16.mxu0 %v1162_v62  ;;  %1061 = vmatprep.subr.bf16.mxu1 %v1162_v62 }
  0x68   : > { %692 = vmatpush2.bf16.msra.mxu0 %v1164_v63  ;;  %1077 = vmatpush2.bf16.msra.mxu1 %v1164_v63 }
  0x69   : > { %693 = vmatprep.subr.bf16.mxu0 %v1165_v0  ;;  %1062 = vmatprep.subr.bf16.mxu1 %v1165_v0 }
  0x6c   : > { %694 = vmatpush2.bf16.msra.mxu0 %v1167_v1  ;;  %1078 = vmatpush2.bf16.msra.mxu1 %v1167_v1 }
  0x6f   : > { %696 = vmatmul.mubr.bf16.vlgmr.msra.gmra.mxu0 %v1168_v3  ;;  %706 = vmatmul.mubr.bf16.vlgmr.msra.gmra.mxu1 %v1171_v4 }
  0x70   : > { %715 = vmatprep.mubr.bf16.mxu1 %v998_v5 }
  0x77   : > { %716 = vmatmul.mubr.bf16.gmra.mxu1 %v997_v6 }
 0x12f   : > { %v697_v14 = vpop.f32.mrf.mxu0  ;;  %v707_v15 = vpop.f32.mrf.mxu1 }
 0x130   : > { %v769_v16 = vadd.f32 %v762_v12, %v697_v14  ;;  %v773_v19 = vadd.f32 %v762_v12, %v707_v15 }
 0x131   : > { %v699_v17 = vpop.f32.mrf.mxu0  ;;  %v709_v18 = vpop.f32.mrf.mxu1 }
 0x132   : > { %v770_v20 = vadd.f32 %v766_v13, %v699_v17  ;;  %v774_v21 = vadd.f32 %v766_v13, %v709_v18 }
 0x133   : > { %v701_v22 = vpop.f32.mrf.mxu0  ;;  %v711_v23 = vpop.f32.mrf.mxu1 }
 0x134   : > { %v1041_v24 = vpack.c.bf16 %v770_v20, %v769_v16  ;;  %v1043_v25 = vpack.c.bf16 %v774_v21, %v773_v19  ;;  %v771_v28 = vadd.f32 %v762_v12, %v701_v22  ;;  %v775_v29 = vadd.f32 %v762_v12, %v711_v23 }
 0x135   : > { %v703_v26 = vpop.f32.mrf.mxu0  ;;  %v713_v27 = vpop.f32.mrf.mxu1 }
 0x136   : > { %811 = vst [vmem:[%s393_s29] sm:$0xff] %v1041_v24  ;;  %813 = vst [vmem:[%s393_s29 + $0x10] sm:$0xff] %v1043_v25  ;;  %v772_v30 = vadd.f32 %v766_v13, %v703_v26  ;;  %v776_v31 = vadd.f32 %v766_v13, %v713_v27 }
 0x137   : > { %v717_v32 = vpop.f32.mrf.mxu1 }
 0x138   : > { %v1042_v33 = vpack.c.bf16 %v772_v30, %v771_v28  ;;  %v1044_v34 = vpack.c.bf16 %v776_v31, %v775_v29  ;;  %v777_v36 = vadd.f32 %v762_v12, %v717_v32 }
 0x139   : > { %v719_v35 = vpop.f32.mrf.mxu1 }
 0x13a   : > { %812 = vst [vmem:[%s393_s29 + $0x8] sm:$0xff] %v1042_v33  ;;  %814 = vst [vmem:[%s393_s29 + $0x18] sm:$0xff] %v1044_v34  ;;  %v778_v37 = vadd.f32 %v766_v13, %v719_v35  ;;  %822 = sbr.rel (!%p1271_p6) target bundleno = 327 (0x147), region = 82 }
 0x13b   : > { %v721_v38 = vpop.f32.mrf.mxu1 }
 0x13c   : > { %v1045_v39 = vpack.c.bf16 %v778_v37, %v777_v36 }
 0x13d   : > { %v722_v40 = vpop.f32.mrf.mxu1  ;;  %v865_v41 = vld [vmem:[%s393_s29] sm:$0xff] (%p1271_p6)  ;;  %v869_v43 = vld [vmem:[%s393_s29 + $0x10] sm:$0xff] (%p1271_p6) }
 0x13e   : > { %815 = vst [vmem:[%s393_s29 + $0x20] sm:$0xff] %v1045_v39  ;;  %866 = vst [vmem:[%s828_s5] sm:$0xff] (%p1271_p6), %v865_v41 }
 0x13f   : > { %870 = vst [vmem:[%s828_s5 + $0x30] sm:$0xff] %v869_v43 }
 0x141   : > { %v867_v42 = vld [vmem:[%s393_s29 + $0x8] sm:$0xff]  ;;  %v871_v44 = vld [vmem:[%s393_s29 + $0x18] sm:$0xff] }
 0x142   : > { %868 = vst [vmem:[%s828_s5 + $0x18] sm:$0xff] %v867_v42  ;;  %872 = vst [vmem:[%s828_s5 + $0x48] sm:$0xff] %v871_v44 }
 0x145   : > { %v873_v45 = vld [vmem:[%s393_s29 + $0x20] sm:$0xff] }
 0x146   : > { %874 = vst [vmem:[%s828_s5 + $0x60] sm:$0xff] %v873_v45 }
 0x147 PF: > { %s13_s16 = sadd.s32 1, %s1214_s16   ;;  %s1438_s12 = smov %s1202_s13 }
 0x148   : > { %p10_p12 = scmp.ge.s32.totalorder %s13_s16, 5   ;;  %s1439_s13 = smov %s1276_s22 }
 0x149   : > { %s1440_s14 = smov %s1210_s15  ;;  %s1441_s15 = smov %s1443_s17 }
 0x14a   :  { %12 = sbr.rel (!%p10_p12) target bundleno = 3 (0x3), region = 157 }

// kernel: mdm_simetric_forward.21
= control target key start
LH: loop header
LB: loop body
LE: loop exit
PB: predicated region body
PF: predicated region fallthrough
CT: control target
= control target key end

     0   :  { %v367_v39 = vlaneseq  ;;  %s959_s1 = inlined_call_operand.vmem [shape: bf16[256,256], index: 1, kind: input, shape index: {}]   ;;  %s960_s0 = inlined_call_operand.vmem [shape: bf16[40,256], index: 0, kind: input, shape index: {}]   ;;  %s961_s2 = inlined_call_operand.vmem [shape: f32[1,256], index: 2, kind: input, shape index: {}]   ;;  %s962_s3 = inlined_call_operand.vmem [shape: bf16[40,256], index: 3, kind: input, shape index: {}]   ;;  %s963_s4 = inlined_call_operand.vmem [shape: f32[1,256], index: 4, kind: input, shape index: {}]   ;;  %s964_s5 = inlined_call_operand.vmem [shape: f32[1,256], index: 5, kind: input, shape index: {}]   ;;  %s965_s6 = inlined_call_operand.vmem [shape: bf16[40,256], index: 6, kind: output, shape index: {}]  }
   0x1   :  { %v658_v0 = vld [vmem:[%s959_s1 + $0x74] ss:$8 sps:$4 sm:$0xff]   ;;  %v660_v1 = vld [vmem:[%s959_s1 + $0x70] ss:$8 sps:$4 sm:$0xff]   ;;  %v661_v2 = vld [vmem:[%s959_s1 + $0x64] ss:$8 sps:$4 sm:$0xff]  }
   0x2   :  { %271 = vmatprep.subr.bf16.mxu0 %v658_v0  ;;  %626 = vmatprep.subr.bf16.mxu1 %v658_v0  ;;  %v663_v3 = vld [vmem:[%s959_s1 + $0x60] ss:$8 sps:$4 sm:$0xff]   ;;  %v664_v4 = vld [vmem:[%s959_s1 + $0x54] ss:$8 sps:$4 sm:$0xff]   ;;  %v666_v5 = vld [vmem:[%s959_s1 + $0x50] ss:$8 sps:$4 sm:$0xff]  }
   0x3   :  { %272 = vmatpush1.bf16.msra.mxu0 %v660_v1  ;;  %642 = vmatpush1.bf16.msra.mxu1 %v660_v1  ;;  %v667_v6 = vld [vmem:[%s959_s1 + $0x44] ss:$8 sps:$4 sm:$0xff]   ;;  %v669_v7 = vld [vmem:[%s959_s1 + $0x40] ss:$8 sps:$4 sm:$0xff]   ;;  %v670_v8 = vld [vmem:[%s959_s1 + $0x34] ss:$8 sps:$4 sm:$0xff]  }
   0x4   :  { %273 = vmatprep.subr.bf16.mxu0 %v661_v2  ;;  %627 = vmatprep.subr.bf16.mxu1 %v661_v2  ;;  %v672_v9 = vld [vmem:[%s959_s1 + $0x30] ss:$8 sps:$4 sm:$0xff]   ;;  %v673_v10 = vld [vmem:[%s959_s1 + $0x24] ss:$8 sps:$4 sm:$0xff]   ;;  %v675_v11 = vld [vmem:[%s959_s1 + $0x20] ss:$8 sps:$4 sm:$0xff]  }
   0x5   :  { %v676_v12 = vld [vmem:[%s959_s1 + $0x14] ss:$8 sps:$4 sm:$0xff]   ;;  %v708_v13 = vld [vmem:[%s960_s0 + $0x4] ss:$8 sps:$4 sm:$0xff]   ;;  %v678_v14 = vld [vmem:[%s959_s1 + $0x10] ss:$8 sps:$4 sm:$0xff]  }
   0x6   :  { %v711_v15 = vld [vmem:[%s960_s0 + $0x14] ss:$8 sps:$4 sm:$0xff]   ;;  %v679_v16 = vld [vmem:[%s959_s1 + $0x4] ss:$8 sps:$4 sm:$0xff]   ;;  %303 = vmatprep.mubr.bf16.mxu0 %v708_v13  ;;  %v681_v17 = vld [vmem:[%s959_s1] ss:$8 sps:$4 sm:$0xff]  }
   0x7   :  { %274 = vmatpush1.bf16.msra.mxu0 %v663_v3  ;;  %643 = vmatpush1.bf16.msra.mxu1 %v663_v3  ;;  %v682_v18 = vld [vmem:[%s959_s1 + $0xf4] ss:$8 sps:$4 sm:$0xff]   ;;  %v684_v19 = vld [vmem:[%s959_s1 + $0xf0] ss:$8 sps:$4 sm:$0xff]   ;;  %v685_v20 = vld [vmem:[%s959_s1 + $0xe4] ss:$8 sps:$4 sm:$0xff]  }
   0x8   :  { %275 = vmatprep.subr.bf16.mxu0 %v664_v4  ;;  %628 = vmatprep.subr.bf16.mxu1 %v664_v4  ;;  %v687_v21 = vld [vmem:[%s959_s1 + $0xe0] ss:$8 sps:$4 sm:$0xff]   ;;  %v688_v22 = vld [vmem:[%s959_s1 + $0xd4] ss:$8 sps:$4 sm:$0xff]   ;;  %v690_v23 = vld [vmem:[%s959_s1 + $0xd0] ss:$8 sps:$4 sm:$0xff]  }
   0x9   :  { %313 = vmatprep.mubr.bf16.mxu1 %v711_v15  ;;  %v691_v24 = vld [vmem:[%s959_s1 + $0xc4] ss:$8 sps:$4 sm:$0xff]   ;;  %v693_v25 = vld [vmem:[%s959_s1 + $0xc0] ss:$8 sps:$4 sm:$0xff]   ;;  %v694_v26 = vld [vmem:[%s959_s1 + $0xb4] ss:$8 sps:$4 sm:$0xff]  }
   0xa   :  { %v696_v27 = vld [vmem:[%s959_s1 + $0xb0] ss:$8 sps:$4 sm:$0xff]   ;;  %v697_v28 = vld [vmem:[%s959_s1 + $0xa4] ss:$8 sps:$4 sm:$0xff]   ;;  %v699_v29 = vld [vmem:[%s959_s1 + $0xa0] ss:$8 sps:$4 sm:$0xff]  }
   0xb   :  { %276 = vmatpush1.bf16.msra.mxu0 %v666_v5  ;;  %644 = vmatpush1.bf16.msra.mxu1 %v666_v5  ;;  %v700_v30 = vld [vmem:[%s959_s1 + $0x94] ss:$8 sps:$4 sm:$0xff]   ;;  %v702_v31 = vld [vmem:[%s959_s1 + $0x90] ss:$8 sps:$4 sm:$0xff]   ;;  %v703_v32 = vld [vmem:[%s959_s1 + $0x84] ss:$8 sps:$4 sm:$0xff]  }
   0xc   :  { %277 = vmatprep.subr.bf16.mxu0 %v667_v6  ;;  %629 = vmatprep.subr.bf16.mxu1 %v667_v6  ;;  %v705_v33 = vld [vmem:[%s959_s1 + $0x80] ss:$8 sps:$4 sm:$0xff]   ;;  %v709_v36 = vld [vmem:[%s960_s0 + $0x10] ss:$8 sps:$4 sm:$0xff]   ;;  %v368_v40 = vshrl.u32 %v367_v39, 7 }
   0xd   :  { %v51_v34 = vld [vmem:[%s960_s0 + $0x20] sm:$0xff]  ;;  %v389_v46 = vld [vmem:[%s962_s3 + $0x10] sm:$0xff]  ;;  %v388_v50 = vld [vmem:[%s962_s3 + $0x8] sm:$0xff] }
   0xe   :  { %v706_v35 = vld [vmem:[%s960_s0] ss:$8 sps:$4 sm:$0xff]   ;;  %v583_v37 = vcombine.high %v51_v34, %v51_v34  ;;  %v582_v38 = vcombine.low %v51_v34, %v51_v34  ;;  %v870_v41 = vsub.s32 0, %v368_v40  ;;  %v875_v43 = vsub.s32 1, %v368_v40  ;;  %v390_v51 = vld [vmem:[%s962_s3 + $0x18] sm:$0xff] }
   0xf   :  { %278 = vmatpush1.bf16.msra.mxu0 %v669_v7  ;;  %645 = vmatpush1.bf16.msra.mxu1 %v669_v7  ;;  %v365_v42 = vld [vmem:[%s961_s2] sm:$0x3]  ;;  %v397_v52 = vunpack.c.h.bf16 %v389_v46  ;;  %v396_v58 = vunpack.c.l.bf16 %v389_v46  ;;  %v394_v63 = vunpack.c.l.bf16 %v388_v50  ;;  %v398_v1 = vunpack.c.l.bf16 %v390_v51 }
  0x10   :  { %279 = vmatprep.subr.bf16.mxu0 %v670_v8  ;;  %630 = vmatprep.subr.bf16.mxu1 %v670_v8  ;;  %v370_v44 = vrot.slane %v365_v42, %v870_v41  ;;  %v374_v45 = vrot.slane %v365_v42, %v875_v43  ;;  %v387_v47 = vld [vmem:[%s962_s3] sm:$0xff]  ;;  %v395_v2 = vunpack.c.h.bf16 %v388_v50  ;;  %v399_v3 = vunpack.c.h.bf16 %v390_v51 }
  0x11   :  { %v393_v53 = vunpack.c.h.bf16 %v387_v47  ;;  %v392_v59 = vunpack.c.l.bf16 %v387_v47  ;;  %v391_v4 = vld [vmem:[%s962_s3 + $0x20] sm:$0xff] }
  0x12   :  { %v400_v15 = vunpack.c.l.bf16 %v391_v4 }
  0x13   :  { %280 = vmatpush1.bf16.msra.mxu0 %v672_v9  ;;  %646 = vmatpush1.bf16.msra.mxu1 %v672_v9 }
  0x14   :  { %281 = vmatprep.subr.bf16.mxu0 %v673_v10  ;;  %631 = vmatprep.subr.bf16.mxu1 %v673_v10 }
  0x17   :  { %282 = vmatpush1.bf16.msra.mxu0 %v675_v11  ;;  %647 = vmatpush1.bf16.msra.mxu1 %v675_v11 }
  0x18   :  { %283 = vmatprep.subr.bf16.mxu0 %v676_v12  ;;  %632 = vmatprep.subr.bf16.mxu1 %v676_v12 }
  0x1b   :  { %284 = vmatpush1.bf16.msra.mxu0 %v678_v14  ;;  %648 = vmatpush1.bf16.msra.mxu1 %v678_v14 }
  0x1c   :  { %285 = vmatprep.subr.bf16.mxu0 %v679_v16  ;;  %633 = vmatprep.subr.bf16.mxu1 %v679_v16 }
  0x1f   :  { %286 = vmatpush1.bf16.msra.mxu0 %v681_v17  ;;  %649 = vmatpush1.bf16.msra.mxu1 %v681_v17 }
  0x20   :  { %287 = vmatprep.subr.bf16.mxu0 %v682_v18  ;;  %634 = vmatprep.subr.bf16.mxu1 %v682_v18 }
  0x23   :  { %288 = vmatpush2.bf16.msra.mxu0 %v684_v19  ;;  %650 = vmatpush2.bf16.msra.mxu1 %v684_v19 }
  0x24   :  { %289 = vmatprep.subr.bf16.mxu0 %v685_v20  ;;  %635 = vmatprep.subr.bf16.mxu1 %v685_v20  ;;  %v401_v20 = vunpack.c.h.bf16 %v391_v4 }
  0x27   :  { %290 = vmatpush2.bf16.msra.mxu0 %v687_v21  ;;  %651 = vmatpush2.bf16.msra.mxu1 %v687_v21 }
  0x28   :  { %291 = vmatprep.subr.bf16.mxu0 %v688_v22  ;;  %636 = vmatprep.subr.bf16.mxu1 %v688_v22 }
  0x2b   :  { %292 = vmatpush2.bf16.msra.mxu0 %v690_v23  ;;  %652 = vmatpush2.bf16.msra.mxu1 %v690_v23 }
  0x2c   :  { %293 = vmatprep.subr.bf16.mxu0 %v691_v24  ;;  %637 = vmatprep.subr.bf16.mxu1 %v691_v24 }
  0x2f   :  { %294 = vmatpush2.bf16.msra.mxu0 %v693_v25  ;;  %653 = vmatpush2.bf16.msra.mxu1 %v693_v25 }
  0x30   :  { %295 = vmatprep.subr.bf16.mxu0 %v694_v26  ;;  %638 = vmatprep.subr.bf16.mxu1 %v694_v26 }
  0x33   :  { %296 = vmatpush2.bf16.msra.mxu0 %v696_v27  ;;  %654 = vmatpush2.bf16.msra.mxu1 %v696_v27 }
  0x34   :  { %297 = vmatprep.subr.bf16.mxu0 %v697_v28  ;;  %639 = vmatprep.subr.bf16.mxu1 %v697_v28 }
  0x37   :  { %298 = vmatpush2.bf16.msra.mxu0 %v699_v29  ;;  %655 = vmatpush2.bf16.msra.mxu1 %v699_v29 }
  0x38   :  { %299 = vmatprep.subr.bf16.mxu0 %v700_v30  ;;  %640 = vmatprep.subr.bf16.mxu1 %v700_v30 }
  0x3b   :  { %300 = vmatpush2.bf16.msra.mxu0 %v702_v31  ;;  %656 = vmatpush2.bf16.msra.mxu1 %v702_v31 }
  0x3c   :  { %301 = vmatprep.subr.bf16.mxu0 %v703_v32  ;;  %641 = vmatprep.subr.bf16.mxu1 %v703_v32 }
  0x3f   :  { %302 = vmatpush2.bf16.msra.mxu0 %v705_v33  ;;  %657 = vmatpush2.bf16.msra.mxu1 %v705_v33 }
  0x42   :  { %304 = vmatmul.mubr.bf16.vlgmr.msra.gmra.mxu0 %v706_v35  ;;  %314 = vmatmul.mubr.bf16.vlgmr.msra.gmra.mxu1 %v709_v36 }
  0x43   :  { %323 = vmatprep.mubr.bf16.mxu1 %v583_v37 }
  0x4a   :  { %324 = vmatmul.mubr.bf16.gmra.mxu1 %v582_v38 }
 0x102   :  { %v305_v48 = vpop.f32.mrf.mxu0  ;;  %v315_v49 = vpop.f32.mrf.mxu1 }
 0x103   :  { %v377_v54 = vadd.f32 %v370_v44, %v305_v48  ;;  %v381_v55 = vadd.f32 %v370_v44, %v315_v49 }
 0x104   :  { %v307_v56 = vpop.f32.mrf.mxu0  ;;  %v317_v57 = vpop.f32.mrf.mxu1 }
 0x105   :  { %v378_v60 = vadd.f32 %v374_v45, %v307_v56  ;;  %v382_v61 = vadd.f32 %v374_v45, %v317_v57  ;;  %v406_v11 = vadd.f32 %v396_v58, %v381_v55  ;;  %v402_v12 = vadd.f32 %v392_v59, %v377_v54 }
 0x106   :  { %v309_v62 = vpop.f32.mrf.mxu0  ;;  %v319_v0 = vpop.f32.mrf.mxu1 }
 0x107   :  { %v379_v5 = vadd.f32 %v370_v44, %v309_v62  ;;  %v383_v6 = vadd.f32 %v370_v44, %v319_v0  ;;  %v407_v7 = vadd.f32 %v397_v52, %v382_v61  ;;  %v403_v8 = vadd.f32 %v393_v53, %v378_v60 }
 0x108   :  { %v311_v9 = vpop.f32.mrf.mxu0  ;;  %v321_v10 = vpop.f32.mrf.mxu1 }
 0x109   :  { %v380_v13 = vadd.f32 %v374_v45, %v311_v9  ;;  %v384_v14 = vadd.f32 %v374_v45, %v321_v10  ;;  %v404_v16 = vadd.f32 %v394_v63, %v379_v5  ;;  %v418_v18 = vadd.f32 %v407_v7, %v406_v11 }
 0x10a   :  { %v325_v17 = vpop.f32.mrf.mxu1  ;;  %v412_v19 = vadd.f32 %v403_v8, %v402_v12  ;;  %v408_v21 = vadd.f32 %v398_v1, %v383_v6 }
 0x10b   :  { %v405_v22 = vadd.f32 %v395_v2, %v380_v13  ;;  %v409_v23 = vadd.f32 %v399_v3, %v384_v14  ;;  %v385_v24 = vadd.f32 %v370_v44, %v325_v17  ;;  %419 = vadd.xlane.f32.xlu1 %v418_v18 }
 0x10c   :  { %413 = vadd.xlane.f32.xlu0 %v412_v19  ;;  %v327_v25 = vpop.f32.mrf.mxu1 }
 0x10d   :  { %v386_v26 = vadd.f32 %v374_v45, %v327_v25  ;;  %v421_v27 = vadd.f32 %v409_v23, %v408_v21  ;;  %v415_v28 = vadd.f32 %v405_v22, %v404_v16  ;;  %v410_v30 = vadd.f32 %v400_v15, %v385_v24 }
 0x10e   :  { %v329_v29 = vpop.f32.mrf.mxu1 }
 0x10f   :  { %v411_v31 = vadd.f32 %v401_v20, %v386_v26  ;;  %422 = vadd.xlane.f32.xlu1 %v421_v27 }
 0x110   :  { %416 = vadd.xlane.f32.xlu0 %v415_v28  ;;  %v330_v32 = vpop.f32.mrf.mxu1 }
 0x111   :  { %v424_v33 = vadd.f32 %v411_v31, %v410_v30 }
 0x114   :  { %425 = vadd.xlane.f32.xlu0 %v424_v33 }
 0x194   :  { %v420_v34 = vpop.xlane.xlu1 %419 }
 0x195   :  { %v414_v35 = vpop.xlane.xlu0 %413  ;;  %v430_v36 = vmul.f32 0.00390625, %v420_v34 }
 0x196   :  { %v428_v37 = vmul.f32 0.00390625, %v414_v35 }
 0x197   :  { %v898_v40 = vsub.f32 %v406_v11, %v430_v36  ;;  %v900_v42 = vsub.f32 %v407_v7, %v430_v36 }
 0x198   :  { %v894_v38 = vsub.f32 %v402_v12, %v428_v37  ;;  %v896_v39 = vsub.f32 %v403_v8, %v428_v37  ;;  %v423_v44 = vpop.xlane.xlu1 %422 }
 0x199   :  { %v417_v45 = vpop.xlane.xlu0 %416  ;;  %v431_v46 = vmul.f32 0.00390625, %v423_v44  ;;  %v447_v56 = vmul.f32 %v898_v40, %v898_v40  ;;  %v448_v57 = vmul.f32 %v900_v42, %v900_v42 }
 0x19a   :  { %v429_v47 = vmul.f32 0.00390625, %v417_v45  ;;  %v443_v48 = vmul.f32 %v894_v38, %v894_v38  ;;  %v444_v49 = vmul.f32 %v896_v39, %v896_v39 }
 0x19b   :  { %v906_v50 = vsub.f32 %v408_v21, %v431_v46  ;;  %v908_v51 = vsub.f32 %v409_v23, %v431_v46  ;;  %v459_v2 = vadd.f32 %v448_v57, %v447_v56  ;;  %v515_v23 = vld [vmem:[%s964_s5] sm:$0x3] }
 0x19c   :  { %v435_v52 = vsub.f32 %v404_v16, %v429_v47  ;;  %v436_v53 = vsub.f32 %v405_v22, %v429_v47  ;;  %v453_v55 = vadd.f32 %v444_v49, %v443_v48  ;;  %v493_v22 = vld [vmem:[%s963_s4] sm:$0x3]  ;;  %v520_v27 = vrot.slane %v515_v23, %v870_v41 }
 0x19d   :  { %v426_v54 = vpop.xlane.xlu0 %425  ;;  %v449_v61 = vmul.f32 %v906_v50, %v906_v50  ;;  %v450_v1 = vmul.f32 %v908_v51, %v908_v51  ;;  %v498_v24 = vrot.slane %v493_v22, %v870_v41  ;;  %v502_v25 = vrot.slane %v493_v22, %v875_v43 }
 0x19e   :  { %v432_v58 = vmul.f32 0.00390625, %v426_v54  ;;  %v445_v59 = vmul.f32 %v435_v52, %v435_v52  ;;  %v446_v60 = vmul.f32 %v436_v53, %v436_v53  ;;  %454 = vadd.xlane.f32.xlu1 %v453_v55  ;;  %v524_v28 = vrot.slane %v515_v23, %v875_v43 }
 0x19f   :  { %v462_v5 = vadd.f32 %v450_v1, %v449_v61 }
 0x1a0   :  { %v916_v62 = vsub.f32 %v410_v30, %v432_v58  ;;  %v918_v63 = vsub.f32 %v411_v31, %v432_v58  ;;  %v456_v0 = vadd.f32 %v446_v60, %v445_v59 }
 0x1a2   :  { %457 = vadd.xlane.f32.xlu0 %v456_v0  ;;  %v451_v3 = vmul.f32 %v916_v62, %v916_v62  ;;  %v452_v4 = vmul.f32 %v918_v63, %v918_v63  ;;  %460 = vadd.xlane.f32.xlu1 %v459_v2 }
 0x1a4   :  { %v465_v6 = vadd.f32 %v452_v4, %v451_v3 }
 0x1a6   :  { %463 = vadd.xlane.f32.xlu0 %v462_v5  ;;  %466 = vadd.xlane.f32.xlu1 %v465_v6 }
 0x227   :  { %v455_v7 = vpop.xlane.xlu1 %454 }
 0x228   :  { %v468_v8 = vmul.f32 0.00390625, %v455_v7 }
 0x22a   :  { %v473_v9 = vadd.f32 1e-05, %v468_v8 }
 0x22b   :  { %v458_v10 = vpop.xlane.xlu0 %457  ;;  %v461_v11 = vpop.xlane.xlu1 %460 }
 0x22c   :  { %v469_v12 = vmul.f32 0.00390625, %v458_v10  ;;  %714 = vrsqrt.f32 %v473_v9  ;;  %v470_v13 = vmul.f32 0.00390625, %v461_v11 }
 0x22e   :  { %v474_v14 = vadd.f32 1e-05, %v469_v12  ;;  %v475_v15 = vadd.f32 1e-05, %v470_v13 }
 0x22f   :  { %v464_v16 = vpop.xlane.xlu0 %463  ;;  %v467_v17 = vpop.xlane.xlu1 %466 }
 0x230   :  { %716 = vrsqrt.f32 %v474_v14  ;;  %v471_v18 = vmul.f32 0.00390625, %v464_v16  ;;  %v472_v19 = vmul.f32 0.00390625, %v467_v17 }
 0x231   :  { %718 = vrsqrt.f32 %v475_v15 }
 0x232   :  { %v476_v20 = vadd.f32 1e-05, %v471_v18  ;;  %v477_v21 = vadd.f32 1e-05, %v472_v19 }
 0x234   :  { %720 = vrsqrt.f32 %v476_v20 }
 0x235   :  { %722 = vrsqrt.f32 %v477_v21 }
 0x239   :  { %v715_v26 = vpop.eup %714 }
 0x23a   :  { %v483_v29 = vmul.f32 %v715_v26, %v894_v38  ;;  %v484_v30 = vmul.f32 %v715_v26, %v896_v39 }
 0x23c   :  { %v505_v32 = vmul.f32 %v498_v24, %v483_v29  ;;  %v506_v33 = vmul.f32 %v502_v25, %v484_v30 }
 0x23d   :  { %v717_v31 = vpop.eup %716 }
 0x23e   :  { %v719_v34 = vpop.eup %718  ;;  %v485_v35 = vmul.f32 %v717_v31, %v435_v52  ;;  %v486_v36 = vmul.f32 %v717_v31, %v436_v53  ;;  %v527_v37 = vadd.f32 %v520_v27, %v505_v32  ;;  %v528_v44 = vadd.f32 %v524_v28, %v506_v33 }
 0x23f   :  { %v487_v45 = vmul.f32 %v719_v34, %v898_v40  ;;  %v488_v46 = vmul.f32 %v719_v34, %v900_v42 }
 0x240   :  { %v507_v47 = vmul.f32 %v498_v24, %v485_v35  ;;  %v508_v41 = vmul.f32 %v502_v25, %v486_v36  ;;  %v621_v43 = vpack.c.bf16 %v528_v44, %v527_v37 }
 0x241   :  { %v721_v48 = vpop.eup %720  ;;  %v509_v49 = vmul.f32 %v498_v24, %v487_v45  ;;  %v510_v38 = vmul.f32 %v502_v25, %v488_v46 }
 0x242   :  { %v723_v54 = vpop.eup %722  ;;  %v529_v39 = vadd.f32 %v520_v27, %v507_v47  ;;  %v530_v55 = vadd.f32 %v524_v28, %v508_v41  ;;  %v489_v56 = vmul.f32 %v721_v48, %v906_v50  ;;  %v490_v52 = vmul.f32 %v721_v48, %v908_v51  ;;  %569 = vst [vmem:[%s965_s6] sm:$0xff] %v621_v43 }
 0x243   :  { %v531_v40 = vadd.f32 %v520_v27, %v509_v49  ;;  %v532_v53 = vadd.f32 %v524_v28, %v510_v38  ;;  %v491_v42 = vmul.f32 %v723_v54, %v916_v62  ;;  %v492_v57 = vmul.f32 %v723_v54, %v918_v63 }
 0x244   :  { %v622_v58 = vpack.c.bf16 %v530_v55, %v529_v39  ;;  %v511_v59 = vmul.f32 %v498_v24, %v489_v56  ;;  %v512_v60 = vmul.f32 %v502_v25, %v490_v52 }
 0x245   :  { %v623_v61 = vpack.c.bf16 %v532_v53, %v531_v40  ;;  %v513_v0 = vmul.f32 %v498_v24, %v491_v42  ;;  %v514_v1 = vmul.f32 %v502_v25, %v492_v57 }
 0x246   :  { %570 = vst [vmem:[%s965_s6 + $0x8] sm:$0xff] %v622_v58  ;;  %v533_v50 = vadd.f32 %v520_v27, %v511_v59  ;;  %v534_v51 = vadd.f32 %v524_v28, %v512_v60 }
 0x247   :  { %571 = vst [vmem:[%s965_s6 + $0x10] sm:$0xff] %v623_v61  ;;  %v535_v2 = vadd.f32 %v520_v27, %v513_v0  ;;  %v536_v62 = vadd.f32 %v524_v28, %v514_v1 }
 0x248   :  { %v624_v3 = vpack.c.bf16 %v534_v51, %v533_v50 }
 0x249   :  { %v625_v63 = vpack.c.bf16 %v536_v62, %v535_v2 }
 0x24a   :  { %572 = vst [vmem:[%s965_s6 + $0x18] sm:$0xff] %v624_v3 }
 0x24b   :  { %573 = vst [vmem:[%s965_s6 + $0x20] sm:$0xff] %v625_v63 }

// kernel: mdm_simetric_forward.20
= control target key start
LH: loop header
LB: loop body
LE: loop exit
PB: predicated region body
PF: predicated region fallthrough
CT: control target
= control target key end

     0   :  { %s1631_s21 = smov 0   ;;  %s1633_s22 = smov 0   ;;  %s1853_s0 = inlined_call_operand.vmem [shape: bf16[4,9,768], index: 0, kind: input, shape index: {}, may-alias: {0,1,2,3,4}]   ;;  %s1854_s1 = inlined_call_operand.vmem [shape: bf16[4,9,768], index: 1, kind: input, shape index: {}, may-alias: {0,1,2,3,4}]   ;;  %s1855_s2 = inlined_call_operand.vmem [shape: bf16[4,9,768], index: 2, kind: input, shape index: {}, may-alias: {0,1,2,3,4}]   ;;  %s1856_s3 = inlined_call_operand.vmem [shape: bf16[4,9,768], index: 3, kind: input, shape index: {}, may-alias: {0,1,2,3,4}]   ;;  %s1857_s4 = inlined_call_operand.vmem [shape: bf16[4,9,768], index: 4, kind: input, shape index: {}, may-alias: {0,1,2,3,4}]   ;;  %s1858_s5 = inlined_call_operand.vmem [shape: f32[4,1,9], index: 5, kind: input, shape index: {}]   ;;  %s1859_s6 = inlined_call_operand.vmem [shape: bf16[4,9,256], index: 6, kind: output, shape index: {}]  }
   0x1   :  { %s1635_s23 = smov 0   ;;  %s1637_s24 = smov 0  }
   0x2   :  { %s1639_s25 = smov 0  }
   0x3 LB: > { %s1341_s26 = sadd.s32 4294967295, %s1591_s25   ;;  %s1658_s27 = sadd.s32 1, %s1591_s25   ;;  %s1591_s25 = sphi %s1639_s25, %s1866_s25   ;;  %s1587_s24 = sphi %s1637_s24, %s1865_s24   ;;  %s1583_s23 = sphi %s1635_s23, %s1864_s23   ;;  %s1579_s22 = sphi %s1633_s22, %s1863_s22   ;;  %s1575_s21 = sphi %s1631_s21, %s1862_s21  }
   0x4   : > { %s20_s28 = ssub.s32 %s1591_s25, %s1658_s27  ;;  %s23_s29 = sadd.s32 1, %s1587_s24 }
   0x5   : > { %p21_p0 = scmp.eq.s32.totalorder %s20_s28, 0  ;;  %p30_p1 = scmp.ne.s32.totalorder %s1587_s24, %s1583_s23 }
   0x6   : > { %p31_p2 = scmp.eq.s32.totalorder %s1591_s25, 0  ;;  %s72_s30 = sadd.s32 2, %s1591_s25 }
   0x7   : > { %s1668_s7 = scalar_select %p21_p0, %s1587_s24, %s23_s29  }
   0x8   : > { %p1672_p3 = por %p31_p2, %p30_p1  ;;  %p73_p4 = scmp.lt.s32.totalorder %s72_s30, 0 }
   0x9   : > { %s74_s9 = ssub.s32 0, %s72_s30  ;;  %s85_s10 = sadd.s32 2, %s1658_s27 }
   0xa   : > { %s1343_s11 = smin.u32 %s74_s9, %s72_s30  ;;  %s87_s13 = ssub.s32 0, %s85_s10 }
   0xb   : > { %s76_s12 = sand.u32 3, %s1343_s11   ;;  %s1346_s15 = smin.u32 %s87_s13, %s85_s10 }
   0xc   : > { %s77_s14 = ssub.s32 0, %s76_s12  ;;  %p86_p5 = scmp.lt.s32.totalorder %s85_s10, 0 }
   0xd   : > { %s1868_s14 = smov (!%p73_p4, %s77_s14), %s76_s12  ;;  %s89_s16 = sand.u32 3, %s1346_s15  }
   0xe   : > { %p1345_p6 = scmp.lt.s32.totalorder %s1868_s14, 0  ;;  %s83_s17 = sadd.s32 4, %s1868_s14 }
   0xf   : > { %s90_s18 = ssub.s32 0, %s89_s16  ;;  %p108_p7 = scmp.ne.s32.totalorder %s1579_s22, %s1575_s21 }
  0x10   : > { %s1870_s17 = smov (!%p1345_p6, %s83_s17), %s1868_s14  ;;  %s1872_s18 = smov (!%p86_p5, %s90_s18), %s89_s16 }
  0x11   : > { %p1683_p8 = por %p108_p7, %p31_p2  ;;  %p1348_p9 = scmp.lt.s32.totalorder %s1872_s18, 0 }
  0x12   : > { %s96_s20 = sadd.s32 4, %s1872_s18  ;;  %s101_s29 = sadd.s32 1, %s1579_s22 }
  0x13   : > { %s1874_s20 = smov (!%p1348_p9, %s96_s20), %s1872_s18  ;;  %p1356_p11 = scmp.ge.s32.totalorder %s1591_s25, 4 }
  0x14   : > { %s98_s28 = ssub.s32 %s1870_s17, %s1874_s20 }
  0x15   : > { %p99_p10 = scmp.eq.s32.totalorder %s98_s28, 0  ;;  %264 = sbr.rel (%p1356_p11) target bundleno = 56 (0x38), region = 16 }
  0x17   : > { %s1690_s30 = scalar_select %p99_p10, %s1579_s22, %s101_s29  }
  0x1a   : > { %267 = sbr.rel (!%p1672_p3) target bundleno = 32 (0x20), region = 20  ;;  %s269_s9 = sand.u32 (%p1672_p3), 1, %s1587_s24  }
  0x1b   : > { %s1473_s10 = smul.u32 (%p1672_p3), 48, %s1591_s25  ;;  %s1357_s11 = sshll.u32 (%p1672_p3), %s269_s9, 4 }
  0x1c   : > { %s271_s15 = scalar_lea.vmem (%p1672_p3), [#allocation2], %s1357_s11 }
  0x1d   : > { %s274_s14 = scalar_lea.vmem (%p1672_p3), %s1853_s0, %s1473_s10 }
  0x1e   : > { %v305_v0 = vld [vmem:[%s274_s14] sm:$0xff] (%p1672_p3)  ;;  %v307_v1 = vld [vmem:[%s274_s14 + $0x18] sm:$0xff] (%p1672_p3) }
  0x1f   : > { %306 = vst [vmem:[%s271_s15] sm:$0xff] %v305_v0  ;;  %308 = vst [vmem:[%s271_s15 + $0x8] sm:$0xff] %v307_v1 }
  0x20 PF: > { %314 = sbr.rel (!%p1672_p3) target bundleno = 38 (0x26), region = 58  ;;  %s316_s16 = sand.u32 (%p1672_p3), 1, %s1587_s24  }
  0x21   : > { %s1360_s18 = smul.u32 (%p1672_p3), 48, %s1591_s25  ;;  %s1359_s20 = sshll.u32 (%p1672_p3), %s316_s16, 4 }
  0x22   : > { %s318_s10 = scalar_lea.vmem (%p1672_p3), [#allocation3], %s1359_s20 }
  0x23   : > { %s1220_s9 = scalar_lea.vmem (%p1672_p3), %s1854_s1, %s1360_s18 }
  0x24   : > { %v1361_v2 = vld [vmem:[%s1220_s9 + $0x8] sm:$0xff] (%p1672_p3)  ;;  %v1362_v3 = vld [vmem:[%s1220_s9 + $0x20] sm:$0xff] (%p1672_p3) }
  0x25   : > { %354 = vst [vmem:[%s318_s10] sm:$0xff] %v1361_v2  ;;  %356 = vst [vmem:[%s318_s10 + $0x8] sm:$0xff] %v1362_v3 }
  0x26 PF: > { %362 = sbr.rel (!%p1683_p8) target bundleno = 44 (0x2c), region = 96  ;;  %s364_s11 = sand.u32 (%p1683_p8), 1, %s1579_s22  }
  0x27   : > { %s1367_s12 = smul.u32 (%p1683_p8), 48, %s1870_s17  ;;  %s1363_s13 = sshll.u32 (%p1683_p8), %s364_s11, 4 }
  0x28   : > { %s366_s18 = scalar_lea.vmem (%p1683_p8), [#allocation4], %s1363_s13 }
  0x29   : > { %s1226_s16 = scalar_lea.vmem (%p1683_p8), %s1855_s2, %s1367_s12 }
  0x2a   : > { %v1368_v4 = vld [vmem:[%s1226_s16 + $0x8] sm:$0xff] (%p1683_p8)  ;;  %v1369_v5 = vld [vmem:[%s1226_s16 + $0x20] sm:$0xff] (%p1683_p8) }
  0x2b   : > { %415 = vst [vmem:[%s366_s18] sm:$0xff] %v1368_v4  ;;  %417 = vst [vmem:[%s366_s18 + $0x8] sm:$0xff] %v1369_v5 }
  0x2c PF: > { %423 = sbr.rel (!%p1672_p3) target bundleno = 50 (0x32), region = 134  ;;  %s425_s20 = sand.u32 (%p1672_p3), 1, %s1587_s24  }
  0x2d   : > { %s1371_s28 = smul.u32 (%p1672_p3), 48, %s1591_s25  ;;  %s1370_s29 = sshll.u32 (%p1672_p3), %s425_s20, 4 }
  0x2e   : > { %s427_s12 = scalar_lea.vmem (%p1672_p3), [#allocation5], %s1370_s29 }
  0x2f   : > { %s1232_s11 = scalar_lea.vmem (%p1672_p3), %s1856_s3, %s1371_s28 }
  0x30   : > { %v1372_v6 = vld [vmem:[%s1232_s11 + $0x10] sm:$0xff] (%p1672_p3)  ;;  %v1373_v7 = vld [vmem:[%s1232_s11 + $0x28] sm:$0xff] (%p1672_p3) }
  0x31   : > { %463 = vst [vmem:[%s427_s12] sm:$0xff] %v1372_v6  ;;  %465 = vst [vmem:[%s427_s12 + $0x8] sm:$0xff] %v1373_v7 }
  0x32 PF: > { %471 = sbr.rel (!%p1683_p8) target bundleno = 56 (0x38), region = 172  ;;  %s473_s8 = sand.u32 (%p1683_p8), 1, %s1579_s22  }
  0x33   : > { %s1378_s13 = smul.u32 (%p1683_p8), 48, %s1870_s17  ;;  %s1374_s14 = sshll.u32 (%p1683_p8), %s473_s8, 4 }
  0x34   : > { %s475_s20 = scalar_lea.vmem (%p1683_p8), [#allocation6], %s1374_s14 }
  0x35   : > { %s1238_s18 = scalar_lea.vmem (%p1683_p8), %s1857_s4, %s1378_s13 }
  0x36   : > { %v1379_v8 = vld [vmem:[%s1238_s18 + $0x10] sm:$0xff] (%p1683_p8)  ;;  %v1380_v9 = vld [vmem:[%s1238_s18 + $0x28] sm:$0xff] (%p1683_p8) }
  0x37   : > { %524 = vst [vmem:[%s475_s20] sm:$0xff] %v1379_v8  ;;  %526 = vst [vmem:[%s475_s20 + $0x8] sm:$0xff] %v1380_v9 }
  0x38 PF: > { %p1381_p12 = scmp.ge.s32.totalorder %s1591_s25, 1  ;;  %p537_p13 = scmp.lt.s32.totalorder %s1591_s25, 5 }
  0x3a   : > { %p538_p0 = pnand %p1381_p12, %p537_p13 }
  0x3b   : > { %s544_s17 = sand.u32 (!%p538_p0), 1, %s1583_s23   ;;  %s558_s19 = sand.u32 (!%p538_p0), 1, %s1575_s21  }
  0x3c   : > { %541 = sbr.rel (%p538_p0) target bundleno = 1014 (0x3f6), region = 214  ;;  %s1734_s28 = sshll.u32 (!%p538_p0), %s544_s17, 4 }
  0x3d   : > { %s1736_s29 = sshll.u32 (!%p538_p0), %s558_s19, 4  ;;  %s553_s21 = scalar_lea.vmem (!%p538_p0), [#allocation3], %s1734_s28 }
  0x3e   : > { %s546_s23 = scalar_lea.vmem (!%p538_p0), [#allocation2], %s1734_s28  ;;  %s567_s9 = scalar_lea.vmem (!%p538_p0), [#allocation5], %s1734_s28 }
  0x3f   : > { %s560_s10 = scalar_lea.vmem (!%p538_p0), [#allocation4], %s1736_s29  ;;  %s574_s11 = scalar_lea.vmem (!%p538_p0), [#allocation6], %s1736_s29 }
  0x40   : > { %p646_p1 = scmp.lt.s32.totalorder (!%p538_p0), %s1341_s26, 3 }
  0x41   : > { %v1593_v10 = vmov 0.0   ;;  %vm1594_vm0 = vmmov 0   ;;  %v655_v11 = vld [vmem:[%s546_s23] sm:$0xff]  ;;  %v656_v15 = vld [vmem:[%s546_s23 + $0x8] sm:$0x11]  ;;  %vm776_vm1 = vcmask 72704  }
  0x42   : > { %1425 = vmatprep.subr.bf16.mxu0 %v1593_v10  ;;  %1431 = vmatprep.subr.bf16.mxu1 %v1593_v10  ;;  %v1517_v12 = vld [vmem:[%s553_s21] ss:$8 sps:$4 sm:$0x1f]   ;;  %v657_v13 = vunpack.c.l.bf16 %v655_v11  ;;  %v659_v16 = vunpack.c.l.bf16 %v656_v15  ;;  %s1876_s26 = smov (!%p646_p1, %s1341_s26), 3  ;;  %vm780_vm2 = vcmask 65536   ;;  %vm830_vm3 = vcmask 1043456  }
  0x43   : > { %1427 = vmatprep.mubr.msk.bf16.mxu0 %vm1594_vm0, %v1593_v10  ;;  %1433 = vmatprep.mubr.msk.bf16.mxu1 %vm1594_vm0, %v1593_v10  ;;  %v1520_v14 = vld [vmem:[%s560_s10] ss:$8 sps:$4 sm:$0x1f]   ;;  %s648_s13 = scalar_lea.vmem %s1858_s5, %s1876_s26  ;;  %vm831_vm4 = vcmask 1044480   ;;  %v1595_v39 = vmov 65535   ;;  %v658_v44 = vunpack.c.h.bf16 %v655_v11  ;;  %v660_v45 = vunpack.c.h.bf16 %v656_v15  ;;  %s1406_s25 = sshll.u32 %s1876_s26, 4 }
  0x44   : > { %1426 = vmatpush3.bf16.xpose.msra.mxu0 %v1517_v12  ;;  %1432 = vmatpush3.bf16.xpose.msra.mxu1 %v1520_v14  ;;  %v661_v17 = vmul.f32 0.088388346, %v657_v13  ;;  %v663_v18 = vmul.f32 0.088388346, %v659_v16  ;;  %v1767_v20 = vld [vmem:[%s648_s13] ss:$0 sm:$0xff]  ;;  %s653_s16 = scalar_lea.vmem %s1859_s6, %s1406_s25 }
  0x45   : > { %1437 = vmatprep.subr.bf16.mxu0 %v1593_v10  ;;  %1443 = vmatprep.subr.bf16.mxu1 %v1593_v10  ;;  %v1522_v37 = vld [vmem:[%s574_s11] ss:$8 sps:$4 sm:$0x1f]   ;;  %v832_v40 = vsel %vm830_vm3, 4294967295, %v1595_v39  ;;  %v662_v46 = vmul.f32 0.088388346, %v658_v44 }
  0x46   : > { %v665_v19 = vpack.c.bf16 %v663_v18, %v661_v17  ;;  %v1526_v38 = vld [vmem:[%s567_s9] ss:$8 sps:$4 sm:$0x1f]   ;;  %v1781_v41 = vsel %vm831_vm4, %v832_v40, 0  ;;  %v664_v47 = vmul.f32 0.088388346, %v660_v45 }
  0x47   : > { %v835_v42 = vand.u32 %v1522_v37, %v1781_v41  ;;  %v887_v43 = vand.u32 %v1526_v38, %v1781_v41  ;;  %v1524_v2 = vld [vmem:[%s560_s10 + $0x4] ss:$8 sps:$4 sm:$0x1f]   ;;  %vm1181_vm5 = vcmask 1040384   ;;  %vm1182_vm6 = vsmask.f32 256 }
  0x48   : > { %v666_v48 = vpack.c.bf16 %v664_v47, %v662_v46  ;;  %v1519_v4 = vld [vmem:[%s553_s21 + $0x4] ss:$8 sps:$4 sm:$0x1f]   ;;  %vm1184_vm7 = vcmask 1044484   ;;  %vm1185_vm8 = vsmask.f32 4352  ;;  %vm1183_vm9 = vmand %vm1181_vm5, %vm1182_vm6 }
  0x49   : > { %v1528_v39 = vld [vmem:[%s567_s9 + $0x4] ss:$8 sps:$4 sm:$0x1f]   ;;  %vm1186_vm10 = vmand %vm1184_vm7, %vm1185_vm8 }
  0x4a   : > { %v1124_v40 = vand.u32 %v1528_v39, %v1781_v41  ;;  %vm1187_vm11 = vmor %vm1186_vm10, %vm1183_vm9 }
  0x4b   : > { %1428 = vmatmul.mubr.bf16.vlgmr.msra.gmra.mxu0 %v665_v19  ;;  %1434 = vmatmul.mubr.bf16.vlgmr.msra.gmra.mxu1 %v665_v19 }
  0x4c   : > { %1439 = vmatprep.mubr.msk.bf16.mxu0 %vm1594_vm0, %v1593_v10  ;;  %1445 = vmatprep.mubr.msk.bf16.mxu1 %vm1594_vm0, %v1593_v10 }
  0x4d   : > { %1438 = vmatpush3.bf16.msra.mxu0 %v835_v42  ;;  %1444 = vmatpush3.bf16.msra.mxu1 %v887_v43 }
  0x4e   : > { %1449 = vmatprep.subr.bf16.mxu0 %v1593_v10  ;;  %1455 = vmatprep.subr.bf16.mxu1 %v1593_v10 }
 0x10b   : > { %v722_v21 = vpop.f32.mrf.mxu0  ;;  %v769_v22 = vpop.f32.mrf.mxu1 }
 0x10c   : > { %v723_v23 = vadd.f32 %v1767_v20, %v722_v21  ;;  %v770_v24 = vadd.f32 %v1767_v20, %v769_v22 }
 0x10d   : > { %v1429_v25 = vpop.f32.mrf.mxu0  ;;  %v1435_v26 = vpop.f32.mrf.mxu1 }
 0x10e   : > { %v784_v27 = vsel %vm776_vm1, %v770_v24, -inf  ;;  %v777_v28 = vsel %vm776_vm1, %v723_v23, -inf }
 0x10f   : > { %785 = vmax.xlane.f32.xlu1 %v784_v27  ;;  %v772_v29 = vpop.f32.mrf.mxu1  ;;  %778 = vmax.xlane.f32.xlu0 %v777_v28  ;;  %v725_v30 = vpop.f32.mrf.mxu0 }
 0x110   : > { %v773_v31 = vadd.f32 %v1767_v20, %v772_v29  ;;  %v726_v32 = vadd.f32 %v1767_v20, %v725_v30 }
 0x111   : > { %v1430_v33 = vpop.f32.mrf.mxu0  ;;  %v1436_v34 = vpop.f32.mrf.mxu1 }
 0x112   : > { %v787_v35 = vsel %vm780_vm2, %v773_v31, -inf  ;;  %v781_v36 = vsel %vm780_vm2, %v726_v32, -inf }
 0x113   : > { %788 = vmax.xlane.f32.xlu1 %v787_v35  ;;  %782 = vmax.xlane.f32.xlu0 %v781_v36 }
 0x198   : > { %v786_v49 = vpop.xlane.xlu1 %785  ;;  %v779_v50 = vpop.xlane.xlu0 %778 }
 0x199   : > { %v790_v51 = vmax.f32 %v779_v50, %v786_v49 }
 0x19b   : > { %v792_v52 = vsub.f32 %v723_v23, %v790_v51  ;;  %v798_v53 = vsub.f32 %v770_v24, %v790_v51 }
 0x19c   : > { %v789_v54 = vpop.xlane.xlu1 %788  ;;  %v783_v55 = vpop.xlane.xlu0 %782 }
 0x19d   : > { %v794_v56 = vmul.f32 1.442695, %v792_v52  ;;  %v791_v57 = vmax.f32 %v783_v55, %v789_v54  ;;  %v800_v58 = vmul.f32 1.442695, %v798_v53 }
 0x19f   : > { %v793_v59 = vsub.f32 %v726_v32, %v791_v57  ;;  %v799_v60 = vsub.f32 %v773_v31, %v791_v57  ;;  %1529 = vpow2.f32 %v794_v56 }
 0x1a0   : > { %1531 = vpow2.f32 %v800_v58 }
 0x1a1   : > { %v796_v61 = vmul.f32 1.442695, %v793_v59  ;;  %v802_v62 = vmul.f32 1.442695, %v799_v60 }
 0x1a3   : > { %1533 = vpow2.f32 %v796_v61 }
 0x1a4   : > { %1535 = vpow2.f32 %v802_v62 }
 0x1ac   : > { %v1530_v63 = vpop.eup %1529 }
 0x1ad   : > { %v1532_v0 = vpop.eup %1531  ;;  %v804_v35 = vsel %vm776_vm1, %v1530_v63, 0.0 }
 0x1ae   : > { %v810_v37 = vsel %vm776_vm1, %v1532_v0, 0.0 }
 0x1b0   : > { %v1534_v1 = vpop.eup %1533 }
 0x1b1   : > { %v1536_v3 = vpop.eup %1535  ;;  %v820_v5 = vpack.c.bf16 %v1534_v1, %v1530_v63  ;;  %v807_v33 = vsel %vm780_vm2, %v1534_v1, 0.0 }
 0x1b2   : > { %v821_v6 = vpack.c.bf16 %v1536_v3, %v1532_v0  ;;  %v813_v36 = vsel %vm780_vm2, %v1536_v3, 0.0 }
 0x1b3   : > { %1446 = vmatmul.mubr.msk.bf16.vlgmr.msra.gmra.mxu1 %vm776_vm1, %v820_v5 }
 0x1b4   : > { %1440 = vmatmul.mubr.msk.bf16.vlgmr.msra.gmra.mxu0 %vm776_vm1, %v821_v6  ;;  %1456 = vmatpush3.bf16.xpose.msra.mxu1 %v1524_v2 }
 0x1b5   : > { %1450 = vmatpush3.bf16.xpose.msra.mxu0 %v1519_v4  ;;  %1451 = vmatprep.mubr.msk.bf16.mxu0 %vm1594_vm0, %v1593_v10 }
 0x1b6   : > { %1457 = vmatprep.mubr.msk.bf16.mxu1 %vm1594_vm0, %v1593_v10  ;;  %1461 = vmatprep.subr.bf16.mxu0 %v1593_v10 }
 0x1b7   : > { %1467 = vmatprep.subr.bf16.mxu1 %v1593_v10 }
 0x1bb   : > { %1458 = vmatmul.mubr.bf16.vlgmr.msra.gmra.mxu1 %v666_v48 }
 0x1bc   : > { %1452 = vmatmul.mubr.bf16.vlgmr.msra.gmra.mxu0 %v666_v48  ;;  %1469 = vmatprep.mubr.msk.bf16.mxu1 %vm1594_vm0, %v1593_v10 }
 0x1bd   : > { %1463 = vmatprep.mubr.msk.bf16.mxu0 %vm1594_vm0, %v1593_v10  ;;  %1468 = vmatpush3.bf16.msra.mxu1 %v1124_v40 }
 0x273   : > { %v923_v7 = vpop.f32.mrf.mxu1 }
 0x274   : > { %v871_v8 = vpop.f32.mrf.mxu0 }
 0x275   : > { %v1803_v9 = vadd.f32 %v923_v7, %v871_v8  ;;  %v1447_v11 = vpop.f32.mrf.mxu1 }
 0x276   : > { %v1441_v12 = vpop.f32.mrf.mxu0 }
 0x277   : > { %v926_v13 = vpop.f32.mrf.mxu1 }
 0x278   : > { %v874_v14 = vpop.f32.mrf.mxu0 }
 0x279   : > { %v1805_v15 = vadd.f32 %v926_v13, %v874_v14  ;;  %v1448_v16 = vpop.f32.mrf.mxu1 }
 0x27a   : > { %v1442_v17 = vpop.f32.mrf.mxu0 }
 0x27b   : > { %v1016_v18 = vpop.f32.mrf.mxu1 }
 0x27c   : > { %v971_v19 = vpop.f32.mrf.mxu0  ;;  %v1017_v22 = vadd.f32 %v1767_v20, %v1016_v18 }
 0x27d   : > { %v972_v21 = vadd.f32 %v1767_v20, %v971_v19  ;;  %v1459_v23 = vpop.f32.mrf.mxu1 }
 0x27e   : > { %v1453_v10 = vpop.f32.mrf.mxu0  ;;  %v1029_v29 = vsel %vm776_vm1, %v1017_v22, -inf }
 0x27f   : > { %v1019_v24 = vpop.f32.mrf.mxu1  ;;  %v1023_v25 = vsel %vm776_vm1, %v972_v21, -inf }
 0x280   : > { %1024 = vmax.xlane.f32.xlu0 %v1023_v25  ;;  %v974_v26 = vpop.f32.mrf.mxu0  ;;  %v1020_v31 = vadd.f32 %v1767_v20, %v1019_v24 }
 0x281   : > { %v975_v27 = vadd.f32 %v1767_v20, %v974_v26  ;;  %v1460_v28 = vpop.f32.mrf.mxu1  ;;  %v1525_v20 = vld [vmem:[%s574_s11 + $0x4] ss:$8 sps:$4 sm:$0x1f]  }
 0x282   : > { %v1454_v30 = vpop.f32.mrf.mxu0  ;;  %v1032_v34 = vsel %vm780_vm2, %v1020_v31, -inf  ;;  %v1074_v38 = vand.u32 %v1525_v20, %v1781_v41 }
 0x283   : > { %v1026_v32 = vsel %vm780_vm2, %v975_v27, -inf }
 0x284   : > { %1030 = vmax.xlane.f32.xlu0 %v1029_v29  ;;  %1027 = vmax.xlane.f32.xlu1 %v1026_v32 }
 0x285   : > { %1462 = vmatpush3.bf16.msra.mxu0 %v1074_v38 }
 0x288   : > { %808 = vadd.xlane.f32.xlu0 %v807_v33  ;;  %1033 = vmax.xlane.f32.xlu1 %v1032_v34 }
 0x28c   : > { %805 = vadd.xlane.f32.xlu0 %v804_v35  ;;  %814 = vadd.xlane.f32.xlu1 %v813_v36 }
 0x290   : > { %811 = vadd.xlane.f32.xlu1 %v810_v37 }
 0x309   : > { %v1025_v42 = vpop.xlane.xlu0 %1024 }
 0x30d   : > { %v1031_v43 = vpop.xlane.xlu0 %1030  ;;  %v1028_v44 = vpop.xlane.xlu1 %1027 }
 0x30e   : > { %v1035_v45 = vmax.f32 %v1025_v42, %v1031_v43 }
 0x310   : > { %v1037_v46 = vsub.f32 %v972_v21, %v1035_v45  ;;  %v1043_v47 = vsub.f32 %v1017_v22, %v1035_v45 }
 0x311   : > { %v1034_v48 = vpop.xlane.xlu1 %1033  ;;  %v809_v1 = vpop.xlane.xlu0 %808 }
 0x312   : > { %v1039_v49 = vmul.f32 1.442695, %v1037_v46  ;;  %v1036_v50 = vmax.f32 %v1028_v44, %v1034_v48  ;;  %v1045_v51 = vmul.f32 1.442695, %v1043_v47 }
 0x314   : > { %v1038_v52 = vsub.f32 %v975_v27, %v1036_v50  ;;  %v1044_v53 = vsub.f32 %v1020_v31, %v1036_v50  ;;  %1537 = vpow2.f32 %v1039_v49 }
 0x315   : > { %1539 = vpow2.f32 %v1045_v51  ;;  %v815_v2 = vpop.xlane.xlu1 %814  ;;  %v806_v3 = vpop.xlane.xlu0 %805 }
 0x316   : > { %v1041_v54 = vmul.f32 1.442695, %v1038_v52  ;;  %v1047_v55 = vmul.f32 1.442695, %v1044_v53  ;;  %v817_v13 = vadd.f32 %v815_v2, %v809_v1 }
 0x318   : > { %1541 = vpow2.f32 %v1041_v54 }
 0x319   : > { %1543 = vpow2.f32 %v1047_v55  ;;  %v812_v4 = vpop.xlane.xlu1 %811 }
 0x31a   : > { %v816_v11 = vadd.f32 %v812_v4, %v806_v3 }
 0x31c   : > { %1545 = vrcp.f32 %v816_v11 }
 0x321   : > { %v1538_v41 = vpop.eup %1537 }
 0x322   : > { %v1540_v56 = vpop.eup %1539  ;;  %v1049_v63 = vsel %vm776_vm1, %v1538_v41, 0.0 }
 0x323   : > { %v1055_v0 = vsel %vm776_vm1, %v1540_v56, 0.0 }
 0x325   : > { %v1542_v57 = vpop.eup %1541 }
 0x326   : > { %v1544_v58 = vpop.eup %1543  ;;  %v1052_v59 = vsel %vm780_vm2, %v1542_v57, 0.0  ;;  %v1065_v60 = vpack.c.bf16 %v1542_v57, %v1538_v41 }
 0x327   : > { %v1058_v61 = vsel %vm780_vm2, %v1544_v58, 0.0  ;;  %1053 = vadd.xlane.f32.xlu0 %v1052_v59  ;;  %v1066_v62 = vpack.c.bf16 %v1544_v58, %v1540_v56 }
 0x328   : > { %1059 = vadd.xlane.f32.xlu1 %v1058_v61  ;;  %1470 = vmatmul.mubr.msk.bf16.vlgmr.msra.gmra.mxu1 %vm776_vm1, %v1065_v60 }
 0x329   : > { %1464 = vmatmul.mubr.msk.bf16.vlgmr.msra.gmra.mxu0 %vm776_vm1, %v1066_v62  ;;  %v1546_v17 = vpop.eup %1545 }
 0x32a   : > { %v930_v10 = vmul.f32 %v1546_v17, %v1803_v9  ;;  %v1188_v9 = vld [vmem:[%s653_s16 + $0x8] sm:$0x11] }
 0x32b   : > { %1050 = vadd.xlane.f32.xlu0 %v1049_v63 }
 0x32c   : > { %1056 = vadd.xlane.f32.xlu1 %v1055_v0 }
 0x3b0   : > { %v1054_v5 = vpop.xlane.xlu0 %1053 }
 0x3b1   : > { %v1060_v6 = vpop.xlane.xlu1 %1059 }
 0x3b2   : > { %v1062_v14 = vadd.f32 %v1060_v6, %v1054_v5 }
 0x3b4   : > { %v1051_v7 = vpop.xlane.xlu0 %1050 }
 0x3b5   : > { %v1057_v8 = vpop.xlane.xlu1 %1056 }
 0x3b6   : > { %v1061_v12 = vadd.f32 %v1057_v8, %v1051_v7 }
 0x3b8   : > { %1547 = vrcp.f32 %v1061_v12 }
 0x3b9   : > { %1549 = vrcp.f32 %v817_v13 }
 0x3ba   : > { %1551 = vrcp.f32 %v1062_v14 }
 0x3c5   : > { %v1548_v22 = vpop.eup %1547 }
 0x3c6   : > { %v1550_v26 = vpop.eup %1549 }
 0x3c7   : > { %v1552_v31 = vpop.eup %1551  ;;  %v931_v33 = vmul.f32 %v1550_v26, %v1805_v15 }
 0x3e8   : > { %v1160_v16 = vpop.f32.mrf.mxu1 }
 0x3e9   : > { %v1110_v18 = vpop.f32.mrf.mxu0 }
 0x3ea   : > { %v1161_v19 = vadd.f32 %v1160_v16, %v1110_v18  ;;  %v1471_v21 = vpop.f32.mrf.mxu1 }
 0x3eb   : > { %v1465_v23 = vpop.f32.mrf.mxu0 }
 0x3ec   : > { %v1167_v24 = vmul.f32 %v1548_v22, %v1161_v19  ;;  %v1163_v25 = vpop.f32.mrf.mxu1 }
 0x3ed   : > { %v1113_v27 = vpop.f32.mrf.mxu0 }
 0x3ee   : > { %v1407_v28 = vpack.c.bf16 %v1167_v24, %v930_v10  ;;  %v1164_v29 = vadd.f32 %v1163_v25, %v1113_v27  ;;  %v1472_v30 = vpop.f32.mrf.mxu1 }
 0x3ef   : > { %v1466_v32 = vpop.f32.mrf.mxu0 }
 0x3f0   : > { %1180 = vst [vmem:[%s653_s16] sm:$0xff] %v1407_v28  ;;  %v1168_v34 = vmul.f32 %v1552_v31, %v1164_v29 }
 0x3f2   : > { %v1408_v35 = vpack.c.bf16 %v1168_v34, %v931_v33 }
 0x3f4   : > { %v1189_v36 = vsel %vm1187_vm11, %v1408_v35, %v1188_v9 }
 0x3f5   : > { %1190 = vst [vmem:[%s653_s16 + $0x8] sm:$0x11] %v1189_v36 }
 0x3f6 PF: > { %p13_p2 = scmp.ge.s32.totalorder %s1658_s27, 6   ;;  %s1862_s21 = smov %s1579_s22 }
 0x3f7   : > { %s1863_s22 = smov %s1690_s30  ;;  %s1864_s23 = smov %s1587_s24 }
 0x3f8   : > { %s1865_s24 = smov %s1668_s7  ;;  %s1866_s25 = smov %s1658_s27 }
 0x3f9   :  { %15 = sbr.rel (!%p13_p2) target bundleno = 3 (0x3), region = 304 }

// kernel: mdm_simetric_forward.22
= control target key start
LH: loop header
LB: loop body
LE: loop exit
PB: predicated region body
PF: predicated region fallthrough
CT: control target
= control target key end

     0   :  { %s1346_s12 = smov 0   ;;  %s1348_s13 = smov 0   ;;  %s1613_s0 = inlined_call_operand.vmem [shape: bf16[40,256], index: 0, kind: input, shape index: {}]   ;;  %s1614_s1 = inlined_call_operand.vmem [shape: bf16[256,512], index: 1, kind: input, shape index: {}]   ;;  %s1615_s2 = inlined_call_operand.vmem [shape: f32[1,512], index: 2, kind: input, shape index: {}]   ;;  %s1616_s3 = inlined_call_operand.vmem [shape: bf16[40,512], index: 3, kind: output, shape index: {}]  }
   0x1   :  { %s1350_s14 = smov 0   ;;  %s1352_s15 = smov 0  }
   0x2   :  { %s1354_s16 = smov 0  }
   0x3 LB: > { %s28_s17 = sadd.s32 1, %s1320_s15  ;;  %s1072_s18 = sadd.s32 4294967295, %s1324_s16   ;;  %s1324_s16 = sphi %s1354_s16, %s13_s16   ;;  %s1320_s15 = sphi %s1352_s15, %s1621_s15   ;;  %s1316_s14 = sphi %s1350_s14, %s1620_s14   ;;  %s1312_s13 = sphi %s1348_s13, %s1619_s13   ;;  %s1308_s12 = sphi %s1346_s12, %s1618_s12  }
   0x4   : > { %p30_p0 = scmp.ge.s32.totalorder %s28_s17, 2  ;;  %p76_p1 = scmp.ne.s32.totalorder %s1312_s13, %s1308_s12 }
   0x5   : > { %p77_p2 = scmp.eq.s32.totalorder %s1324_s16, 0  ;;  %p134_p4 = scmp.eq.s32.totalorder %s1072_s18, 1 }
   0x6   : > { %s1623_s17 = smov (%p30_p0, %s28_s17), 0  ;;  %s69_s20 = sadd.s32 1, %s1312_s13 }
   0x7   : > { %p78_p3 = por %p77_p2, %p76_p1  ;;  %s65_s19 = ssub.s32 %s1320_s15, %s1623_s17 }
   0x8   : > { %p67_p5 = scmp.eq.s32.totalorder %s65_s19, 0  ;;  %p1381_p6 = por %p134_p4, %p76_p1 }
   0x9   : > { %p1076_p7 = scmp.ge.s32.totalorder %s1324_s16, 2 }
   0xa   : > { %s1386_s22 = scalar_select %p67_p5, %s1312_s13, %s69_s20  }
   0xb   : > { %171 = sbr.rel (%p1076_p7) target bundleno = 36 (0x24), region = 20 }
  0x10   : > { %174 = sbr.rel (!%p78_p3) target bundleno = 36 (0x24), region = 24  ;;  %s176_s23 = sand.u32 (%p78_p3), 1, %s1312_s13  }
  0x11   : > { %s1130_s24 = sshll.u32 (%p78_p3), %s1320_s15, 3  ;;  %s1077_s25 = sshll.u32 (%p78_p3), %s176_s23, 8 }
  0x12   : > { %s1394_s28 = scalar_lea.vmem (%p78_p3), %s1614_s1, %s1130_s24  ;;  %s1399_s29 = scalar_lea.vmem (%p78_p3), [#allocation3], %s1077_s25 }
  0x13   : > { %v275_v0 = vld [vmem:[%s1394_s28] sm:$0xff] (%p78_p3)  ;;  %v277_v1 = vld [vmem:[%s1394_s28 + $0x10] sm:$0xff] (%p78_p3) }
  0x14   : > { %v279_v2 = vld [vmem:[%s1394_s28 + $0x20] sm:$0xff] (%p78_p3)  ;;  %276 = vst [vmem:[%s1399_s29] sm:$0xff] (%p78_p3), %v275_v0  ;;  %278 = vst [vmem:[%s1399_s29 + $0x8] sm:$0xff] (%p78_p3), %v277_v1  ;;  %v281_v3 = vld [vmem:[%s1394_s28 + $0x30] sm:$0xff] (%p78_p3) }
  0x15   : > { %280 = vst [vmem:[%s1399_s29 + $0x10] sm:$0xff] %v279_v2  ;;  %v283_v4 = vld [vmem:[%s1394_s28 + $0x40] sm:$0xff]  ;;  %v285_v5 = vld [vmem:[%s1394_s28 + $0x50] sm:$0xff]  ;;  %282 = vst [vmem:[%s1399_s29 + $0x18] sm:$0xff] %v281_v3 }
  0x16   : > { %284 = vst [vmem:[%s1399_s29 + $0x20] sm:$0xff] %v283_v4  ;;  %286 = vst [vmem:[%s1399_s29 + $0x28] sm:$0xff] %v285_v5  ;;  %v287_v6 = vld [vmem:[%s1394_s28 + $0x60] sm:$0xff]  ;;  %v289_v7 = vld [vmem:[%s1394_s28 + $0x70] sm:$0xff] }
  0x17   : > { %v291_v8 = vld [vmem:[%s1394_s28 + $0x80] sm:$0xff]  ;;  %288 = vst [vmem:[%s1399_s29 + $0x30] sm:$0xff] %v287_v6  ;;  %290 = vst [vmem:[%s1399_s29 + $0x38] sm:$0xff] %v289_v7  ;;  %v293_v9 = vld [vmem:[%s1394_s28 + $0x90] sm:$0xff] }
  0x18   : > { %292 = vst [vmem:[%s1399_s29 + $0x40] sm:$0xff] %v291_v8  ;;  %v295_v10 = vld [vmem:[%s1394_s28 + $0xa0] sm:$0xff]  ;;  %v297_v11 = vld [vmem:[%s1394_s28 + $0xb0] sm:$0xff]  ;;  %294 = vst [vmem:[%s1399_s29 + $0x48] sm:$0xff] %v293_v9 }
  0x19   : > { %296 = vst [vmem:[%s1399_s29 + $0x50] sm:$0xff] %v295_v10  ;;  %298 = vst [vmem:[%s1399_s29 + $0x58] sm:$0xff] %v297_v11  ;;  %v299_v12 = vld [vmem:[%s1394_s28 + $0xc0] sm:$0xff]  ;;  %v301_v13 = vld [vmem:[%s1394_s28 + $0xd0] sm:$0xff] }
  0x1a   : > { %v303_v14 = vld [vmem:[%s1394_s28 + $0xe0] sm:$0xff]  ;;  %300 = vst [vmem:[%s1399_s29 + $0x60] sm:$0xff] %v299_v12  ;;  %302 = vst [vmem:[%s1399_s29 + $0x68] sm:$0xff] %v301_v13  ;;  %v305_v15 = vld [vmem:[%s1394_s28 + $0xf0] sm:$0xff] }
  0x1b   : > { %304 = vst [vmem:[%s1399_s29 + $0x70] sm:$0xff] %v303_v14  ;;  %v307_v16 = vld [vmem:[%s1394_s28 + $0x100] sm:$0xff]  ;;  %v309_v17 = vld [vmem:[%s1394_s28 + $0x110] sm:$0xff]  ;;  %306 = vst [vmem:[%s1399_s29 + $0x78] sm:$0xff] %v305_v15 }
  0x1c   : > { %308 = vst [vmem:[%s1399_s29 + $0x80] sm:$0xff] %v307_v16  ;;  %310 = vst [vmem:[%s1399_s29 + $0x88] sm:$0xff] %v309_v17  ;;  %v311_v18 = vld [vmem:[%s1394_s28 + $0x120] sm:$0xff]  ;;  %v313_v19 = vld [vmem:[%s1394_s28 + $0x130] sm:$0xff] }
  0x1d   : > { %v315_v20 = vld [vmem:[%s1394_s28 + $0x140] sm:$0xff]  ;;  %312 = vst [vmem:[%s1399_s29 + $0x90] sm:$0xff] %v311_v18  ;;  %314 = vst [vmem:[%s1399_s29 + $0x98] sm:$0xff] %v313_v19  ;;  %v317_v21 = vld [vmem:[%s1394_s28 + $0x150] sm:$0xff] }
  0x1e   : > { %316 = vst [vmem:[%s1399_s29 + $0xa0] sm:$0xff] %v315_v20  ;;  %v319_v22 = vld [vmem:[%s1394_s28 + $0x160] sm:$0xff]  ;;  %v321_v23 = vld [vmem:[%s1394_s28 + $0x170] sm:$0xff]  ;;  %318 = vst [vmem:[%s1399_s29 + $0xa8] sm:$0xff] %v317_v21 }
  0x1f   : > { %320 = vst [vmem:[%s1399_s29 + $0xb0] sm:$0xff] %v319_v22  ;;  %322 = vst [vmem:[%s1399_s29 + $0xb8] sm:$0xff] %v321_v23  ;;  %v323_v24 = vld [vmem:[%s1394_s28 + $0x180] sm:$0xff]  ;;  %v325_v25 = vld [vmem:[%s1394_s28 + $0x190] sm:$0xff] }
  0x20   : > { %v327_v26 = vld [vmem:[%s1394_s28 + $0x1a0] sm:$0xff]  ;;  %324 = vst [vmem:[%s1399_s29 + $0xc0] sm:$0xff] %v323_v24  ;;  %326 = vst [vmem:[%s1399_s29 + $0xc8] sm:$0xff] %v325_v25  ;;  %v329_v27 = vld [vmem:[%s1394_s28 + $0x1b0] sm:$0xff] }
  0x21   : > { %328 = vst [vmem:[%s1399_s29 + $0xd0] sm:$0xff] %v327_v26  ;;  %v331_v28 = vld [vmem:[%s1394_s28 + $0x1c0] sm:$0xff]  ;;  %v333_v29 = vld [vmem:[%s1394_s28 + $0x1d0] sm:$0xff]  ;;  %330 = vst [vmem:[%s1399_s29 + $0xd8] sm:$0xff] %v329_v27 }
  0x22   : > { %332 = vst [vmem:[%s1399_s29 + $0xe0] sm:$0xff] %v331_v28  ;;  %334 = vst [vmem:[%s1399_s29 + $0xe8] sm:$0xff] %v333_v29  ;;  %v335_v30 = vld [vmem:[%s1394_s28 + $0x1e0] sm:$0xff]  ;;  %v337_v31 = vld [vmem:[%s1394_s28 + $0x1f0] sm:$0xff] }
  0x23   : > { %336 = vst [vmem:[%s1399_s29 + $0xf0] sm:$0xff] %v335_v30  ;;  %338 = vst [vmem:[%s1399_s29 + $0xf8] sm:$0xff] %v337_v31 }
  0x24 PF: > { %p1080_p8 = scmp.ge.s32.totalorder %s1324_s16, 1  ;;  %p351_p9 = scmp.lt.s32.totalorder %s1324_s16, 3 }
  0x26   : > { %p352_p10 = pnand %p1080_p8, %p351_p9 }
  0x27   : > { %s358_s30 = sand.u32 (!%p352_p10), 1, %s1308_s12   ;;  %s1082_s24 = sshll.u32 (!%p352_p10), %s1316_s14, 1 }
  0x28   : > { %355 = sbr.rel (%p352_p10) target bundleno = 361 (0x169), region = 66  ;;  %s1081_s4 = sshll.u32 (!%p352_p10), %s358_s30, 8 }
  0x29   : > { %s1473_s9 = scalar_lea.vmem (!%p352_p10), [#allocation3], %s1081_s4  ;;  %p409_p11 = scmp.lt.s32.totalorder (!%p352_p10), %s1082_s24, 3 }
  0x2a   : > { %s1169_s28 = smul.u32 (!%p352_p10), 40, %s358_s30 }
  0x2c   : > { %s393_s12 = scalar_lea.vmem (!%p352_p10), [#allocation4], %s1169_s28 }
  0x2d   : > { %v1260_v32 = vld [vmem:[%s1613_s0 + $0x4] ss:$8 sps:$4 sm:$0xff]   ;;  %v1263_v33 = vld [vmem:[%s1613_s0 + $0x14] ss:$8 sps:$4 sm:$0xff]   ;;  %v1212_v35 = vld [vmem:[%s1473_s9 + $0x70] ss:$8 sps:$4 sm:$0xff]   ;;  %v759_v7 = vlaneseq }
  0x2e   : > { %v1210_v34 = vld [vmem:[%s1473_s9 + $0x74] ss:$8 sps:$4 sm:$0xff]   ;;  %695 = vmatprep.mubr.bf16.mxu0 %v1260_v32  ;;  %705 = vmatprep.mubr.bf16.mxu1 %v1263_v33  ;;  %v1213_v36 = vld [vmem:[%s1473_s9 + $0x64] ss:$8 sps:$4 sm:$0xff]   ;;  %v1215_v37 = vld [vmem:[%s1473_s9 + $0x60] ss:$8 sps:$4 sm:$0xff]  }
  0x2f   : > { %663 = vmatprep.subr.bf16.mxu0 %v1210_v34  ;;  %1137 = vmatprep.subr.bf16.mxu1 %v1210_v34  ;;  %v1216_v38 = vld [vmem:[%s1473_s9 + $0x54] ss:$8 sps:$4 sm:$0xff]   ;;  %v1218_v39 = vld [vmem:[%s1473_s9 + $0x50] ss:$8 sps:$4 sm:$0xff]   ;;  %v1219_v40 = vld [vmem:[%s1473_s9 + $0x44] ss:$8 sps:$4 sm:$0xff]  }
  0x30   : > { %664 = vmatpush1.bf16.msra.mxu0 %v1212_v35  ;;  %1153 = vmatpush1.bf16.msra.mxu1 %v1212_v35  ;;  %v1221_v41 = vld [vmem:[%s1473_s9 + $0x40] ss:$8 sps:$4 sm:$0xff]   ;;  %v1222_v42 = vld [vmem:[%s1473_s9 + $0x34] ss:$8 sps:$4 sm:$0xff]   ;;  %v1224_v43 = vld [vmem:[%s1473_s9 + $0x30] ss:$8 sps:$4 sm:$0xff]  }
  0x31   : > { %665 = vmatprep.subr.bf16.mxu0 %v1213_v36  ;;  %1138 = vmatprep.subr.bf16.mxu1 %v1213_v36  ;;  %v1225_v44 = vld [vmem:[%s1473_s9 + $0x24] ss:$8 sps:$4 sm:$0xff]   ;;  %v1227_v45 = vld [vmem:[%s1473_s9 + $0x20] ss:$8 sps:$4 sm:$0xff]   ;;  %v1228_v46 = vld [vmem:[%s1473_s9 + $0x14] ss:$8 sps:$4 sm:$0xff]  }
  0x32   : > { %v1230_v47 = vld [vmem:[%s1473_s9 + $0x10] ss:$8 sps:$4 sm:$0xff]   ;;  %v1231_v48 = vld [vmem:[%s1473_s9 + $0x4] ss:$8 sps:$4 sm:$0xff]   ;;  %v1233_v49 = vld [vmem:[%s1473_s9] ss:$8 sps:$4 sm:$0xff]  }
  0x33   : > { %v1234_v50 = vld [vmem:[%s1473_s9 + $0xf4] ss:$8 sps:$4 sm:$0xff]   ;;  %v1236_v51 = vld [vmem:[%s1473_s9 + $0xf0] ss:$8 sps:$4 sm:$0xff]   ;;  %v1237_v52 = vld [vmem:[%s1473_s9 + $0xe4] ss:$8 sps:$4 sm:$0xff]  }
  0x34   : > { %666 = vmatpush1.bf16.msra.mxu0 %v1215_v37  ;;  %1154 = vmatpush1.bf16.msra.mxu1 %v1215_v37  ;;  %v1239_v53 = vld [vmem:[%s1473_s9 + $0xe0] ss:$8 sps:$4 sm:$0xff]   ;;  %v1240_v54 = vld [vmem:[%s1473_s9 + $0xd4] ss:$8 sps:$4 sm:$0xff]   ;;  %v1242_v55 = vld [vmem:[%s1473_s9 + $0xd0] ss:$8 sps:$4 sm:$0xff]  }
  0x35   : > { %667 = vmatprep.subr.bf16.mxu0 %v1216_v38  ;;  %1139 = vmatprep.subr.bf16.mxu1 %v1216_v38  ;;  %v1243_v56 = vld [vmem:[%s1473_s9 + $0xc4] ss:$8 sps:$4 sm:$0xff]   ;;  %v1245_v57 = vld [vmem:[%s1473_s9 + $0xc0] ss:$8 sps:$4 sm:$0xff]   ;;  %v1246_v58 = vld [vmem:[%s1473_s9 + $0xb4] ss:$8 sps:$4 sm:$0xff]  }
  0x36   : > { %v1248_v59 = vld [vmem:[%s1473_s9 + $0xb0] ss:$8 sps:$4 sm:$0xff]   ;;  %v1249_v60 = vld [vmem:[%s1473_s9 + $0xa4] ss:$8 sps:$4 sm:$0xff]   ;;  %v1251_v61 = vld [vmem:[%s1473_s9 + $0xa0] ss:$8 sps:$4 sm:$0xff]  }
  0x37   : > { %v1252_v62 = vld [vmem:[%s1473_s9 + $0x94] ss:$8 sps:$4 sm:$0xff]   ;;  %v1254_v63 = vld [vmem:[%s1473_s9 + $0x90] ss:$8 sps:$4 sm:$0xff]   ;;  %v1255_v0 = vld [vmem:[%s1473_s9 + $0x84] ss:$8 sps:$4 sm:$0xff]  }
  0x38   : > { %668 = vmatpush1.bf16.msra.mxu0 %v1218_v39  ;;  %1155 = vmatpush1.bf16.msra.mxu1 %v1218_v39  ;;  %v1257_v1 = vld [vmem:[%s1473_s9 + $0x80] ss:$8 sps:$4 sm:$0xff]   ;;  %v1261_v4 = vld [vmem:[%s1613_s0 + $0x10] ss:$8 sps:$4 sm:$0xff]   ;;  %s1625_s24 = smov (!%p409_p11, %s1082_s24), 3  ;;  %v760_v8 = vshrl.u32 %v759_v7, 7 }
  0x39   : > { %669 = vmatprep.subr.bf16.mxu0 %v1219_v40  ;;  %1140 = vmatprep.subr.bf16.mxu1 %v1219_v40  ;;  %v443_v2 = vld [vmem:[%s1613_s0 + $0x20] sm:$0xff]  ;;  %s411_s27 = scalar_lea.vmem %s1615_s2, %s1625_s24  ;;  %s1136_s29 = sshll.u32 (%p1381_p6), %s1316_s14, 3 }
  0x3a   : > { %v1258_v3 = vld [vmem:[%s1613_s0] ss:$8 sps:$4 sm:$0xff]   ;;  %v1088_v5 = vcombine.high %v443_v2, %v443_v2  ;;  %v1087_v6 = vcombine.low %v443_v2, %v443_v2  ;;  %v761_v9 = vsub.s32 0, %v760_v8  ;;  %v765_v11 = vsub.s32 1, %v760_v8  ;;  %s918_s5 = scalar_lea.vmem (%p1381_p6), %s1616_s3, %s1136_s29 }
  0x3b   : > { %v757_v10 = vld [vmem:[%s411_s27] sm:$0x3] }
  0x3c   : > { %670 = vmatpush1.bf16.msra.mxu0 %v1221_v41  ;;  %1156 = vmatpush1.bf16.msra.mxu1 %v1221_v41  ;;  %v762_v12 = vrot.slane %v757_v10, %v761_v9  ;;  %v766_v13 = vrot.slane %v757_v10, %v765_v11 }
  0x3d   : > { %671 = vmatprep.subr.bf16.mxu0 %v1222_v42  ;;  %1141 = vmatprep.subr.bf16.mxu1 %v1222_v42 }
  0x40   : > { %672 = vmatpush1.bf16.msra.mxu0 %v1224_v43  ;;  %1157 = vmatpush1.bf16.msra.mxu1 %v1224_v43 }
  0x41   : > { %673 = vmatprep.subr.bf16.mxu0 %v1225_v44  ;;  %1142 = vmatprep.subr.bf16.mxu1 %v1225_v44 }
  0x44   : > { %674 = vmatpush1.bf16.msra.mxu0 %v1227_v45  ;;  %1158 = vmatpush1.bf16.msra.mxu1 %v1227_v45 }
  0x45   : > { %675 = vmatprep.subr.bf16.mxu0 %v1228_v46  ;;  %1143 = vmatprep.subr.bf16.mxu1 %v1228_v46 }
  0x48   : > { %676 = vmatpush1.bf16.msra.mxu0 %v1230_v47  ;;  %1159 = vmatpush1.bf16.msra.mxu1 %v1230_v47 }
  0x49   : > { %677 = vmatprep.subr.bf16.mxu0 %v1231_v48  ;;  %1144 = vmatprep.subr.bf16.mxu1 %v1231_v48 }
  0x4c   : > { %678 = vmatpush1.bf16.msra.mxu0 %v1233_v49  ;;  %1160 = vmatpush1.bf16.msra.mxu1 %v1233_v49 }
  0x4d   : > { %679 = vmatprep.subr.bf16.mxu0 %v1234_v50  ;;  %1145 = vmatprep.subr.bf16.mxu1 %v1234_v50 }
  0x50   : > { %680 = vmatpush2.bf16.msra.mxu0 %v1236_v51  ;;  %1161 = vmatpush2.bf16.msra.mxu1 %v1236_v51 }
  0x51   : > { %681 = vmatprep.subr.bf16.mxu0 %v1237_v52  ;;  %1146 = vmatprep.subr.bf16.mxu1 %v1237_v52 }
  0x54   : > { %682 = vmatpush2.bf16.msra.mxu0 %v1239_v53  ;;  %1162 = vmatpush2.bf16.msra.mxu1 %v1239_v53 }
  0x55   : > { %683 = vmatprep.subr.bf16.mxu0 %v1240_v54  ;;  %1147 = vmatprep.subr.bf16.mxu1 %v1240_v54 }
  0x58   : > { %684 = vmatpush2.bf16.msra.mxu0 %v1242_v55  ;;  %1163 = vmatpush2.bf16.msra.mxu1 %v1242_v55 }
  0x59   : > { %685 = vmatprep.subr.bf16.mxu0 %v1243_v56  ;;  %1148 = vmatprep.subr.bf16.mxu1 %v1243_v56 }
  0x5c   : > { %686 = vmatpush2.bf16.msra.mxu0 %v1245_v57  ;;  %1164 = vmatpush2.bf16.msra.mxu1 %v1245_v57 }
  0x5d   : > { %687 = vmatprep.subr.bf16.mxu0 %v1246_v58  ;;  %1149 = vmatprep.subr.bf16.mxu1 %v1246_v58 }
  0x60   : > { %688 = vmatpush2.bf16.msra.mxu0 %v1248_v59  ;;  %1165 = vmatpush2.bf16.msra.mxu1 %v1248_v59 }
  0x61   : > { %689 = vmatprep.subr.bf16.mxu0 %v1249_v60  ;;  %1150 = vmatprep.subr.bf16.mxu1 %v1249_v60 }
  0x64   : > { %690 = vmatpush2.bf16.msra.mxu0 %v1251_v61  ;;  %1166 = vmatpush2.bf16.msra.mxu1 %v1251_v61 }
  0x65   : > { %691 = vmatprep.subr.bf16.mxu0 %v1252_v62  ;;  %1151 = vmatprep.subr.bf16.mxu1 %v1252_v62 }
  0x68   : > { %692 = vmatpush2.bf16.msra.mxu0 %v1254_v63  ;;  %1167 = vmatpush2.bf16.msra.mxu1 %v1254_v63 }
  0x69   : > { %693 = vmatprep.subr.bf16.mxu0 %v1255_v0  ;;  %1152 = vmatprep.subr.bf16.mxu1 %v1255_v0 }
  0x6c   : > { %694 = vmatpush2.bf16.msra.mxu0 %v1257_v1  ;;  %1168 = vmatpush2.bf16.msra.mxu1 %v1257_v1 }
  0x6f   : > { %696 = vmatmul.mubr.bf16.vlgmr.msra.gmra.mxu0 %v1258_v3  ;;  %706 = vmatmul.mubr.bf16.vlgmr.msra.gmra.mxu1 %v1261_v4 }
  0x70   : > { %715 = vmatprep.mubr.bf16.mxu1 %v1088_v5 }
  0x77   : > { %716 = vmatmul.mubr.bf16.gmra.mxu1 %v1087_v6 }
 0x12f   : > { %v697_v14 = vpop.f32.mrf.mxu0  ;;  %v707_v15 = vpop.f32.mrf.mxu1 }
 0x130   : > { %v1520_v16 = vadd.f32 %v762_v12, %v697_v14  ;;  %v1522_v17 = vadd.f32 %v762_v12, %v707_v15 }
 0x131   : > { %v699_v18 = vpop.f32.mrf.mxu0  ;;  %v709_v19 = vpop.f32.mrf.mxu1 }
 0x132   : > { %v779_v20 = vmul.f32 %v1520_v16, %v1520_v16  ;;  %v783_v21 = vmul.f32 %v1522_v17, %v1522_v17  ;;  %v1528_v22 = vadd.f32 %v766_v13, %v699_v18  ;;  %v1530_v23 = vadd.f32 %v766_v13, %v709_v19 }
 0x133   : > { %v701_v24 = vpop.f32.mrf.mxu0  ;;  %v711_v25 = vpop.f32.mrf.mxu1 }
 0x134   : > { %v789_v26 = vmul.f32 %v779_v20, %v1520_v16  ;;  %v793_v27 = vmul.f32 %v783_v21, %v1522_v17  ;;  %v780_v28 = vmul.f32 %v1528_v22, %v1528_v22  ;;  %v784_v29 = vmul.f32 %v1530_v23, %v1530_v23 }
 0x135   : > { %v1538_v30 = vadd.f32 %v762_v12, %v701_v24  ;;  %v1540_v31 = vadd.f32 %v762_v12, %v711_v25  ;;  %v703_v32 = vpop.f32.mrf.mxu0  ;;  %v713_v33 = vpop.f32.mrf.mxu1 }
 0x136   : > { %v799_v34 = vmul.f32 0.044715, %v789_v26  ;;  %v803_v35 = vmul.f32 0.044715, %v793_v27  ;;  %v790_v36 = vmul.f32 %v780_v28, %v1528_v22  ;;  %v794_v37 = vmul.f32 %v784_v29, %v1530_v23 }
 0x137   : > { %v781_v38 = vmul.f32 %v1538_v30, %v1538_v30  ;;  %v785_v39 = vmul.f32 %v1540_v31, %v1540_v31  ;;  %v1548_v40 = vadd.f32 %v766_v13, %v703_v32  ;;  %v1550_v41 = vadd.f32 %v766_v13, %v713_v33  ;;  %v717_v42 = vpop.f32.mrf.mxu1 }
 0x138   : > { %v809_v43 = vadd.f32 %v799_v34, %v1520_v16  ;;  %v813_v44 = vadd.f32 %v803_v35, %v1522_v17  ;;  %v800_v45 = vmul.f32 0.044715, %v790_v36  ;;  %v804_v46 = vmul.f32 0.044715, %v794_v37 }
 0x139   : > { %v791_v47 = vmul.f32 %v781_v38, %v1538_v30  ;;  %v795_v48 = vmul.f32 %v785_v39, %v1540_v31  ;;  %v782_v49 = vmul.f32 %v1548_v40, %v1548_v40  ;;  %v786_v50 = vmul.f32 %v1550_v41, %v1550_v41  ;;  %v719_v51 = vpop.f32.mrf.mxu1 }
 0x13a   : > { %v819_v52 = vmul.f32 0.7978846, %v809_v43  ;;  %v823_v53 = vmul.f32 0.7978846, %v813_v44  ;;  %v810_v54 = vadd.f32 %v800_v45, %v1528_v22  ;;  %v814_v55 = vadd.f32 %v804_v46, %v1530_v23 }
 0x13b   : > { %v801_v56 = vmul.f32 0.044715, %v791_v47  ;;  %v805_v57 = vmul.f32 0.044715, %v795_v48  ;;  %v792_v58 = vmul.f32 %v782_v49, %v1548_v40  ;;  %v796_v59 = vmul.f32 %v786_v50, %v1550_v41  ;;  %v721_v60 = vpop.f32.mrf.mxu1 }
 0x13c   : > { %1266 = vtanh.f32 %v819_v52  ;;  %v820_v61 = vmul.f32 0.7978846, %v810_v54  ;;  %v824_v62 = vmul.f32 0.7978846, %v814_v55  ;;  %v1564_v63 = vadd.f32 %v762_v12, %v717_v42 }
 0x13d   : > { %1268 = vtanh.f32 %v823_v53  ;;  %v811_v0 = vadd.f32 %v801_v56, %v1538_v30  ;;  %v815_v1 = vadd.f32 %v805_v57, %v1540_v31  ;;  %v802_v2 = vmul.f32 0.044715, %v792_v58  ;;  %v722_v3 = vpop.f32.mrf.mxu1 }
 0x13e   : > { %1270 = vtanh.f32 %v820_v61  ;;  %v806_v4 = vmul.f32 0.044715, %v796_v59  ;;  %v787_v5 = vmul.f32 %v1564_v63, %v1564_v63  ;;  %v1570_v6 = vadd.f32 %v766_v13, %v719_v51 }
 0x13f   : > { %1272 = vtanh.f32 %v824_v62  ;;  %v821_v7 = vmul.f32 0.7978846, %v811_v0  ;;  %v825_v8 = vmul.f32 0.7978846, %v815_v1  ;;  %v812_v9 = vadd.f32 %v802_v2, %v1548_v40 }
 0x140   : > { %v816_v10 = vadd.f32 %v806_v4, %v1550_v41  ;;  %v797_v11 = vmul.f32 %v787_v5, %v1564_v63  ;;  %v788_v12 = vmul.f32 %v1570_v6, %v1570_v6 }
 0x141   : > { %1274 = vtanh.f32 %v821_v7  ;;  %v822_v14 = vmul.f32 0.7978846, %v812_v9 }
 0x142   : > { %1276 = vtanh.f32 %v825_v8  ;;  %v826_v15 = vmul.f32 0.7978846, %v816_v10  ;;  %v807_v18 = vmul.f32 0.044715, %v797_v11  ;;  %v798_v13 = vmul.f32 %v788_v12, %v1570_v6 }
 0x143   : > { %1278 = vtanh.f32 %v822_v14 }
 0x144   : > { %1280 = vtanh.f32 %v826_v15  ;;  %v817_v19 = vadd.f32 %v807_v18, %v1564_v63  ;;  %v808_v20 = vmul.f32 0.044715, %v798_v13 }
 0x146   : > { %v827_v21 = vmul.f32 0.7978846, %v817_v19  ;;  %v818_v24 = vadd.f32 %v808_v20, %v1570_v6 }
 0x148   : > { %1282 = vtanh.f32 %v827_v21  ;;  %v828_v25 = vmul.f32 0.7978846, %v818_v24 }
 0x149   : > { %v1267_v26 = vpop.eup %1266 }
 0x14a   : > { %v1269_v27 = vpop.eup %1268  ;;  %v839_v28 = vadd.f32 1.0, %v1267_v26  ;;  %1284 = vtanh.f32 %v828_v25 }
 0x14b   : > { %v1271_v29 = vpop.eup %1270  ;;  %v843_v32 = vadd.f32 1.0, %v1269_v27 }
 0x14c   : > { %v1273_v33 = vpop.eup %1272  ;;  %v849_v34 = vmul.f32 0.5, %v839_v28  ;;  %v840_v35 = vadd.f32 1.0, %v1271_v29 }
 0x14d   : > { %v853_v36 = vmul.f32 0.5, %v843_v32  ;;  %v844_v37 = vadd.f32 1.0, %v1273_v33 }
 0x14e   : > { %v1275_v38 = vpop.eup %1274  ;;  %v850_v39 = vmul.f32 0.5, %v840_v35  ;;  %v859_v46 = vmul.f32 %v849_v34, %v1520_v16 }
 0x14f   : > { %v1277_v42 = vpop.eup %1276  ;;  %v854_v43 = vmul.f32 0.5, %v844_v37  ;;  %v841_v44 = vadd.f32 1.0, %v1275_v38  ;;  %v863_v50 = vmul.f32 %v853_v36, %v1522_v17 }
 0x150   : > { %v1279_v45 = vpop.eup %1278  ;;  %v860_v47 = vmul.f32 %v850_v39, %v1528_v22  ;;  %v845_v48 = vadd.f32 1.0, %v1277_v42 }
 0x151   : > { %v1281_v49 = vpop.eup %1280  ;;  %v864_v51 = vmul.f32 %v854_v43, %v1530_v23  ;;  %v851_v52 = vmul.f32 0.5, %v841_v44  ;;  %v842_v53 = vadd.f32 1.0, %v1279_v45 }
 0x152   : > { %v1131_v54 = vpack.c.bf16 %v860_v47, %v859_v46  ;;  %v855_v55 = vmul.f32 0.5, %v845_v48  ;;  %v846_v56 = vadd.f32 1.0, %v1281_v49 }
 0x153   : > { %v1133_v57 = vpack.c.bf16 %v864_v51, %v863_v50  ;;  %v852_v58 = vmul.f32 0.5, %v842_v53  ;;  %v861_v16 = vmul.f32 %v851_v52, %v1538_v30 }
 0x154   : > { %901 = vst [vmem:[%s393_s12] sm:$0xff] %v1131_v54  ;;  %v856_v59 = vmul.f32 0.5, %v846_v56  ;;  %v865_v17 = vmul.f32 %v855_v55, %v1540_v31 }
 0x155   : > { %v1283_v60 = vpop.eup %1282  ;;  %903 = vst [vmem:[%s393_s12 + $0x10] sm:$0xff] %v1133_v57  ;;  %v862_v22 = vmul.f32 %v852_v58, %v1548_v40 }
 0x156   : > { %v866_v23 = vmul.f32 %v856_v59, %v1550_v41  ;;  %v847_v61 = vadd.f32 1.0, %v1283_v60 }
 0x157   : > { %v1285_v62 = vpop.eup %1284  ;;  %v1132_v0 = vpack.c.bf16 %v862_v22, %v861_v16 }
 0x158   : > { %v1134_v1 = vpack.c.bf16 %v866_v23, %v865_v17  ;;  %v857_v2 = vmul.f32 0.5, %v847_v61  ;;  %v848_v3 = vadd.f32 1.0, %v1285_v62 }
 0x159   : > { %902 = vst [vmem:[%s393_s12 + $0x8] sm:$0xff] %v1132_v0 }
 0x15a   : > { %904 = vst [vmem:[%s393_s12 + $0x18] sm:$0xff] %v1134_v1  ;;  %v858_v4 = vmul.f32 0.5, %v848_v3  ;;  %v867_v5 = vmul.f32 %v857_v2, %v1564_v63 }
 0x15b   : > { %v955_v31 = vld [vmem:[%s393_s12] sm:$0xff] (%p1381_p6) }
 0x15c   : > { %v868_v7 = vmul.f32 %v858_v4, %v1570_v6  ;;  %912 = sbr.rel (!%p1381_p6) target bundleno = 361 (0x169), region = 82  ;;  %v959_v41 = vld [vmem:[%s393_s12 + $0x10] sm:$0xff] (%p1381_p6)  ;;  %956 = vst [vmem:[%s918_s5] sm:$0xff] (%p1381_p6), %v955_v31 }
 0x15d   : > { %960 = vst [vmem:[%s918_s5 + $0x20] sm:$0xff] (%p1381_p6), %v959_v41 }
 0x15e   : > { %v1135_v30 = vpack.c.bf16 %v868_v7, %v867_v5 }
 0x160   : > { %905 = vst [vmem:[%s393_s12 + $0x20] sm:$0xff] %v1135_v30  ;;  %v957_v40 = vld [vmem:[%s393_s12 + $0x8] sm:$0xff] (%p1381_p6) }
 0x161   : > { %v961_v8 = vld [vmem:[%s393_s12 + $0x18] sm:$0xff]  ;;  %958 = vst [vmem:[%s918_s5 + $0x10] sm:$0xff] %v957_v40 }
 0x162   : > { %962 = vst [vmem:[%s918_s5 + $0x30] sm:$0xff] %v961_v8 }
 0x167   : > { %v963_v9 = vld [vmem:[%s393_s12 + $0x20] sm:$0xff] }
 0x168   : > { %964 = vst [vmem:[%s918_s5 + $0x40] sm:$0xff] %v963_v9 }
 0x169 PF: > { %s13_s16 = sadd.s32 1, %s1324_s16   ;;  %s1618_s12 = smov %s1312_s13 }
 0x16a   : > { %p10_p12 = scmp.ge.s32.totalorder %s13_s16, 4   ;;  %s1619_s13 = smov %s1386_s22 }
 0x16b   : > { %s1620_s14 = smov %s1320_s15  ;;  %s1621_s15 = smov %s1623_s17 }
 0x16c   :  { %12 = sbr.rel (!%p10_p12) target bundleno = 3 (0x3), region = 157 }

// kernel: mdm_simetric_forward.29
= control target key start
LH: loop header
LB: loop body
LE: loop exit
PB: predicated region body
PF: predicated region fallthrough
CT: control target
= control target key end

     0   :  { %s444_s1 = inlined_call_operand.vmem [shape: bf16[256,128], index: 1, kind: input, shape index: {}]   ;;  %s445_s0 = inlined_call_operand.vmem [shape: bf16[32,256], index: 0, kind: input, shape index: {}]   ;;  %s446_s2 = inlined_call_operand.vmem [shape: f32[1,128], index: 2, kind: input, shape index: {}]   ;;  %s447_s3 = inlined_call_operand.vmem [shape: f32[32,128], index: 3, kind: output, shape index: {}]  }
   0x1   :  { %v327_v0 = vld [vmem:[%s444_s1 + $0x78] sm:$0xff]   ;;  %v329_v2 = vld [vmem:[%s444_s1 + $0x70] sm:$0xff]   ;;  %v331_v4 = vld [vmem:[%s444_s1 + $0x68] sm:$0xff]  }
   0x2   :  { %v328_v1 = vld [vmem:[%s444_s1 + $0x38] sm:$0xff]   ;;  %283 = vmatprep.subr.bf16.mxu0 %v327_v0  ;;  %311 = vmatprep.subr.bf16.mxu1 %v327_v0  ;;  %v330_v3 = vld [vmem:[%s444_s1 + $0x30] sm:$0xff]   ;;  %v332_v5 = vld [vmem:[%s444_s1 + $0x28] sm:$0xff]  }
   0x3   :  { %284 = vmatpush3.bf16.msra.mxu0 %v328_v1  ;;  %319 = vmatpush3.bf16.msra.mxu1 %v328_v1  ;;  %v333_v6 = vld [vmem:[%s444_s1 + $0x60] sm:$0xff]   ;;  %v335_v8 = vld [vmem:[%s444_s1 + $0x58] sm:$0xff]   ;;  %v337_v10 = vld [vmem:[%s444_s1 + $0x50] sm:$0xff]  }
   0x4   :  { %285 = vmatprep.subr.bf16.mxu0 %v329_v2  ;;  %312 = vmatprep.subr.bf16.mxu1 %v329_v2  ;;  %v334_v7 = vld [vmem:[%s444_s1 + $0x20] sm:$0xff]   ;;  %v336_v9 = vld [vmem:[%s444_s1 + $0x18] sm:$0xff]   ;;  %v338_v13 = vld [vmem:[%s444_s1 + $0x10] sm:$0xff]  }
   0x5   :  { %v345_v11 = vld [vmem:[%s445_s0 + $0x4] ss:$8 sps:$4 sm:$0xff]   ;;  %v348_v12 = vld [vmem:[%s445_s0 + $0x14] ss:$8 sps:$4 sm:$0xff]   ;;  %v343_v18 = vld [vmem:[%s445_s0] ss:$8 sps:$4 sm:$0xff]  }
   0x6   :  { %v339_v14 = vld [vmem:[%s444_s1 + $0x48] sm:$0xff]   ;;  %211 = vmatprep.mubr.bf16.mxu0 %v345_v11  ;;  %219 = vmatprep.mubr.bf16.mxu1 %v348_v12  ;;  %v341_v16 = vld [vmem:[%s444_s1 + $0x40] sm:$0xff]   ;;  %v346_v19 = vld [vmem:[%s445_s0 + $0x10] ss:$8 sps:$4 sm:$0xff]  }
   0x7   :  { %286 = vmatpush3.bf16.msra.mxu0 %v330_v3  ;;  %320 = vmatpush3.bf16.msra.mxu1 %v330_v3  ;;  %v340_v15 = vld [vmem:[%s444_s1 + $0x8] sm:$0xff]   ;;  %v342_v17 = vld [vmem:[%s444_s1] sm:$0xff]  }
   0x8   :  { %287 = vmatprep.subr.bf16.mxu0 %v331_v4  ;;  %313 = vmatprep.subr.bf16.mxu1 %v331_v4  ;;  %v282_v23 = vld [vmem:[%s446_s2] ss:$0 sm:$0xff] }
   0xb   :  { %288 = vmatpush3.bf16.msra.mxu0 %v332_v5  ;;  %321 = vmatpush3.bf16.msra.mxu1 %v332_v5 }
   0xc   :  { %289 = vmatprep.subr.bf16.mxu0 %v333_v6  ;;  %314 = vmatprep.subr.bf16.mxu1 %v333_v6 }
   0xf   :  { %290 = vmatpush3.bf16.msra.mxu0 %v334_v7  ;;  %322 = vmatpush3.bf16.msra.mxu1 %v334_v7 }
  0x10   :  { %291 = vmatprep.subr.bf16.mxu0 %v335_v8  ;;  %315 = vmatprep.subr.bf16.mxu1 %v335_v8 }
  0x13   :  { %292 = vmatpush3.bf16.msra.mxu0 %v336_v9  ;;  %323 = vmatpush3.bf16.msra.mxu1 %v336_v9 }
  0x14   :  { %293 = vmatprep.subr.bf16.mxu0 %v337_v10  ;;  %316 = vmatprep.subr.bf16.mxu1 %v337_v10 }
  0x17   :  { %294 = vmatpush3.bf16.msra.mxu0 %v338_v13  ;;  %324 = vmatpush3.bf16.msra.mxu1 %v338_v13 }
  0x18   :  { %295 = vmatprep.subr.bf16.mxu0 %v339_v14  ;;  %317 = vmatprep.subr.bf16.mxu1 %v339_v14 }
  0x1b   :  { %296 = vmatpush3.bf16.msra.mxu0 %v340_v15  ;;  %325 = vmatpush3.bf16.msra.mxu1 %v340_v15 }
  0x1c   :  { %297 = vmatprep.subr.bf16.mxu0 %v341_v16  ;;  %318 = vmatprep.subr.bf16.mxu1 %v341_v16 }
  0x1f   :  { %298 = vmatpush3.bf16.msra.mxu0 %v342_v17  ;;  %326 = vmatpush3.bf16.msra.mxu1 %v342_v17 }
  0x22   :  { %212 = vmatmul.mubr.bf16.vlgmr.msra.gmra.mxu0 %v343_v18  ;;  %220 = vmatmul.mubr.bf16.vlgmr.msra.gmra.mxu1 %v346_v19 }
  0xe2   :  { %v299_v20 = vpop.f32.mrf.mxu0  ;;  %v305_v21 = vpop.f32.mrf.mxu1 }
  0xe4   :  { %v300_v22 = vpop.f32.mrf.mxu0  ;;  %v306_v24 = vpop.f32.mrf.mxu1 }
  0xe5   :  { %v301_v25 = vadd.f32 %v300_v22, %v299_v20  ;;  %v307_v26 = vadd.f32 %v306_v24, %v305_v21 }
  0xe6   :  { %v302_v27 = vpop.f32.mrf.mxu0  ;;  %v308_v28 = vpop.f32.mrf.mxu1 }
  0xe7   :  { %v250_v29 = vadd.f32 %v301_v25, %v282_v23  ;;  %v252_v30 = vadd.f32 %v307_v26, %v282_v23 }
  0xe8   :  { %v303_v31 = vpop.f32.mrf.mxu0  ;;  %v309_v32 = vpop.f32.mrf.mxu1 }
  0xe9   :  { %254 = vst [vmem:[%s447_s3] sm:$0xff] %v250_v29  ;;  %256 = vst [vmem:[%s447_s3 + $0x10] sm:$0xff] %v252_v30  ;;  %v304_v33 = vadd.f32 %v303_v31, %v302_v27  ;;  %v310_v34 = vadd.f32 %v309_v32, %v308_v28 }
  0xeb   :  { %v251_v35 = vadd.f32 %v304_v33, %v282_v23  ;;  %v253_v36 = vadd.f32 %v310_v34, %v282_v23 }
  0xed   :  { %255 = vst [vmem:[%s447_s3 + $0x8] sm:$0xff] %v251_v35  ;;  %257 = vst [vmem:[%s447_s3 + $0x18] sm:$0xff] %v253_v36 }

// kernel: mdm_simetric_forward.23
= control target key start
LH: loop header
LB: loop body
LE: loop exit
PB: predicated region body
PF: predicated region fallthrough
CT: control target
= control target key end

     0   :  { %s1441_s1 = inlined_call_operand.vmem [shape: bf16[512,256], index: 1, kind: input, shape index: {}]   ;;  %s1442_s0 = inlined_call_operand.vmem [shape: bf16[40,512], index: 0, kind: input, shape index: {}]   ;;  %s1443_s2 = inlined_call_operand.vmem [shape: f32[1,256], index: 2, kind: input, shape index: {}]   ;;  %s1444_s3 = inlined_call_operand.vmem [shape: bf16[40,256], index: 3, kind: input, shape index: {}]   ;;  %s1445_s4 = inlined_call_operand.vmem [shape: f32[1,256], index: 4, kind: input, shape index: {}]   ;;  %s1446_s5 = inlined_call_operand.vmem [shape: f32[1,256], index: 5, kind: input, shape index: {}]   ;;  %s1447_s6 = inlined_call_operand.vmem [shape: bf16[40,256], index: 6, kind: output, shape index: {}]  }
   0x1   :  { %v949_v0 = vld [vmem:[%s1441_s1 + $0x74] ss:$8 sps:$4 sm:$0xff]   ;;  %v953_v2 = vld [vmem:[%s1441_s1 + $0x70] ss:$8 sps:$4 sm:$0xff]   ;;  %v955_v4 = vld [vmem:[%s1441_s1 + $0x64] ss:$8 sps:$4 sm:$0xff]  }
   0x2   :  { %v951_v1 = vld [vmem:[%s1441_s1 + $0x174] ss:$8 sps:$4 sm:$0xff]   ;;  %495 = vmatprep.subr.bf16.mxu0 %v949_v0  ;;  %v954_v3 = vld [vmem:[%s1441_s1 + $0x170] ss:$8 sps:$4 sm:$0xff]   ;;  %v957_v5 = vld [vmem:[%s1441_s1 + $0x164] ss:$8 sps:$4 sm:$0xff]  }
   0x3   :  { %556 = vmatprep.subr.bf16.mxu1 %v951_v1  ;;  %496 = vmatpush1.bf16.msra.mxu0 %v953_v2  ;;  %v959_v6 = vld [vmem:[%s1441_s1 + $0x60] ss:$8 sps:$4 sm:$0xff]   ;;  %v961_v8 = vld [vmem:[%s1441_s1 + $0x54] ss:$8 sps:$4 sm:$0xff]   ;;  %v965_v10 = vld [vmem:[%s1441_s1 + $0x50] ss:$8 sps:$4 sm:$0xff]  }
   0x4   :  { %557 = vmatpush1.bf16.msra.mxu1 %v954_v3  ;;  %497 = vmatprep.subr.bf16.mxu0 %v955_v4  ;;  %v960_v7 = vld [vmem:[%s1441_s1 + $0x160] ss:$8 sps:$4 sm:$0xff]   ;;  %v963_v9 = vld [vmem:[%s1441_s1 + $0x154] ss:$8 sps:$4 sm:$0xff]   ;;  %v966_v11 = vld [vmem:[%s1441_s1 + $0x150] ss:$8 sps:$4 sm:$0xff]  }
   0x5   :  { %558 = vmatprep.subr.bf16.mxu1 %v957_v5  ;;  %v967_v12 = vld [vmem:[%s1441_s1 + $0x44] ss:$8 sps:$4 sm:$0xff]   ;;  %v971_v14 = vld [vmem:[%s1441_s1 + $0x40] ss:$8 sps:$4 sm:$0xff]   ;;  %v973_v16 = vld [vmem:[%s1441_s1 + $0x34] ss:$8 sps:$4 sm:$0xff]  }
   0x6   :  { %v969_v13 = vld [vmem:[%s1441_s1 + $0x144] ss:$8 sps:$4 sm:$0xff]   ;;  %v972_v15 = vld [vmem:[%s1441_s1 + $0x140] ss:$8 sps:$4 sm:$0xff]   ;;  %v975_v17 = vld [vmem:[%s1441_s1 + $0x134] ss:$8 sps:$4 sm:$0xff]  }
   0x7   :  { %498 = vmatpush1.bf16.msra.mxu0 %v959_v6  ;;  %v977_v18 = vld [vmem:[%s1441_s1 + $0x30] ss:$8 sps:$4 sm:$0xff]   ;;  %v979_v20 = vld [vmem:[%s1441_s1 + $0x24] ss:$8 sps:$4 sm:$0xff]   ;;  %v983_v22 = vld [vmem:[%s1441_s1 + $0x20] ss:$8 sps:$4 sm:$0xff]  }
   0x8   :  { %559 = vmatpush1.bf16.msra.mxu1 %v960_v7  ;;  %499 = vmatprep.subr.bf16.mxu0 %v961_v8  ;;  %v978_v19 = vld [vmem:[%s1441_s1 + $0x130] ss:$8 sps:$4 sm:$0xff]   ;;  %v981_v21 = vld [vmem:[%s1441_s1 + $0x124] ss:$8 sps:$4 sm:$0xff]   ;;  %v984_v23 = vld [vmem:[%s1441_s1 + $0x120] ss:$8 sps:$4 sm:$0xff]  }
   0x9   :  { %560 = vmatprep.subr.bf16.mxu1 %v963_v9  ;;  %v985_v24 = vld [vmem:[%s1441_s1 + $0x14] ss:$8 sps:$4 sm:$0xff]   ;;  %v989_v26 = vld [vmem:[%s1441_s1 + $0x10] ss:$8 sps:$4 sm:$0xff]   ;;  %v991_v28 = vld [vmem:[%s1441_s1 + $0x4] ss:$8 sps:$4 sm:$0xff]  }
   0xa   :  { %v987_v25 = vld [vmem:[%s1441_s1 + $0x114] ss:$8 sps:$4 sm:$0xff]   ;;  %v990_v27 = vld [vmem:[%s1441_s1 + $0x110] ss:$8 sps:$4 sm:$0xff]   ;;  %v993_v29 = vld [vmem:[%s1441_s1 + $0x104] ss:$8 sps:$4 sm:$0xff]  }
   0xb   :  { %500 = vmatpush1.bf16.msra.mxu0 %v965_v10  ;;  %v995_v30 = vld [vmem:[%s1441_s1] ss:$8 sps:$4 sm:$0xff]   ;;  %v997_v32 = vld [vmem:[%s1441_s1 + $0xf4] ss:$8 sps:$4 sm:$0xff]   ;;  %v1001_v34 = vld [vmem:[%s1441_s1 + $0xf0] ss:$8 sps:$4 sm:$0xff]  }
   0xc   :  { %561 = vmatpush1.bf16.msra.mxu1 %v966_v11  ;;  %501 = vmatprep.subr.bf16.mxu0 %v967_v12  ;;  %v996_v31 = vld [vmem:[%s1441_s1 + $0x100] ss:$8 sps:$4 sm:$0xff]   ;;  %v999_v33 = vld [vmem:[%s1441_s1 + $0x1f4] ss:$8 sps:$4 sm:$0xff]   ;;  %v1002_v35 = vld [vmem:[%s1441_s1 + $0x1f0] ss:$8 sps:$4 sm:$0xff]  }
   0xd   :  { %562 = vmatprep.subr.bf16.mxu1 %v969_v13  ;;  %v1003_v36 = vld [vmem:[%s1441_s1 + $0xe4] ss:$8 sps:$4 sm:$0xff]   ;;  %v1007_v38 = vld [vmem:[%s1441_s1 + $0xe0] ss:$8 sps:$4 sm:$0xff]   ;;  %v1009_v40 = vld [vmem:[%s1441_s1 + $0xd4] ss:$8 sps:$4 sm:$0xff]  }
   0xe   :  { %v1005_v37 = vld [vmem:[%s1441_s1 + $0x1e4] ss:$8 sps:$4 sm:$0xff]   ;;  %v1008_v39 = vld [vmem:[%s1441_s1 + $0x1e0] ss:$8 sps:$4 sm:$0xff]   ;;  %v1011_v41 = vld [vmem:[%s1441_s1 + $0x1d4] ss:$8 sps:$4 sm:$0xff]  }
   0xf   :  { %502 = vmatpush1.bf16.msra.mxu0 %v971_v14  ;;  %v1013_v42 = vld [vmem:[%s1441_s1 + $0xd0] ss:$8 sps:$4 sm:$0xff]   ;;  %v1015_v44 = vld [vmem:[%s1441_s1 + $0xc4] ss:$8 sps:$4 sm:$0xff]   ;;  %v1019_v46 = vld [vmem:[%s1441_s1 + $0xc0] ss:$8 sps:$4 sm:$0xff]   ;;  %v652_v14 = vlaneseq }
  0x10   :  { %563 = vmatpush1.bf16.msra.mxu1 %v972_v15  ;;  %503 = vmatprep.subr.bf16.mxu0 %v973_v16  ;;  %v1014_v43 = vld [vmem:[%s1441_s1 + $0x1d0] ss:$8 sps:$4 sm:$0xff]   ;;  %v1017_v45 = vld [vmem:[%s1441_s1 + $0x1c4] ss:$8 sps:$4 sm:$0xff]   ;;  %v1020_v47 = vld [vmem:[%s1441_s1 + $0x1c0] ss:$8 sps:$4 sm:$0xff]  }
  0x11   :  { %564 = vmatprep.subr.bf16.mxu1 %v975_v17  ;;  %v1021_v48 = vld [vmem:[%s1441_s1 + $0xb4] ss:$8 sps:$4 sm:$0xff]   ;;  %v1025_v52 = vld [vmem:[%s1441_s1 + $0xb0] ss:$8 sps:$4 sm:$0xff]   ;;  %v1027_v54 = vld [vmem:[%s1441_s1 + $0xa4] ss:$8 sps:$4 sm:$0xff]  }
  0x12   :  { %v1047_v49 = vld [vmem:[%s1442_s0 + $0x4] ss:$16 sps:$4 sm:$0xff]   ;;  %v1050_v51 = vld [vmem:[%s1442_s0 + $0xc] ss:$16 sps:$4 sm:$0xff]   ;;  %v1026_v53 = vld [vmem:[%s1441_s1 + $0x1b0] ss:$8 sps:$4 sm:$0xff]  }
  0x13   :  { %504 = vmatpush1.bf16.msra.mxu0 %v977_v18  ;;  %v1023_v50 = vld [vmem:[%s1441_s1 + $0x1b4] ss:$8 sps:$4 sm:$0xff]   ;;  %527 = vmatprep.mubr.bf16.mxu0 %v1047_v49  ;;  %v1029_v55 = vld [vmem:[%s1441_s1 + $0x1a4] ss:$8 sps:$4 sm:$0xff]   ;;  %v1031_v56 = vld [vmem:[%s1441_s1 + $0xa0] ss:$8 sps:$4 sm:$0xff]  }
  0x14   :  { %565 = vmatpush1.bf16.msra.mxu1 %v978_v19  ;;  %505 = vmatprep.subr.bf16.mxu0 %v979_v20  ;;  %v1032_v57 = vld [vmem:[%s1441_s1 + $0x1a0] ss:$8 sps:$4 sm:$0xff]   ;;  %v1033_v58 = vld [vmem:[%s1441_s1 + $0x94] ss:$8 sps:$4 sm:$0xff]   ;;  %v1037_v60 = vld [vmem:[%s1441_s1 + $0x90] ss:$8 sps:$4 sm:$0xff]  }
  0x15   :  { %566 = vmatprep.subr.bf16.mxu1 %v981_v21  ;;  %588 = vmatprep.mubr.bf16.mxu1 %v1050_v51  ;;  %v1035_v59 = vld [vmem:[%s1441_s1 + $0x194] ss:$8 sps:$4 sm:$0xff]   ;;  %v1038_v61 = vld [vmem:[%s1441_s1 + $0x190] ss:$8 sps:$4 sm:$0xff]   ;;  %v1039_v62 = vld [vmem:[%s1441_s1 + $0x84] ss:$8 sps:$4 sm:$0xff]  }
  0x16   :  { %v1041_v63 = vld [vmem:[%s1441_s1 + $0x184] ss:$8 sps:$4 sm:$0xff]   ;;  %v1043_v0 = vld [vmem:[%s1441_s1 + $0x80] ss:$8 sps:$4 sm:$0xff]   ;;  %v653_v15 = vshrl.u32 %v652_v14, 7 }
  0x17   :  { %506 = vmatpush1.bf16.msra.mxu0 %v983_v22  ;;  %v1044_v1 = vld [vmem:[%s1441_s1 + $0x180] ss:$8 sps:$4 sm:$0xff]   ;;  %v1051_v4 = vld [vmem:[%s1442_s0 + $0x24] ss:$16 sps:$4 sm:$0xff]   ;;  %v1053_v5 = vld [vmem:[%s1442_s0 + $0x2c] ss:$16 sps:$4 sm:$0xff]  }
  0x18   :  { %567 = vmatpush1.bf16.msra.mxu1 %v984_v23  ;;  %507 = vmatprep.subr.bf16.mxu0 %v985_v24  ;;  %v1045_v2 = vld [vmem:[%s1442_s0] ss:$16 sps:$4 sm:$0xff]   ;;  %v1048_v3 = vld [vmem:[%s1442_s0 + $0x8] ss:$16 sps:$4 sm:$0xff]   ;;  %v1328_v16 = vsub.s32 0, %v653_v15  ;;  %v1333_v18 = vsub.s32 1, %v653_v15 }
  0x19   :  { %568 = vmatprep.subr.bf16.mxu1 %v987_v25  ;;  %v55_v6 = vld [vmem:[%s1442_s0 + $0x40] sm:$0xff]  ;;  %v56_v7 = vld [vmem:[%s1442_s0 + $0x48] sm:$0xff] }
  0x1a   :  { %v1055_v8 = vld [vmem:[%s1442_s0 + $0x20] ss:$16 sps:$4 sm:$0xff]   ;;  %v1056_v9 = vld [vmem:[%s1442_s0 + $0x28] ss:$16 sps:$4 sm:$0xff]   ;;  %v872_v10 = vcombine.high %v55_v6, %v55_v6  ;;  %v874_v11 = vcombine.high %v56_v7, %v56_v7  ;;  %v871_v12 = vcombine.low %v55_v6, %v55_v6  ;;  %v873_v13 = vcombine.low %v56_v7, %v56_v7 }
  0x1b   :  { %508 = vmatpush1.bf16.msra.mxu0 %v989_v26  ;;  %v650_v17 = vld [vmem:[%s1443_s2] sm:$0x3] }
  0x1c   :  { %569 = vmatpush1.bf16.msra.mxu1 %v990_v27  ;;  %509 = vmatprep.subr.bf16.mxu0 %v991_v28  ;;  %v1336_v19 = vrot.slane %v650_v17, %v1328_v16  ;;  %v672_v22 = vld [vmem:[%s1444_s3] sm:$0xff]  ;;  %v1342_v24 = vrot.slane %v650_v17, %v1333_v18 }
  0x1d   :  { %570 = vmatprep.subr.bf16.mxu1 %v993_v29  ;;  %v677_v29 = vunpack.c.l.bf16 %v672_v22 }
  0x1f   :  { %510 = vmatpush1.bf16.msra.mxu0 %v995_v30  ;;  %v678_v30 = vunpack.c.h.bf16 %v672_v22 }
  0x20   :  { %571 = vmatpush1.bf16.msra.mxu1 %v996_v31  ;;  %511 = vmatprep.subr.bf16.mxu0 %v997_v32  ;;  %v673_v31 = vld [vmem:[%s1444_s3 + $0x8] sm:$0xff] }
  0x21   :  { %572 = vmatprep.subr.bf16.mxu1 %v999_v33 }
  0x23   :  { %512 = vmatpush2.bf16.msra.mxu0 %v1001_v34 }
  0x24   :  { %573 = vmatpush2.bf16.msra.mxu1 %v1002_v35  ;;  %513 = vmatprep.subr.bf16.mxu0 %v1003_v36 }
  0x25   :  { %574 = vmatprep.subr.bf16.mxu1 %v1005_v37 }
  0x27   :  { %514 = vmatpush2.bf16.msra.mxu0 %v1007_v38  ;;  %v679_v38 = vunpack.c.l.bf16 %v673_v31 }
  0x28   :  { %575 = vmatpush2.bf16.msra.mxu1 %v1008_v39  ;;  %515 = vmatprep.subr.bf16.mxu0 %v1009_v40  ;;  %v680_v39 = vunpack.c.h.bf16 %v673_v31 }
  0x29   :  { %576 = vmatprep.subr.bf16.mxu1 %v1011_v41 }
  0x2b   :  { %516 = vmatpush2.bf16.msra.mxu0 %v1013_v42 }
  0x2c   :  { %577 = vmatpush2.bf16.msra.mxu1 %v1014_v43  ;;  %517 = vmatprep.subr.bf16.mxu0 %v1015_v44  ;;  %v674_v44 = vld [vmem:[%s1444_s3 + $0x10] sm:$0xff] }
  0x2d   :  { %578 = vmatprep.subr.bf16.mxu1 %v1017_v45 }
  0x2f   :  { %518 = vmatpush2.bf16.msra.mxu0 %v1019_v46 }
  0x30   :  { %579 = vmatpush2.bf16.msra.mxu1 %v1020_v47  ;;  %519 = vmatprep.subr.bf16.mxu0 %v1021_v48 }
  0x31   :  { %580 = vmatprep.subr.bf16.mxu1 %v1023_v50 }
  0x33   :  { %520 = vmatpush2.bf16.msra.mxu0 %v1025_v52  ;;  %v681_v52 = vunpack.c.l.bf16 %v674_v44 }
  0x34   :  { %581 = vmatpush2.bf16.msra.mxu1 %v1026_v53  ;;  %521 = vmatprep.subr.bf16.mxu0 %v1027_v54  ;;  %v682_v53 = vunpack.c.h.bf16 %v674_v44 }
  0x35   :  { %582 = vmatprep.subr.bf16.mxu1 %v1029_v55 }
  0x37   :  { %522 = vmatpush2.bf16.msra.mxu0 %v1031_v56 }
  0x38   :  { %583 = vmatpush2.bf16.msra.mxu1 %v1032_v57  ;;  %523 = vmatprep.subr.bf16.mxu0 %v1033_v58  ;;  %v675_v58 = vld [vmem:[%s1444_s3 + $0x18] sm:$0xff] }
  0x39   :  { %584 = vmatprep.subr.bf16.mxu1 %v1035_v59 }
  0x3b   :  { %524 = vmatpush2.bf16.msra.mxu0 %v1037_v60 }
  0x3c   :  { %585 = vmatpush2.bf16.msra.mxu1 %v1038_v61  ;;  %525 = vmatprep.subr.bf16.mxu0 %v1039_v62 }
  0x3d   :  { %586 = vmatprep.subr.bf16.mxu1 %v1041_v63 }
  0x3f   :  { %526 = vmatpush2.bf16.msra.mxu0 %v1043_v0 }
  0x40   :  { %587 = vmatpush2.bf16.msra.mxu1 %v1044_v1 }
  0x42   :  { %528 = vmatmul.mubr.bf16.vlgmr.msra.gmra.mxu0 %v1045_v2  ;;  %v683_v2 = vunpack.c.l.bf16 %v675_v58 }
  0x43   :  { %589 = vmatmul.mubr.bf16.vlgmr.msra.gmra.mxu1 %v1048_v3  ;;  %537 = vmatprep.mubr.bf16.mxu0 %v1051_v4  ;;  %v684_v3 = vunpack.c.h.bf16 %v675_v58 }
  0x44   :  { %598 = vmatprep.mubr.bf16.mxu1 %v1053_v5 }
  0x4a   :  { %538 = vmatmul.mubr.bf16.gmra.mxu0 %v1055_v8  ;;  %v676_v8 = vld [vmem:[%s1444_s3 + $0x20] sm:$0xff] }
  0x4b   :  { %599 = vmatmul.mubr.bf16.gmra.mxu1 %v1056_v9  ;;  %547 = vmatprep.mubr.bf16.mxu0 %v872_v10  ;;  %v685_v17 = vunpack.c.l.bf16 %v676_v8 }
  0x4c   :  { %608 = vmatprep.mubr.bf16.mxu1 %v874_v11 }
  0x52   :  { %548 = vmatmul.mubr.bf16.gmra.mxu0 %v871_v12 }
  0x53   :  { %609 = vmatmul.mubr.bf16.gmra.mxu1 %v873_v13 }
 0x102   :  { %v529_v20 = vpop.f32.mrf.mxu0 }
 0x103   :  { %v590_v21 = vpop.f32.mrf.mxu1 }
 0x104   :  { %v591_v23 = vadd.f32 %v590_v21, %v529_v20  ;;  %v531_v25 = vpop.f32.mrf.mxu0  ;;  %v686_v20 = vunpack.c.h.bf16 %v676_v8 }
 0x105   :  { %v592_v26 = vpop.f32.mrf.mxu1 }
 0x106   :  { %v662_v27 = vadd.f32 %v1336_v19, %v591_v23  ;;  %v593_v28 = vadd.f32 %v592_v26, %v531_v25  ;;  %v533_v32 = vpop.f32.mrf.mxu0 }
 0x107   :  { %v594_v33 = vpop.f32.mrf.mxu1 }
 0x108   :  { %v663_v34 = vadd.f32 %v1342_v24, %v593_v28  ;;  %v595_v35 = vadd.f32 %v594_v33, %v533_v32  ;;  %v535_v36 = vpop.f32.mrf.mxu0  ;;  %v687_v42 = vadd.f32 %v677_v29, %v662_v27 }
 0x109   :  { %v596_v37 = vpop.f32.mrf.mxu1 }
 0x10a   :  { %v664_v40 = vadd.f32 %v1336_v19, %v595_v35  ;;  %v597_v41 = vadd.f32 %v596_v37, %v535_v36  ;;  %v688_v43 = vadd.f32 %v678_v30, %v663_v34  ;;  %v539_v45 = vpop.f32.mrf.mxu0 }
 0x10b   :  { %v600_v46 = vpop.f32.mrf.mxu1 }
 0x10c   :  { %v665_v47 = vadd.f32 %v1342_v24, %v597_v41  ;;  %v601_v48 = vadd.f32 %v600_v46, %v539_v45  ;;  %v697_v49 = vadd.f32 %v688_v43, %v687_v42  ;;  %v541_v50 = vpop.f32.mrf.mxu0  ;;  %v689_v56 = vadd.f32 %v679_v38, %v664_v40 }
 0x10d   :  { %v602_v51 = vpop.f32.mrf.mxu1 }
 0x10e   :  { %v666_v54 = vadd.f32 %v1336_v19, %v601_v48  ;;  %v603_v55 = vadd.f32 %v602_v51, %v541_v50  ;;  %698 = vadd.xlane.f32.xlu0 %v697_v49  ;;  %v690_v57 = vadd.f32 %v680_v39, %v665_v47  ;;  %v543_v59 = vpop.f32.mrf.mxu0 }
 0x10f   :  { %v604_v60 = vpop.f32.mrf.mxu1 }
 0x110   :  { %v667_v61 = vadd.f32 %v1342_v24, %v603_v55  ;;  %v605_v62 = vadd.f32 %v604_v60, %v543_v59  ;;  %v700_v63 = vadd.f32 %v690_v57, %v689_v56  ;;  %v545_v0 = vpop.f32.mrf.mxu0  ;;  %v691_v6 = vadd.f32 %v681_v52, %v666_v54 }
 0x111   :  { %v606_v1 = vpop.f32.mrf.mxu1 }
 0x112   :  { %v668_v4 = vadd.f32 %v1336_v19, %v605_v62  ;;  %v607_v5 = vadd.f32 %v606_v1, %v545_v0  ;;  %701 = vadd.xlane.f32.xlu0 %v700_v63  ;;  %v692_v7 = vadd.f32 %v682_v53, %v667_v61  ;;  %v549_v9 = vpop.f32.mrf.mxu0 }
 0x113   :  { %v610_v10 = vpop.f32.mrf.mxu1 }
 0x114   :  { %v669_v11 = vadd.f32 %v1342_v24, %v607_v5  ;;  %v611_v12 = vadd.f32 %v610_v10, %v549_v9  ;;  %v703_v13 = vadd.f32 %v692_v7, %v691_v6  ;;  %v551_v14 = vpop.f32.mrf.mxu0  ;;  %v693_v23 = vadd.f32 %v683_v2, %v668_v4 }
 0x115   :  { %v612_v15 = vpop.f32.mrf.mxu1 }
 0x116   :  { %v670_v21 = vadd.f32 %v1336_v19, %v611_v12  ;;  %v613_v22 = vadd.f32 %v612_v15, %v551_v14  ;;  %704 = vadd.xlane.f32.xlu1 %v703_v13  ;;  %v694_v25 = vadd.f32 %v684_v3, %v669_v11  ;;  %v553_v26 = vpop.f32.mrf.mxu0  ;;  %v778_v15 = vld [vmem:[%s1445_s4] sm:$0x3] }
 0x117   :  { %v614_v27 = vpop.f32.mrf.mxu1 }
 0x118   :  { %v671_v28 = vadd.f32 %v1342_v24, %v613_v22  ;;  %v706_v29 = vadd.f32 %v694_v25, %v693_v23  ;;  %v554_v30 = vpop.f32.mrf.mxu0  ;;  %v695_v32 = vadd.f32 %v685_v17, %v670_v21  ;;  %v800_v17 = vld [vmem:[%s1446_s5] sm:$0x3]  ;;  %v783_v22 = vrot.slane %v778_v15, %v1328_v16 }
 0x119   :  { %v615_v31 = vpop.f32.mrf.mxu1  ;;  %v805_v27 = vrot.slane %v800_v17, %v1328_v16 }
 0x11a   :  { %707 = vadd.xlane.f32.xlu1 %v706_v29  ;;  %v696_v33 = vadd.f32 %v686_v20, %v671_v28  ;;  %v809_v28 = vrot.slane %v800_v17, %v1333_v18 }
 0x11c   :  { %v709_v34 = vadd.f32 %v696_v33, %v695_v32 }
 0x11e   :  { %710 = vadd.xlane.f32.xlu0 %v709_v34 }
 0x197   :  { %v699_v35 = vpop.xlane.xlu0 %698 }
 0x198   :  { %v713_v36 = vmul.f32 0.00390625, %v699_v35 }
 0x19a   :  { %v1366_v37 = vsub.f32 %v687_v42, %v713_v36  ;;  %v1368_v19 = vsub.f32 %v688_v43, %v713_v36 }
 0x19b   :  { %v702_v38 = vpop.xlane.xlu0 %701 }
 0x19c   :  { %v714_v39 = vmul.f32 0.00390625, %v702_v38  ;;  %v728_v40 = vmul.f32 %v1366_v37, %v1366_v37  ;;  %v729_v24 = vmul.f32 %v1368_v19, %v1368_v19 }
 0x19e   :  { %v1374_v41 = vsub.f32 %v689_v56, %v714_v39  ;;  %v1376_v44 = vsub.f32 %v690_v57, %v714_v39  ;;  %v738_v45 = vadd.f32 %v729_v24, %v728_v40 }
 0x19f   :  { %v705_v46 = vpop.xlane.xlu1 %704 }
 0x1a0   :  { %v715_v47 = vmul.f32 0.00390625, %v705_v46  ;;  %739 = vadd.xlane.f32.xlu1 %v738_v45  ;;  %v730_v42 = vmul.f32 %v1374_v41, %v1374_v41  ;;  %v731_v43 = vmul.f32 %v1376_v44, %v1376_v44 }
 0x1a2   :  { %v1382_v48 = vsub.f32 %v691_v6, %v715_v47  ;;  %v1384_v49 = vsub.f32 %v692_v7, %v715_v47  ;;  %v741_v50 = vadd.f32 %v731_v43, %v730_v42 }
 0x1a3   :  { %v708_v51 = vpop.xlane.xlu1 %707 }
 0x1a4   :  { %v716_v52 = vmul.f32 0.00390625, %v708_v51  ;;  %742 = vadd.xlane.f32.xlu0 %v741_v50  ;;  %v732_v53 = vmul.f32 %v1382_v48, %v1382_v48  ;;  %v733_v54 = vmul.f32 %v1384_v49, %v1384_v49 }
 0x1a6   :  { %v1390_v55 = vsub.f32 %v693_v23, %v716_v52  ;;  %v1392_v56 = vsub.f32 %v694_v25, %v716_v52  ;;  %v744_v57 = vadd.f32 %v733_v54, %v732_v53  ;;  %v787_v23 = vrot.slane %v778_v15, %v1333_v18 }
 0x1a7   :  { %v711_v58 = vpop.xlane.xlu0 %710 }
 0x1a8   :  { %v717_v59 = vmul.f32 0.00390625, %v711_v58  ;;  %745 = vadd.xlane.f32.xlu1 %v744_v57  ;;  %v734_v60 = vmul.f32 %v1390_v55, %v1390_v55  ;;  %v735_v61 = vmul.f32 %v1392_v56, %v1392_v56 }
 0x1aa   :  { %v1398_v62 = vsub.f32 %v695_v32, %v717_v59  ;;  %v1400_v63 = vsub.f32 %v696_v33, %v717_v59  ;;  %v747_v0 = vadd.f32 %v735_v61, %v734_v60 }
 0x1ac   :  { %748 = vadd.xlane.f32.xlu0 %v747_v0  ;;  %v736_v1 = vmul.f32 %v1398_v62, %v1398_v62  ;;  %v737_v2 = vmul.f32 %v1400_v63, %v1400_v63 }
 0x1ae   :  { %v750_v3 = vadd.f32 %v737_v2, %v736_v1 }
 0x1b0   :  { %751 = vadd.xlane.f32.xlu1 %v750_v3 }
 0x229   :  { %v740_v4 = vpop.xlane.xlu1 %739 }
 0x22a   :  { %v753_v5 = vmul.f32 0.00390625, %v740_v4 }
 0x22c   :  { %v758_v6 = vadd.f32 1e-05, %v753_v5 }
 0x22d   :  { %v743_v7 = vpop.xlane.xlu0 %742 }
 0x22e   :  { %1061 = vrsqrt.f32 %v758_v6  ;;  %v754_v8 = vmul.f32 0.00390625, %v743_v7 }
 0x230   :  { %v759_v9 = vadd.f32 1e-05, %v754_v8 }
 0x231   :  { %v746_v10 = vpop.xlane.xlu1 %745 }
 0x232   :  { %1063 = vrsqrt.f32 %v759_v9  ;;  %v755_v11 = vmul.f32 0.00390625, %v746_v10 }
 0x234   :  { %v760_v12 = vadd.f32 1e-05, %v755_v11 }
 0x235   :  { %v749_v13 = vpop.xlane.xlu0 %748 }
 0x236   :  { %1065 = vrsqrt.f32 %v760_v12  ;;  %v756_v14 = vmul.f32 0.00390625, %v749_v13 }
 0x238   :  { %v761_v20 = vadd.f32 1e-05, %v756_v14 }
 0x239   :  { %v752_v21 = vpop.xlane.xlu1 %751 }
 0x23a   :  { %1067 = vrsqrt.f32 %v761_v20  ;;  %v757_v25 = vmul.f32 0.00390625, %v752_v21 }
 0x23b   :  { %v1062_v26 = vpop.eup %1061 }
 0x23c   :  { %v768_v29 = vmul.f32 %v1062_v26, %v1366_v37  ;;  %v769_v30 = vmul.f32 %v1062_v26, %v1368_v19  ;;  %v762_v31 = vadd.f32 1e-05, %v757_v25 }
 0x23e   :  { %v790_v32 = vmul.f32 %v783_v22, %v768_v29  ;;  %v791_v33 = vmul.f32 %v787_v23, %v769_v30  ;;  %1069 = vrsqrt.f32 %v762_v31 }
 0x23f   :  { %v1064_v34 = vpop.eup %1063 }
 0x240   :  { %v812_v35 = vadd.f32 %v805_v27, %v790_v32  ;;  %v813_v36 = vadd.f32 %v809_v28, %v791_v33  ;;  %v770_v38 = vmul.f32 %v1064_v34, %v1374_v41  ;;  %v771_v39 = vmul.f32 %v1064_v34, %v1376_v44 }
 0x242   :  { %v944_v40 = vpack.c.bf16 %v813_v36, %v812_v35  ;;  %v792_v24 = vmul.f32 %v783_v22, %v770_v38  ;;  %v793_v16 = vmul.f32 %v787_v23, %v771_v39 }
 0x243   :  { %v1066_v45 = vpop.eup %1065 }
 0x244   :  { %854 = vst [vmem:[%s1447_s6] sm:$0xff] %v944_v40  ;;  %v814_v18 = vadd.f32 %v805_v27, %v792_v24  ;;  %v815_v37 = vadd.f32 %v809_v28, %v793_v16  ;;  %v772_v19 = vmul.f32 %v1066_v45, %v1382_v48  ;;  %v773_v46 = vmul.f32 %v1066_v45, %v1384_v49 }
 0x246   :  { %v945_v47 = vpack.c.bf16 %v815_v37, %v814_v18  ;;  %v794_v42 = vmul.f32 %v783_v22, %v772_v19  ;;  %v795_v43 = vmul.f32 %v787_v23, %v773_v46 }
 0x247   :  { %v1068_v41 = vpop.eup %1067 }
 0x248   :  { %855 = vst [vmem:[%s1447_s6 + $0x8] sm:$0xff] %v945_v47  ;;  %v816_v44 = vadd.f32 %v805_v27, %v794_v42  ;;  %v817_v50 = vadd.f32 %v809_v28, %v795_v43  ;;  %v774_v51 = vmul.f32 %v1068_v41, %v1390_v55  ;;  %v775_v52 = vmul.f32 %v1068_v41, %v1392_v56 }
 0x24a   :  { %v946_v53 = vpack.c.bf16 %v817_v50, %v816_v44  ;;  %v796_v54 = vmul.f32 %v783_v22, %v774_v51  ;;  %v797_v57 = vmul.f32 %v787_v23, %v775_v52 }
 0x24b   :  { %v1070_v48 = vpop.eup %1069 }
 0x24c   :  { %856 = vst [vmem:[%s1447_s6 + $0x10] sm:$0xff] %v946_v53  ;;  %v818_v49 = vadd.f32 %v805_v27, %v796_v54  ;;  %v819_v58 = vadd.f32 %v809_v28, %v797_v57  ;;  %v776_v59 = vmul.f32 %v1070_v48, %v1398_v62  ;;  %v777_v60 = vmul.f32 %v1070_v48, %v1400_v63 }
 0x24e   :  { %v947_v61 = vpack.c.bf16 %v819_v58, %v818_v49  ;;  %v798_v0 = vmul.f32 %v783_v22, %v776_v59  ;;  %v799_v1 = vmul.f32 %v787_v23, %v777_v60 }
 0x250   :  { %857 = vst [vmem:[%s1447_s6 + $0x18] sm:$0xff] %v947_v61  ;;  %v820_v55 = vadd.f32 %v805_v27, %v798_v0  ;;  %v821_v56 = vadd.f32 %v809_v28, %v799_v1 }
 0x252   :  { %v948_v2 = vpack.c.bf16 %v821_v56, %v820_v55 }
 0x254   :  { %858 = vst [vmem:[%s1447_s6 + $0x20] sm:$0xff] %v948_v2 }

</bundles_post_ra>
